<compile_context>
chip_gen: v7x
topology: tpu7x:2x2x1
jax: 0.10.0
libtpu: 0.0.40
codegen_flags: <defaults>
</compile_context>

<pallas_src>
import functools

import jax
import jax.numpy as jnp
from jax.experimental import pallas as pl
from jax.experimental.pallas import tpu as pltpu

EPS = 1e-5  # torch.nn.LayerNorm default eps


def _layernorm(x, g, b):
    mu = jnp.mean(x, axis=-1, keepdims=True)
    var = jnp.mean(jnp.square(x - mu), axis=-1, keepdims=True)
    return (x - mu) * jax.lax.rsqrt(var + EPS) * g + b


# ----------------------------- fused encoder kernel ----------------------------- #

def _encoder_kernel(B, T, heads,
                    x_ref, small_ref, b1_ref, wqkv_ref, wo_ref, w1_ref, w2_ref,
                    lnf_ref, o_ref):
    """grid = (depth,).  The (B*T, C) activation lives in the resident output block
    `o_ref` across layers; weights for layer l are streamed (double-buffered) by the
    BlockSpec index_map."""
    layer = pl.program_id(0)
    n_layers = pl.num_programs(0)

    @pl.when(layer == 0)
    def _():
        o_ref[...] = x_ref[...]                       # load activations once

    x = o_ref[...]                                    # (B*T, C) f32, resident carry
    BT, C = x.shape
    H = heads
    D = C // H
    G = B * H
    scale = 1.0 / (D ** 0.5)

    small = small_ref[0]                              # (6, C) f32 packed params
    ln1_g, ln1_b = small[0:1], small[1:2]
    bo = small[2:3]
    ln2_g, ln2_b = small[3:4], small[4:5]
    b2 = small[5:6]
    b1 = b1_ref[0]                                    # (1, F) f32

    # ---- pre-norm multi-head self-attention (fused QKV) + residual ----
    xn = _layernorm(x, ln1_g, ln1_b).astype(jnp.bfloat16)
    qkv = jnp.dot(xn, wqkv_ref[0], preferred_element_type=jnp.float32)   # (B*T, 3C) f32

    # One head-major relayout for q, k, v together: (B, T, 3H, D) -> (B, 3H, T, D).
    qkvh = pltpu.einshape("bthd->bhtd", qkv.reshape(B, T, 3 * H, D))
    q = (qkvh[:, 0 * H:1 * H] * scale).astype(jnp.bfloat16).reshape(G, T, D)
    k = qkvh[:, 1 * H:2 * H].astype(jnp.bfloat16).reshape(G, T, D)
    v = qkvh[:, 2 * H:3 * H].astype(jnp.bfloat16).reshape(G, T, D)

    s = jnp.einsum("gqd,gkd->gqk", q, k,
                   preferred_element_type=jnp.float32)                    # (G, T, T) f32
    s = s - jnp.max(s, axis=-1, keepdims=True)
    p = jnp.exp(s)
    p = p * pl.reciprocal(jnp.sum(p, axis=-1, keepdims=True), approx=True)
    ctx = jnp.einsum("gqk,gkd->gqd", p.astype(jnp.bfloat16), v,
                     preferred_element_type=jnp.float32)                  # (G, T, D) f32
    ctx = pltpu.einshape("bhtd->bthd", ctx.reshape(B, H, T, D)).reshape(BT, C)
    attn = jnp.dot(ctx.astype(jnp.bfloat16), wo_ref[0],
                   preferred_element_type=jnp.float32) + bo
    x = x + attn

    # ---- pre-norm GELU feed-forward + residual ----
    xn2 = _layernorm(x, ln2_g, ln2_b).astype(jnp.bfloat16)
    hid = jnp.dot(xn2, w1_ref[0], preferred_element_type=jnp.float32) + b1
    hid = jax.nn.gelu(hid, approximate=True).astype(jnp.bfloat16)
    ff = jnp.dot(hid, w2_ref[0], preferred_element_type=jnp.float32) + b2
    x = x + ff

    # ---- write the carry; fuse the final LayerNorm on the last layer ----
    @pl.when(layer < n_layers - 1)
    def _():
        o_ref[...] = x

    @pl.when(layer == n_layers - 1)
    def _():
        lnf = lnf_ref[...]                            # (2, C): [gamma, beta]
        o_ref[...] = _layernorm(x, lnf[0:1], lnf[1:2]).astype(o_ref.dtype)


# ------------------------------ pallas_call wrapper ------------------------------ #

def _vmem_limit_bytes(BT, T, C, F, B, heads):
    """Generation-aware VMEM request: generous, but with headroom below capacity."""
    G = B * heads
    w_bf16 = (C * 3 * C + C * C + C * F + F * C) * 2          # one layer's matmul weights
    p_small = (6 * C + F + 2 * C) * 4                          # packed params (f32)
    act = BT * C * 4                                           # resident carry
    inter = (3 * BT * C + 2 * G * T * T + 2 * BT * F + 4 * BT * C) * 4
    needed = 2 * (w_bf16 + p_small) + 2 * act + inter
    needed = int(needed * 1.5) + (8 << 20)
    try:
        cap = pltpu.get_tpu_info().vmem_capacity_bytes         # 64 MiB v7x, 128 MiB v5e/v6e
    except Exception:                                          # noqa: BLE001 - conservative fallback
        cap = 64 << 20
    headroom = 16 << 20                                        # Mosaic internal scratch etc.
    return min(max(needed, 48 << 20), cap - headroom)


def checkpointed_xtransformer_encoder(x, params, heads,
                                      needs_permute=True, exit_permute=True):
    """x: (B, C, T) float32, like the PyTorch module's channels-mid input."""
    if needs_permute:
        x = jnp.transpose(x, (0, 2, 1))               # (B, T, C) channels-last
    B, T, C = x.shape
    assert C % heads == 0
    L = params["wqkv"].shape[0]
    F = params["w1"].shape[2]
    BT = B * T
    x2 = x.reshape(BT, C)                             # fold batch into matmul rows

    kernel = functools.partial(_encoder_kernel, B, T, heads)
    layer_spec = lambda shape: pl.BlockSpec((1,) + shape, lambda l: (l, 0, 0))

    out = pl.pallas_call(
        kernel,
        out_shape=jax.ShapeDtypeStruct((BT, C), x.dtype),
        grid=(L,),
        in_specs=[
            pl.BlockSpec((BT, C), lambda l: (0, 0)),          # x (fetched once)
            layer_spec((6, C)),                               # packed small params (f32)
            layer_spec((1, F)),                               # b1 (f32)
            layer_spec((C, 3 * C)),                           # wqkv (bf16)
            layer_spec((C, C)),                               # wo   (bf16)
            layer_spec((C, F)),                               # w1   (bf16)
            layer_spec((F, C)),                               # w2   (bf16)
            pl.BlockSpec((2, C), lambda l: (0, 0)),           # final LN gamma/beta
        ],
        out_specs=pl.BlockSpec((BT, C), lambda l: (0, 0)),    # resident carry + result
        compiler_params=pltpu.CompilerParams(
            dimension_semantics=("arbitrary",),
            vmem_limit_bytes=_vmem_limit_bytes(BT, T, C, F, B, heads)),
    )(x2, params["small"], params["b1"], params["wqkv"], params["wo"],
      params["w1"], params["w2"], params["lnf"])

    out = out.reshape(B, T, C)
    if exit_permute:
        out = jnp.transpose(out, (0, 2, 1))           # back to (B, C, T)
    return out


# ------------------------------ parameter init ------------------------------ #

def init_params(key, dim, depth, heads, ff_mult=4):
    del heads  # head count only affects the split, not parameter shapes
    ff_dim = dim * ff_mult

    def dense(k, fan_in, shape):
        w = jax.random.normal(k, shape, jnp.float32) / jnp.sqrt(fan_in)
        return w.astype(jnp.bfloat16)                 # MXU operands in bf16

    wqkv, wo, w1, w2 = [], [], [], []
    for _ in range(depth):
        key, k1, k2, k3, k4 = jax.random.split(key, 5)
        wqkv.append(dense(k1, dim, (dim, 3 * dim)))   # [wq | wk | wv] fused
        wo.append(dense(k2, dim, (dim, dim)))
        w1.append(dense(k3, dim, (dim, ff_dim)))
        w2.append(dense(k4, ff_dim, (ff_dim, dim)))

    L = depth
    ones = jnp.ones((L, 1, dim), jnp.float32)
    zeros = jnp.zeros((L, 1, dim), jnp.float32)
    # packed rows: [ln1_g, ln1_b, bo, ln2_g, ln2_b, b2]
    small = jnp.concatenate([ones, zeros, zeros, ones, zeros, zeros], axis=1)

    return dict(
        small=small,                                   # (L, 6, dim) f32
        b1=jnp.zeros((L, 1, ff_dim), jnp.float32),
        wqkv=jnp.stack(wqkv),
        wo=jnp.stack(wo),
        w1=jnp.stack(w1),
        w2=jnp.stack(w2),
        lnf=jnp.stack([jnp.ones((dim,), jnp.float32),
                       jnp.zeros((dim,), jnp.float32)]),   # (2, dim): gamma, beta
    )


# ------------------------------------ main ----------------------------------- #

if __name__ == "__main__":
    # Small but lane-friendly shapes: model dim C = 128 (multiple of 128 lanes).
    B, C, T = 2, 128, 16          # batch, model dim (channels), sequence length
    heads, depth = 4, 2

    key = jax.random.PRNGKey(0)
    kx, kp = jax.random.split(key)
    x = jax.random.normal(kx, (B, C, T), dtype=jnp.float32)   # channels-mid
    params = init_params(kp, C, depth, heads)

    out = checkpointed_xtransformer_encoder(
        x, params, heads, needs_permute=True, exit_permute=True)
    out = jax.block_until_ready(out)

    assert out.shape == (B, C, T), out.shape
    assert bool(jnp.all(jnp.isfinite(out)))
    print("KERNEL_OK")
</pallas_src>

<mosaic_0001>
module attributes {stable_mosaic.version = 11 : i64} {
  func.func @_encoder_kernel(%arg0: i32, %arg1: memref<32x128xf32, #tpu.memory_space<vmem>>, %arg2: memref<1x6x128xf32, #tpu.memory_space<vmem>>, %arg3: memref<1x1x512xf32, #tpu.memory_space<vmem>>, %arg4: memref<1x128x384xbf16, #tpu.memory_space<vmem>>, %arg5: memref<1x128x128xbf16, #tpu.memory_space<vmem>>, %arg6: memref<1x128x512xbf16, #tpu.memory_space<vmem>>, %arg7: memref<1x512x128xbf16, #tpu.memory_space<vmem>>, %arg8: memref<2x128xf32, #tpu.memory_space<vmem>>, %arg9: memref<32x128xf32, #tpu.memory_space<vmem>>) attributes {dimension_semantics = [#tpu.dimension_semantics<arbitrary>], iteration_bounds = array<i64: 2>, scalar_prefetch = 0 : i64, scratch_operands = 0 : i64, tpu.core_type = #tpu.core_type<tc>, window_params = [{pipeline_mode = #tpu.pipeline_mode<synchronous>, transform_indices = @transform_0, window_bounds = array<i64: 32, 128>}, {transform_indices = @transform_1, window_bounds = array<i64: 1, 6, 128>}, {transform_indices = @transform_2, window_bounds = array<i64: 1, 1, 512>}, {transform_indices = @transform_3, window_bounds = array<i64: 1, 128, 384>}, {transform_indices = @transform_4, window_bounds = array<i64: 1, 128, 128>}, {transform_indices = @transform_5, window_bounds = array<i64: 1, 128, 512>}, {transform_indices = @transform_6, window_bounds = array<i64: 1, 512, 128>}, {pipeline_mode = #tpu.pipeline_mode<synchronous>, transform_indices = @transform_7, window_bounds = array<i64: 2, 128>}, {pipeline_mode = #tpu.pipeline_mode<synchronous>, transform_indices = @transform_8, window_bounds = array<i64: 32, 128>}]} {
    %c0_i32 = arith.constant 0 : i32
    %0 = arith.cmpi eq, %arg0, %c0_i32 : i32
    %1 = arith.extui %0 : i1 to i32
    %c0_i32_0 = arith.constant 0 : i32
    %2 = arith.cmpi ne, %1, %c0_i32_0 : i32
    scf.if %2 {
      %c0_45 = arith.constant 0 : index
      %c0_46 = arith.constant 0 : index
      %130 = vector.load %arg1[%c0_45, %c0_46] : memref<32x128xf32, #tpu.memory_space<vmem>>, vector<32x128xf32>
      %c0_47 = arith.constant 0 : index
      %c0_48 = arith.constant 0 : index
      %131 = vector.load %arg9[%c0_47, %c0_48] : memref<32x128xf32, #tpu.memory_space<vmem>>, vector<32x128xf32>
      tpu.vector_store %arg9[%c0_47, %c0_48], %130 {strides = array<i32>} : memref<32x128xf32, #tpu.memory_space<vmem>>, vector<32x128xf32>,
    } else {
    }
    %c0 = arith.constant 0 : index
    %c0_1 = arith.constant 0 : index
    %3 = vector.load %arg9[%c0, %c0_1] : memref<32x128xf32, #tpu.memory_space<vmem>>, vector<32x128xf32>
    %c0_2 = arith.constant 0 : index
    %c0_3 = arith.constant 0 : index
    %c0_4 = arith.constant 0 : index
    %4 = vector.load %arg2[%c0_2, %c0_3, %c0_4] : memref<1x6x128xf32, #tpu.memory_space<vmem>>, vector<1x6x128xf32>
    %5 = vector.shape_cast %4 : vector<1x6x128xf32> to vector<6x128xf32>
    %6 = vector.extract_strided_slice %5 {offsets = [0, 0], sizes = [1, 128], strides = [1, 1]} : vector<6x128xf32> to vector<1x128xf32>
    %7 = vector.extract_strided_slice %5 {offsets = [1, 0], sizes = [1, 128], strides = [1, 1]} : vector<6x128xf32> to vector<1x128xf32>
    %8 = vector.extract_strided_slice %5 {offsets = [2, 0], sizes = [1, 128], strides = [1, 1]} : vector<6x128xf32> to vector<1x128xf32>
    %9 = vector.extract_strided_slice %5 {offsets = [3, 0], sizes = [1, 128], strides = [1, 1]} : vector<6x128xf32> to vector<1x128xf32>
    %10 = vector.extract_strided_slice %5 {offsets = [4, 0], sizes = [1, 128], strides = [1, 1]} : vector<6x128xf32> to vector<1x128xf32>
    %11 = vector.extract_strided_slice %5 {offsets = [5, 0], sizes = [1, 128], strides = [1, 1]} : vector<6x128xf32> to vector<1x128xf32>
    %c0_5 = arith.constant 0 : index
    %c0_6 = arith.constant 0 : index
    %c0_7 = arith.constant 0 : index
    %12 = vector.load %arg3[%c0_5, %c0_6, %c0_7] : memref<1x1x512xf32, #tpu.memory_space<vmem>>, vector<1x1x512xf32>
    %13 = vector.shape_cast %12 : vector<1x1x512xf32> to vector<1x512xf32>
    %cst = arith.constant dense<0.000000e+00> : vector<32xf32>
    %14 = vector.multi_reduction <add>, %3, %cst [1] : vector<32x128xf32> to vector<32xf32>
    %15 = vector.shape_cast %14 : vector<32xf32> to vector<32x1xf32>
    %cst_8 = arith.constant 1.280000e+02 : f32
    %16 = vector.broadcast %cst_8 : f32 to vector<32x1xf32>
    %17 = arith.divf %15, %16 : vector<32x1xf32>
    %18 = vector.broadcast %17 : vector<32x1xf32> to vector<32x128xf32>
    %19 = arith.subf %3, %18 : vector<32x128xf32>
    %20 = arith.mulf %19, %19 : vector<32x128xf32>
    %cst_9 = arith.constant dense<0.000000e+00> : vector<32xf32>
    %21 = vector.multi_reduction <add>, %20, %cst_9 [1] : vector<32x128xf32> to vector<32xf32>
    %22 = vector.shape_cast %21 : vector<32xf32> to vector<32x1xf32>
    %cst_10 = arith.constant 1.280000e+02 : f32
    %23 = vector.broadcast %cst_10 : f32 to vector<32x1xf32>
    %24 = arith.divf %22, %23 : vector<32x1xf32>
    %25 = vector.broadcast %17 : vector<32x1xf32> to vector<32x128xf32>
    %26 = arith.subf %3, %25 : vector<32x128xf32>
    %cst_11 = arith.constant 9.99999974E-6 : f32
    %27 = vector.broadcast %cst_11 : f32 to vector<32x1xf32>
    %28 = arith.addf %24, %27 : vector<32x1xf32>
    %29 = math.rsqrt %28 : vector<32x1xf32>
    %30 = vector.broadcast %29 : vector<32x1xf32> to vector<32x128xf32>
    %31 = arith.mulf %26, %30 : vector<32x128xf32>
    %32 = vector.broadcast %6 : vector<1x128xf32> to vector<32x128xf32>
    %33 = arith.mulf %31, %32 : vector<32x128xf32>
    %34 = vector.broadcast %7 : vector<1x128xf32> to vector<32x128xf32>
    %35 = arith.addf %33, %34 : vector<32x128xf32>
    %36 = arith.truncf %35 : vector<32x128xf32> to vector<32x128xbf16>
    %c0_12 = arith.constant 0 : index
    %c0_13 = arith.constant 0 : index
    %c0_14 = arith.constant 0 : index
    %37 = vector.load %arg4[%c0_12, %c0_13, %c0_14] : memref<1x128x384xbf16, #tpu.memory_space<vmem>>, vector<1x128x384xbf16>
    %38 = vector.shape_cast %37 : vector<1x128x384xbf16> to vector<128x384xbf16>
    %cst_15 = arith.constant dense<0.000000e+00> : vector<32x384xf32>
    %39 = tpu.matmul %36, %38, %cst_15 {dimension_numbers = #tpu.dot_dimension_numbers<[1], [0], [0], [1], [0, 0, 1, 1], [], []>} : vector<32x128xbf16>, vector<128x384xbf16>, vector<32x384xf32> -> vector<32x384xf32>
    %40 = vector.shape_cast %39 : vector<32x384xf32> to vector<2x16x12x32xf32>
    %41 = tpu.transpose %40, [0, 2, 1, 3] : vector<2x16x12x32xf32> -> vector<2x12x16x32xf32>
    %42 = vector.extract_strided_slice %41 {offsets = [0, 0, 0, 0], sizes = [2, 4, 16, 32], strides = [1, 1, 1, 1]} : vector<2x12x16x32xf32> to vector<2x4x16x32xf32>
    %cst_16 = arith.constant 0.176776692 : f32
    %43 = vector.broadcast %cst_16 : f32 to vector<2x4x16x32xf32>
    %44 = arith.mulf %42, %43 : vector<2x4x16x32xf32>
    %45 = arith.truncf %44 : vector<2x4x16x32xf32> to vector<2x4x16x32xbf16>
    %46 = vector.shape_cast %45 : vector<2x4x16x32xbf16> to vector<8x16x32xbf16>
    %47 = vector.extract_strided_slice %41 {offsets = [0, 4, 0, 0], sizes = [2, 4, 16, 32], strides = [1, 1, 1, 1]} : vector<2x12x16x32xf32> to vector<2x4x16x32xf32>
    %48 = arith.truncf %47 : vector<2x4x16x32xf32> to vector<2x4x16x32xbf16>
    %49 = vector.shape_cast %48 : vector<2x4x16x32xbf16> to vector<8x16x32xbf16>
    %50 = vector.extract_strided_slice %41 {offsets = [0, 8, 0, 0], sizes = [2, 4, 16, 32], strides = [1, 1, 1, 1]} : vector<2x12x16x32xf32> to vector<2x4x16x32xf32>
    %51 = arith.truncf %50 : vector<2x4x16x32xf32> to vector<2x4x16x32xbf16>
    %52 = vector.shape_cast %51 : vector<2x4x16x32xbf16> to vector<8x16x32xbf16>
    "tpu.trace_start"() <{level = 10 : i32, message = "gqd,gkd->gqk"}> : () -> ()
    %cst_17 = arith.constant dense<0.000000e+00> : vector<8x16x16xf32>
    %53 = tpu.matmul %46, %49, %cst_17 {dimension_numbers = #tpu.dot_dimension_numbers<[2], [2], [1], [1], [0, 0, 0, 1, 1, 1], [0], [0]>} : vector<8x16x32xbf16>, vector<8x16x32xbf16>, vector<8x16x16xf32> -> vector<8x16x16xf32>
    "tpu.trace_stop"() : () -> ()
    %cst_18 = arith.constant dense<0xFF800000> : vector<8x16xf32>
    %54 = vector.multi_reduction <maximumf>, %53, %cst_18 [2] : vector<8x16x16xf32> to vector<8x16xf32>
    %55 = vector.shape_cast %54 : vector<8x16xf32> to vector<8x16x1xf32>
    %56 = vector.broadcast %55 : vector<8x16x1xf32> to vector<8x16x16xf32>
    %57 = arith.subf %53, %56 : vector<8x16x16xf32>
    %58 = math.exp %57 : vector<8x16x16xf32>
    %cst_19 = arith.constant dense<0.000000e+00> : vector<8x16xf32>
    %59 = vector.multi_reduction <add>, %58, %cst_19 [2] : vector<8x16x16xf32> to vector<8x16xf32>
    %60 = vector.shape_cast %59 : vector<8x16xf32> to vector<8x16x1xf32>
    %61 = tpu.reciprocal %60 {approx = true} : vector<8x16x1xf32> -> vector<8x16x1xf32>
    %62 = vector.broadcast %61 : vector<8x16x1xf32> to vector<8x16x16xf32>
    %63 = arith.mulf %58, %62 : vector<8x16x16xf32>
    %64 = arith.truncf %63 : vector<8x16x16xf32> to vector<8x16x16xbf16>
    "tpu.trace_start"() <{level = 10 : i32, message = "gqk,gkd->gqd"}> : () -> ()
    %cst_20 = arith.constant dense<0.000000e+00> : vector<8x16x32xf32>
    %65 = tpu.matmul %64, %52, %cst_20 {dimension_numbers = #tpu.dot_dimension_numbers<[2], [1], [1], [2], [0, 0, 0, 1, 1, 2], [0], [0]>} : vector<8x16x16xbf16>, vector<8x16x32xbf16>, vector<8x16x32xf32> -> vector<8x16x32xf32>
    "tpu.trace_stop"() : () -> ()
    %66 = vector.shape_cast %65 : vector<8x16x32xf32> to vector<2x4x16x32xf32>
    %67 = tpu.transpose %66, [0, 2, 1, 3] : vector<2x4x16x32xf32> -> vector<2x16x4x32xf32>
    %68 = vector.shape_cast %67 : vector<2x16x4x32xf32> to vector<32x128xf32>
    %69 = arith.truncf %68 : vector<32x128xf32> to vector<32x128xbf16>
    %c0_21 = arith.constant 0 : index
    %c0_22 = arith.constant 0 : index
    %c0_23 = arith.constant 0 : index
    %70 = vector.load %arg5[%c0_21, %c0_22, %c0_23] : memref<1x128x128xbf16, #tpu.memory_space<vmem>>, vector<1x128x128xbf16>
    %71 = vector.shape_cast %70 : vector<1x128x128xbf16> to vector<128x128xbf16>
    %cst_24 = arith.constant dense<0.000000e+00> : vector<32x128xf32>
    %72 = tpu.matmul %69, %71, %cst_24 {dimension_numbers = #tpu.dot_dimension_numbers<[1], [0], [0], [1], [0, 0, 1, 1], [], []>} : vector<32x128xbf16>, vector<128x128xbf16>, vector<32x128xf32> -> vector<32x128xf32>
    %73 = vector.broadcast %8 : vector<1x128xf32> to vector<32x128xf32>
    %74 = arith.addf %72, %73 : vector<32x128xf32>
    %75 = arith.addf %3, %74 : vector<32x128xf32>
    %cst_25 = arith.constant dense<0.000000e+00> : vector<32xf32>
    %76 = vector.multi_reduction <add>, %75, %cst_25 [1] : vector<32x128xf32> to vector<32xf32>
    %77 = vector.shape_cast %76 : vector<32xf32> to vector<32x1xf32>
    %cst_26 = arith.constant 1.280000e+02 : f32
    %78 = vector.broadcast %cst_26 : f32 to vector<32x1xf32>
    %79 = arith.divf %77, %78 : vector<32x1xf32>
    %80 = vector.broadcast %79 : vector<32x1xf32> to vector<32x128xf32>
    %81 = arith.subf %75, %80 : vector<32x128xf32>
    %82 = arith.mulf %81, %81 : vector<32x128xf32>
    %cst_27 = arith.constant dense<0.000000e+00> : vector<32xf32>
    %83 = vector.multi_reduction <add>, %82, %cst_27 [1] : vector<32x128xf32> to vector<32xf32>
    %84 = vector.shape_cast %83 : vector<32xf32> to vector<32x1xf32>
    %cst_28 = arith.constant 1.280000e+02 : f32
    %85 = vector.broadcast %cst_28 : f32 to vector<32x1xf32>
    %86 = arith.divf %84, %85 : vector<32x1xf32>
    %87 = vector.broadcast %79 : vector<32x1xf32> to vector<32x128xf32>
    %88 = arith.subf %75, %87 : vector<32x128xf32>
    %cst_29 = arith.constant 9.99999974E-6 : f32
    %89 = vector.broadcast %cst_29 : f32 to vector<32x1xf32>
    %90 = arith.addf %86, %89 : vector<32x1xf32>
    %91 = math.rsqrt %90 : vector<32x1xf32>
    %92 = vector.broadcast %91 : vector<32x1xf32> to vector<32x128xf32>
    %93 = arith.mulf %88, %92 : vector<32x128xf32>
    %94 = vector.broadcast %9 : vector<1x128xf32> to vector<32x128xf32>
    %95 = arith.mulf %93, %94 : vector<32x128xf32>
    %96 = vector.broadcast %10 : vector<1x128xf32> to vector<32x128xf32>
    %97 = arith.addf %95, %96 : vector<32x128xf32>
    %98 = arith.truncf %97 : vector<32x128xf32> to vector<32x128xbf16>
    %c0_30 = arith.constant 0 : index
    %c0_31 = arith.constant 0 : index
    %c0_32 = arith.constant 0 : index
    %99 = vector.load %arg6[%c0_30, %c0_31, %c0_32] : memref<1x128x512xbf16, #tpu.memory_space<vmem>>, vector<1x128x512xbf16>
    %100 = vector.shape_cast %99 : vector<1x128x512xbf16> to vector<128x512xbf16>
    %cst_33 = arith.constant dense<0.000000e+00> : vector<32x512xf32>
    %101 = tpu.matmul %98, %100, %cst_33 {dimension_numbers = #tpu.dot_dimension_numbers<[1], [0], [0], [1], [0, 0, 1, 1], [], []>} : vector<32x128xbf16>, vector<128x512xbf16>, vector<32x512xf32> -> vector<32x512xf32>
    %102 = vector.broadcast %13 : vector<1x512xf32> to vector<32x512xf32>
    %103 = arith.addf %101, %102 : vector<32x512xf32>
    %104 = arith.mulf %103, %103 : vector<32x512xf32>
    %105 = arith.mulf %103, %104 : vector<32x512xf32>
    %cst_34 = arith.constant 4.471500e-02 : f32
    %106 = vector.broadcast %cst_34 : f32 to vector<32x512xf32>
    %107 = arith.mulf %106, %105 : vector<32x512xf32>
    %108 = arith.addf %103, %107 : vector<32x512xf32>
    %cst_35 = arith.constant 0.797884583 : f32
    %109 = vector.broadcast %cst_35 : f32 to vector<32x512xf32>
    %110 = arith.mulf %109, %108 : vector<32x512xf32>
    %111 = math.tanh %110 : vector<32x512xf32>
    %cst_36 = arith.constant 1.000000e+00 : f32
    %112 = vector.broadcast %cst_36 : f32 to vector<32x512xf32>
    %113 = arith.addf %112, %111 : vector<32x512xf32>
    %cst_37 = arith.constant 5.000000e-01 : f32
    %114 = vector.broadcast %cst_37 : f32 to vector<32x512xf32>
    %115 = arith.mulf %114, %113 : vector<32x512xf32>
    %116 = arith.mulf %103, %115 : vector<32x512xf32>
    %117 = arith.truncf %116 : vector<32x512xf32> to vector<32x512xbf16>
    %c0_38 = arith.constant 0 : index
    %c0_39 = arith.constant 0 : index
    %c0_40 = arith.constant 0 : index
    %118 = vector.load %arg7[%c0_38, %c0_39, %c0_40] : memref<1x512x128xbf16, #tpu.memory_space<vmem>>, vector<1x512x128xbf16>
    %119 = vector.shape_cast %118 : vector<1x512x128xbf16> to vector<512x128xbf16>
    %cst_41 = arith.constant dense<0.000000e+00> : vector<32x128xf32>
    %120 = tpu.matmul %117, %119, %cst_41 {dimension_numbers = #tpu.dot_dimension_numbers<[1], [0], [0], [1], [0, 0, 1, 1], [], []>} : vector<32x512xbf16>, vector<512x128xbf16>, vector<32x128xf32> -> vector<32x128xf32>
    %121 = vector.broadcast %11 : vector<1x128xf32> to vector<32x128xf32>
    %122 = arith.addf %120, %121 : vector<32x128xf32>
    %123 = arith.addf %75, %122 : vector<32x128xf32>
    %c1_i32 = arith.constant 1 : i32
    %124 = arith.cmpi slt, %arg0, %c1_i32 : i32
    %125 = arith.extui %124 : i1 to i32
    %c0_i32_42 = arith.constant 0 : i32
    %126 = arith.cmpi ne, %125, %c0_i32_42 : i32
    scf.if %126 {
      %c0_45 = arith.constant 0 : index
      %c0_46 = arith.constant 0 : index
      %130 = vector.load %arg9[%c0_45, %c0_46] : memref<32x128xf32, #tpu.memory_space<vmem>>, vector<32x128xf32>
      tpu.vector_store %arg9[%c0_45, %c0_46], %123 {strides = array<i32>} : memref<32x128xf32, #tpu.memory_space<vmem>>, vector<32x128xf32>,
    } else {
    }
    %c1_i32_43 = arith.constant 1 : i32
    %127 = arith.cmpi eq, %arg0, %c1_i32_43 : i32
    %128 = arith.extui %127 : i1 to i32
    %c0_i32_44 = arith.constant 0 : i32
    %129 = arith.cmpi ne, %128, %c0_i32_44 : i32
    scf.if %129 {
      %c0_45 = arith.constant 0 : index
      %c0_46 = arith.constant 0 : index
      %130 = vector.load %arg8[%c0_45, %c0_46] : memref<2x128xf32, #tpu.memory_space<vmem>>, vector<2x128xf32>
      %131 = vector.extract_strided_slice %130 {offsets = [0, 0], sizes = [1, 128], strides = [1, 1]} : vector<2x128xf32> to vector<1x128xf32>
      %132 = vector.extract_strided_slice %130 {offsets = [1, 0], sizes = [1, 128], strides = [1, 1]} : vector<2x128xf32> to vector<1x128xf32>
      %cst_47 = arith.constant dense<0.000000e+00> : vector<32xf32>
      %133 = vector.multi_reduction <add>, %123, %cst_47 [1] : vector<32x128xf32> to vector<32xf32>
      %134 = vector.shape_cast %133 : vector<32xf32> to vector<32x1xf32>
      %cst_48 = arith.constant 1.280000e+02 : f32
      %135 = vector.broadcast %cst_48 : f32 to vector<32x1xf32>
      %136 = arith.divf %134, %135 : vector<32x1xf32>
      %137 = vector.broadcast %136 : vector<32x1xf32> to vector<32x128xf32>
      %138 = arith.subf %123, %137 : vector<32x128xf32>
      %139 = arith.mulf %138, %138 : vector<32x128xf32>
      %cst_49 = arith.constant dense<0.000000e+00> : vector<32xf32>
      %140 = vector.multi_reduction <add>, %139, %cst_49 [1] : vector<32x128xf32> to vector<32xf32>
      %141 = vector.shape_cast %140 : vector<32xf32> to vector<32x1xf32>
      %cst_50 = arith.constant 1.280000e+02 : f32
      %142 = vector.broadcast %cst_50 : f32 to vector<32x1xf32>
      %143 = arith.divf %141, %142 : vector<32x1xf32>
      %144 = vector.broadcast %136 : vector<32x1xf32> to vector<32x128xf32>
      %145 = arith.subf %123, %144 : vector<32x128xf32>
      %cst_51 = arith.constant 9.99999974E-6 : f32
      %146 = vector.broadcast %cst_51 : f32 to vector<32x1xf32>
      %147 = arith.addf %143, %146 : vector<32x1xf32>
      %148 = math.rsqrt %147 : vector<32x1xf32>
      %149 = vector.broadcast %148 : vector<32x1xf32> to vector<32x128xf32>
      %150 = arith.mulf %145, %149 : vector<32x128xf32>
      %151 = vector.broadcast %131 : vector<1x128xf32> to vector<32x128xf32>
      %152 = arith.mulf %150, %151 : vector<32x128xf32>
      %153 = vector.broadcast %132 : vector<1x128xf32> to vector<32x128xf32>
      %154 = arith.addf %152, %153 : vector<32x128xf32>
      %c0_52 = arith.constant 0 : index
      %c0_53 = arith.constant 0 : index
      %155 = vector.load %arg9[%c0_52, %c0_53] : memref<32x128xf32, #tpu.memory_space<vmem>>, vector<32x128xf32>
      tpu.vector_store %arg9[%c0_52, %c0_53], %154 {strides = array<i32>} : memref<32x128xf32, #tpu.memory_space<vmem>>, vector<32x128xf32>,
    } else {
    }
    return
  }
  func.func @transform_0(%arg0: i32) -> (i32, i32) {
    %c0_i32 = arith.constant 0 : i32
    %c0_i32_0 = arith.constant 0 : i32
    %c0_i32_1 = arith.constant 0 : i32
    return %c0_i32, %c0_i32_0 : i32, i32
  }
  func.func @transform_1(%arg0: i32) -> (i32, i32, i32) {
    %c0_i32 = arith.constant 0 : i32
    %c0_i32_0 = arith.constant 0 : i32
    %c0_i32_1 = arith.constant 0 : i32
    return %arg0, %c0_i32, %c0_i32_0 : i32, i32, i32
  }
  func.func @transform_2(%arg0: i32) -> (i32, i32, i32) {
    %c0_i32 = arith.constant 0 : i32
    %c0_i32_0 = arith.constant 0 : i32
    %c0_i32_1 = arith.constant 0 : i32
    return %arg0, %c0_i32, %c0_i32_0 : i32, i32, i32
  }
  func.func @transform_3(%arg0: i32) -> (i32, i32, i32) {
    %c0_i32 = arith.constant 0 : i32
    %c0_i32_0 = arith.constant 0 : i32
    %c0_i32_1 = arith.constant 0 : i32
    return %arg0, %c0_i32, %c0_i32_0 : i32, i32, i32
  }
  func.func @transform_4(%arg0: i32) -> (i32, i32, i32) {
    %c0_i32 = arith.constant 0 : i32
    %c0_i32_0 = arith.constant 0 : i32
    %c0_i32_1 = arith.constant 0 : i32
    return %arg0, %c0_i32, %c0_i32_0 : i32, i32, i32
  }
  func.func @transform_5(%arg0: i32) -> (i32, i32, i32) {
    %c0_i32 = arith.constant 0 : i32
    %c0_i32_0 = arith.constant 0 : i32
    %c0_i32_1 = arith.constant 0 : i32
    return %arg0, %c0_i32, %c0_i32_0 : i32, i32, i32
  }
  func.func @transform_6(%arg0: i32) -> (i32, i32, i32) {
    %c0_i32 = arith.constant 0 : i32
    %c0_i32_0 = arith.constant 0 : i32
    %c0_i32_1 = arith.constant 0 : i32
    return %arg0, %c0_i32, %c0_i32_0 : i32, i32, i32
  }
  func.func @transform_7(%arg0: i32) -> (i32, i32) {
    %c0_i32 = arith.constant 0 : i32
    %c0_i32_0 = arith.constant 0 : i32
    %c0_i32_1 = arith.constant 0 : i32
    return %c0_i32, %c0_i32_0 : i32, i32
  }
  func.func @transform_8(%arg0: i32) -> (i32, i32) {
    %c0_i32 = arith.constant 0 : i32
    %c0_i32_0 = arith.constant 0 : i32
    %c0_i32_1 = arith.constant 0 : i32
    return %c0_i32, %c0_i32_0 : i32, i32
  }
}

</mosaic_0001>

<bundles_post_ra>
// kernel: tpu_custom_call.1
= control target key start
LH: loop header
LB: loop body
LE: loop exit
PB: predicated region body
PF: predicated region fallthrough
CT: control target
= control target key end

     0   :  { %s8072_s0 = inlined_call_operand.hbm [shape: f32[32,128], index: 0, kind: input, shape index: {}]   ;;  %s8073_s1 = inlined_call_operand.vmem [shape: f32[2,6,128], index: 1, kind: input, shape index: {}]   ;;  %s8074_s2 = inlined_call_operand.vmem [shape: f32[2,1,512], index: 2, kind: input, shape index: {}]   ;;  %s8075_s3 = inlined_call_operand.hbm [shape: bf16[2,128,384], index: 3, kind: input, shape index: {}]   ;;  %s8076_s4 = inlined_call_operand.hbm [shape: bf16[2,128,128], index: 4, kind: input, shape index: {}]   ;;  %s8077_s5 = inlined_call_operand.hbm [shape: bf16[2,128,512], index: 5, kind: input, shape index: {}]   ;;  %s8078_s6 = inlined_call_operand.hbm [shape: bf16[2,512,128], index: 6, kind: input, shape index: {}]   ;;  %s8079_s7 = inlined_call_operand.vmem [shape: f32[2,128], index: 7, kind: input, shape index: {}]   ;;  %s8080_s8 = inlined_call_operand.hbm [shape: f32[32,128], index: 8, kind: output, shape index: {}]  }
   0x1   :  { %8092 = sst [smem:[#allocation19_spill]] %s8075_s3 }
   0x2   :  { %8093 = sst [smem:[#allocation20_spill]] %s8077_s5 }
   0x3   :  { %8094 = sst [smem:[#allocation21_spill]] %s8080_s8 }
   0x4   :  { %13 = vsyncpa [#allocation3], 0 }
   0x5   :  { %14 = vsyncpa [#allocation6], 0 }
   0x6   :  { %16 = vsyncpa [#allocation6 + $0x1], 0 }
   0x7   :  { %17 = vsyncpa [#allocation9], 0 }
   0x8   :  { %19 = vsyncpa [#allocation9 + $0x1], 0 }
   0x9   :  { %20 = vsyncpa [#allocation4], 0  ;;  %s6478_s27 = smov 0   ;;  %s6480_s28 = smov 0  }
   0xa   :  { %s6482_s29 = smov 0   ;;  %s6484_s30 = smov 0  }
   0xb LB: > { %8095 = sst [smem:[#allocation16_spill]] %s6403_s29  ;;  %s6499_s9 = sadd.s32 1, %s6407_s30   ;;  %s6407_s30 = sphi %s6484_s30, %s8113_s30   ;;  %s6403_s29 = sphi %s6482_s29, %s8115_s29   ;;  %s6399_s28 = sphi %s6480_s28, %s8117_s28   ;;  %s6395_s27 = sphi %s6478_s27, %s8116_s27  }
   0xc   : > { %8096 = sst [smem:[#allocation17_spill]] %s6499_s9  ;;  %s106_s10 = sadd.s32 1, %s6403_s29 }
   0xd   : > { %s103_s11 = ssub.s32 %s6407_s30, %s6499_s9  ;;  %p113_p0 = scmp.ne.s32.totalorder %s6403_s29, %s6399_s28 }
   0xe   : > { %p104_p1 = scmp.eq.s32.totalorder %s103_s11, 0  ;;  %p114_p2 = scmp.eq.s32.totalorder %s6407_s30, 0 }
   0xf   : > { %p5856_p3 = scmp.lt.s32.totalorder %s6407_s30, 2  ;;  %s293_s13 = sand.u32 1, %s6407_s30  }
  0x10   : > { %s6509_s12 = scalar_select %p104_p1, %s6403_s29, %s106_s10  }
  0x11   : > { %p115_p4 = por %p114_p2, %p113_p0  ;;  %s6513_s14 = sand.u32 1, %s6403_s29  }
  0x12   : > { %8097 = sst [smem:[#allocation18_spill]] %s6509_s12  ;;  %s5819_s15 = smul.u32 192, %s6513_s14 }
  0x13   : > { %p6516_p5 = pnand %p5856_p3, %p115_p4  ;;  %s5820_s17 = smul.u32 3072, %s6407_s30 }
  0x14   : > { %s8099_s3 = sld [smem:[#allocation19_spill]]  ;;  %s297_s21 = scalar_lea.vmem [#allocation5], %s5819_s15 }
  0x15   : > { %s8098_s16 = scalar_select %p6516_p5, 1, 0 }
  0x16   : > { %s304_s22 = sshll.u32 %s297_s21, 4  ;;  %s6530_s23 = scalar_lea.sflag [#allocation6], %s293_s13  ;;  %s6526_s22 = int_to_ptr.vmem [resolvable:$true] %s304_s22 }
  0x17   : > { %p6536_p7 = pneg %p6516_p5 }
  0x19   : > { %s8100_s25 = scalar_select %p6536_p7, 1, 0 }
  0x1a   : > { %s6524_s20 = scalar_lea.hbm %s8099_s3, %s5820_s17  ;;  %s6192_s11 = scalar_lea.hbm %s8099_s3, 6144 }
  0x1b   : > { %s6187_s24 = scalar_lea.hbm %s6524_s20, 3072  ;;  %p6193_p10 = scmp.lt.u32.totalorder %s6524_s20, %s8099_s3 }
  0x1c   : > { %p6188_p6 = scmp.ne.s32.totalorder %s6524_s20, %s6187_s24  ;;  %p6194_p11 = scmp.lt.u32.totalorder %s6192_s11, %s6187_s24 }
  0x1d   : > { %p6196_p13 = scmp.lt.u32.totalorder %s6187_s24, %s6524_s20 }
  0x1e   : > { %p6190_p8 = pnand %p6536_p7, %p6188_p6  ;;  %p6195_p12 = por %p6194_p11, %p6193_p10 }
  0x20   : > { %p6191_p9 = pneg %p6190_p8  ;;  %p6197_p0 = por %p6196_p13, %p6195_p12 }
  0x22   : > { %p6198_p1 = pnand %p6197_p0, %p6191_p9 }
  0x24   : > { %6201 = shalt.err (!%p6198_p1)
}
  0x25   : > { %s6202_s18 = scalar_lea.vmem %s6526_s22, 3072  ;;  %s6409_s19 = smov [#allocation5]  }
  0x26   : > { %p6203_p2 = scmp.ne.s32.totalorder %s6526_s22, %s6202_s18  ;;  %s6207_s21 = sshll.u32 %s6409_s19, 4  ;;  %s6208_s21 = int_to_ptr.vmem [resolvable:$false] %s6207_s21 }
  0x27   : > { %s6209_s26 = scalar_lea.vmem %s6208_s21, 6144  ;;  %p6210_p6 = scmp.lt.s32.totalorder %s6526_s22, %s6208_s21 }
  0x28   : > { %p6205_p3 = pnand %p6203_p2, %p6536_p7  ;;  %p6211_p8 = scmp.lt.s32.totalorder %s6209_s26, %s6202_s18 }
  0x2a   : > { %p6206_p4 = pneg %p6205_p3  ;;  %p6212_p10 = por %p6211_p8, %p6210_p6 }
  0x2c   : > { %p6213_p11 = pnand %p6212_p10, %p6206_p4 }
  0x2e   : > { %6216 = shalt.err (!%p6213_p11)
}
  0x2f   : > { %s6410_s24 = smov 192   ;;  %s6411_s10 = smov 12  }
  0x30   : > { %5845 = dma.hbm_to_vmem [thread:$0]  (!%p6516_p5), %s6524_s20, 3072, %s6526_s22, %s6530_s23, %s6410_s24, %s6410_s24, %s6411_s10  }
  0x31   : > { %s5392_s11 = sshll.u32 %s6513_s14, 8  ;;  %s5573_s15 = sshll.u32 %s6407_s30, 12 }
  0x32   : > { %s8101_s5 = sld [smem:[#allocation20_spill]]  ;;  %s339_s21 = scalar_lea.vmem [#allocation8], %s5392_s11 }
  0x33   : > { %s346_s26 = sshll.u32 %s339_s21, 4  ;;  %s6575_s3 = scalar_lea.sflag [#allocation9], %s293_s13  ;;  %s6571_s26 = int_to_ptr.vmem [resolvable:$true] %s346_s26 }
  0x38   : > { %s6567_s19 = scalar_lea.hbm %s8101_s5, %s5573_s15  ;;  %s6222_s10 = scalar_lea.hbm %s8101_s5, 8192 }
  0x39   : > { %s6217_s20 = scalar_lea.hbm %s6567_s19, 4096  ;;  %p6223_p0 = scmp.lt.u32.totalorder %s6567_s19, %s8101_s5 }
  0x3a   : > { %p6218_p9 = scmp.ne.s32.totalorder %s6567_s19, %s6217_s20  ;;  %p6224_p1 = scmp.lt.u32.totalorder %s6222_s10, %s6217_s20 }
  0x3b   : > { %p6226_p3 = scmp.lt.u32.totalorder %s6217_s20, %s6567_s19 }
  0x3c   : > { %p6220_p12 = pnand %p6218_p9, %p6536_p7  ;;  %p6225_p2 = por %p6224_p1, %p6223_p0 }
  0x3e   : > { %p6221_p13 = pneg %p6220_p12  ;;  %p6227_p4 = por %p6226_p3, %p6225_p2 }
  0x40   : > { %p6228_p6 = pnand %p6227_p4, %p6221_p13 }
  0x42   : > { %6231 = shalt.err (!%p6228_p6)
}
  0x43   : > { %s6232_s13 = scalar_lea.vmem %s6571_s26, 4096  ;;  %s6412_s21 = smov [#allocation8]  }
  0x44   : > { %p6233_p8 = scmp.ne.s32.totalorder %s6571_s26, %s6232_s13  ;;  %s6237_s22 = sshll.u32 %s6412_s21, 4  ;;  %s6238_s22 = int_to_ptr.vmem [resolvable:$false] %s6237_s22 }
  0x45   : > { %s6239_s24 = scalar_lea.vmem %s6238_s22, 8192  ;;  %p6240_p9 = scmp.lt.s32.totalorder %s6571_s26, %s6238_s22 }
  0x46   : > { %p6235_p10 = pnand %p6233_p8, %p6536_p7  ;;  %p6241_p12 = scmp.lt.s32.totalorder %s6239_s24, %s6232_s13 }
  0x48   : > { %p6236_p11 = pneg %p6235_p10  ;;  %p6242_p0 = por %p6241_p12, %p6240_p9 }
  0x4a   : > { %p6243_p1 = pnand %p6242_p0, %p6236_p11 }
  0x4c   : > { %6246 = shalt.err (!%p6243_p1)
}
  0x4d   : > { %s6413_s20 = smov 256   ;;  %s6414_s10 = smov 16  }
  0x4e   : > { %5851 = dma.hbm_to_vmem [thread:$0]  (!%p6516_p5), %s6567_s19, 4096, %s6571_s26, %s6575_s3, %s6413_s20, %s6413_s20, %s6414_s10  }
  0x4f   : > { %s6604_s13 = scalar_lea.hbm %s8078_s6, %s5573_s15  ;;  %s360_s21 = scalar_lea.vmem [#allocation10], %s5392_s11 }
  0x50   : > { %s367_s22 = sshll.u32 %s360_s21, 4  ;;  %s6611_s24 = sadd.s32 4294967295, %s6407_s30   ;;  %s6608_s22 = int_to_ptr.vmem [resolvable:$true] %s367_s22 }
  0x51   : > { %p119_p13 = scmp.ne.s32.totalorder %s6399_s28, %s6395_s27  ;;  %p8085_p2 = scmp.eq.s32.totalorder %s6611_s24, 0 }
  0x52   : > { %p5385_p3 = scmp.ge.s32.totalorder %s6407_s30, 1  ;;  %p250_p4 = scmp.lt.s32.totalorder %s6407_s30, 3 }
  0x53   : > { %p6620_p6 = por %p8085_p2, %p119_p13  ;;  %s6415_s19 = smov [#allocation2]  }
  0x54   : > { %p6625_p10 = pnand %p5385_p3, %p250_p4  ;;  %s262_s26 = sshll.u32 %s6415_s19, 4  ;;  %s6631_s26 = int_to_ptr.vmem [resolvable:$true] %s262_s26 }
  0x55   : > { %s8102_s15 = scalar_select %p6620_p6, 1, 0 }
  0x56   : > { %s8103_s11 = scalar_select %p6625_p10, 1, 0 }
  0x57   : > { %p5838_p11 = pneg %p6625_p10  ;;  %s5389_s27 = sshll.u32 %s6513_s14, 6 }
  0x58   : > { %s5572_s10 = sshll.u32 %s6407_s30, 10  ;;  %s318_s17 = scalar_lea.vmem [#allocation7], %s5389_s27 }
  0x59   : > { %p6636_p9 = pnand %p5838_p11, %p8085_p2  ;;  %s325_s18 = sshll.u32 %s318_s17, 4  ;;  %s6667_s18 = int_to_ptr.vmem [resolvable:$true] %s325_s18 }
  0x5a   : > { %s6644_s12 = scalar_lea.hbm %s8076_s4, %s5572_s10  ;;  %s6247_s9 = scalar_lea.hbm %s8072_s0, 512 }
  0x5b   : > { %p6248_p12 = scmp.ne.s32.totalorder %s8072_s0, %s6247_s9  ;;  %p6249_p0 = pneg %p6636_p9 }
  0x5c   : > { %p6254_p3 = scmp.lt.u32.totalorder %s6247_s9, %s8072_s0 }
  0x5d   : > { %p6250_p1 = pnand %p6249_p0, %p6248_p12 }
  0x5f   : > { %p6251_p13 = pneg %p6250_p1 }
  0x61   : > { %p6256_p4 = pnand %p6254_p3, %p6251_p13 }
  0x63   : > { %6259 = shalt.err (!%p6256_p4)
}
  0x64   : > { %s6260_s5 = scalar_lea.vmem %s6631_s26, 512  ;;  %p6268_p6 = scmp.lt.s32.totalorder %s6631_s26, %s6631_s26 }
  0x65   : > { %p6261_p11 = scmp.ne.s32.totalorder %s6631_s26, %s6260_s5  ;;  %p6269_p10 = scmp.lt.s32.totalorder %s6260_s5, %s6260_s5 }
  0x67   : > { %p6263_p8 = pnand %p6261_p11, %p6249_p0  ;;  %p6270_p5 = por %p6269_p10, %p6268_p6 }
  0x69   : > { %p6264_p2 = pneg %p6263_p8 }
  0x6b   : > { %p6271_p7 = pnand %p6270_p5, %p6264_p2 }
  0x6d   : > { %6274 = shalt.err (!%p6271_p7)
}
  0x6e   : > { %s6416_s8 = smov 128   ;;  %s6417_s29 = smov 8  }
  0x6f   : > { %5841 = dma.hbm_to_vmem [thread:$0]  (!%p6636_p9), %s8072_s0, 512, %s6631_s26, [#allocation3], %s6416_s8, %s6416_s8, %s6417_s29  }
  0x70   : > { %s6275_s17 = scalar_lea.hbm %s6644_s12, 1024  ;;  %p8105_p5 = scmp.ne.s32.totalorder %s8100_s25, 0 }
  0x71   : > { %p6276_p6 = scmp.ne.s32.totalorder %s6644_s12, %s6275_s17  ;;  %s6280_s14 = scalar_lea.hbm %s8076_s4, 2048 }
  0x72   : > { %p6281_p8 = scmp.lt.u32.totalorder %s6644_s12, %s8076_s4  ;;  %p6282_p10 = scmp.lt.u32.totalorder %s6280_s14, %s6275_s17 }
  0x73   : > { %p6278_p7 = pnand %p6276_p6, %p8105_p5  ;;  %p6284_p0 = scmp.lt.u32.totalorder %s6275_s17, %s6644_s12 }
  0x74   : > { %p6283_p12 = por %p6282_p10, %p6281_p8 }
  0x75   : > { %p6279_p2 = pneg %p6278_p7 }
  0x76   : > { %p6285_p1 = por %p6284_p0, %p6283_p12 }
  0x78   : > { %p6286_p9 = pnand %p6285_p1, %p6279_p2 }
  0x7a   : > { %6289 = shalt.err (!%p6286_p9)
}
  0x7b   : > { %s6290_s26 = scalar_lea.vmem %s6667_s18, 1024  ;;  %s6418_s20 = smov [#allocation7]  }
  0x7c   : > { %p6291_p13 = scmp.ne.s32.totalorder %s6667_s18, %s6290_s26  ;;  %s6295_s5 = sshll.u32 %s6418_s20, 4  ;;  %s6296_s5 = int_to_ptr.vmem [resolvable:$false] %s6295_s5 }
  0x7d   : > { %s6297_s8 = scalar_lea.vmem %s6296_s5, 2048  ;;  %p6298_p11 = scmp.lt.s32.totalorder %s6667_s18, %s6296_s5 }
  0x7e   : > { %p6293_p3 = pnand %p6291_p13, %p8105_p5  ;;  %p6299_p6 = scmp.lt.s32.totalorder %s6297_s8, %s6290_s26 }
  0x80   : > { %p6294_p4 = pneg %p6293_p3  ;;  %p6300_p7 = por %p6299_p6, %p6298_p11 }
  0x82   : > { %p6301_p8 = pnand %p6300_p7, %p6294_p4 }
  0x84   : > { %6304 = shalt.err (!%p6301_p8)
}
  0x85   : > { %s6419_s29 = smov 64   ;;  %s6420_s9 = smov 4  }
  0x86   : > { %p8106_p2 = scmp.ne.s32.totalorder %s8098_s16, 0  ;;  %s6305_s10 = scalar_lea.hbm %s6604_s13, 4096 }
  0x87   : > { %p6306_p10 = scmp.ne.s32.totalorder %s6604_s13, %s6305_s10  ;;  %s6310_s19 = scalar_lea.hbm %s8078_s6, 8192 }
  0x88   : > { %5848 = dma.hbm_to_vmem [thread:$0]  (!%p8106_p2), %s6644_s12, 1024, %s6667_s18, %s6530_s23, %s6419_s29, %s6419_s29, %s6420_s9  }
  0x89   : > { %p6308_p12 = pnand %p6306_p10, %p8105_p5  ;;  %p6311_p1 = scmp.lt.u32.totalorder %s6604_s13, %s8078_s6 }
  0x8a   : > { %p6312_p9 = scmp.lt.u32.totalorder %s6310_s19, %s6305_s10  ;;  %p6314_p3 = scmp.lt.u32.totalorder %s6305_s10, %s6604_s13 }
  0x8b   : > { %p6309_p0 = pneg %p6308_p12 }
  0x8c   : > { %p6313_p13 = por %p6312_p9, %p6311_p1 }
  0x8e   : > { %p6315_p4 = por %p6314_p3, %p6313_p13 }
  0x90   : > { %p6316_p11 = pnand %p6315_p4, %p6309_p0 }
  0x92   : > { %6319 = shalt.err (!%p6316_p11)
}
  0x93   : > { %s6320_s12 = scalar_lea.vmem %s6608_s22, 4096  ;;  %s6421_s23 = smov [#allocation10]  }
  0x94   : > { %p6321_p6 = scmp.ne.s32.totalorder %s6608_s22, %s6320_s12  ;;  %s6325_s18 = sshll.u32 %s6421_s23, 4  ;;  %s6326_s18 = int_to_ptr.vmem [resolvable:$false] %s6325_s18 }
  0x95   : > { %s6327_s27 = scalar_lea.vmem %s6326_s18, 8192  ;;  %p6328_p10 = scmp.lt.s32.totalorder %s6608_s22, %s6326_s18 }
  0x96   : > { %p6323_p7 = pnand %p6321_p6, %p8105_p5  ;;  %p6329_p12 = scmp.lt.s32.totalorder %s6327_s27, %s6320_s12 }
  0x98   : > { %p6324_p8 = pneg %p6323_p7  ;;  %p6330_p1 = por %p6329_p12, %p6328_p10 }
  0x9a   : > { %p6331_p9 = pnand %p6330_p1, %p6324_p8 }
  0x9c   : > { %6334 = shalt.err (!%p6331_p9)
}
  0x9d   : > { %5854 = dma.hbm_to_vmem [thread:$0]  (!%p8106_p2), %s6604_s13, 4096, %s6608_s22, %s6575_s3, %s6419_s29, %s6419_s29, %s6420_s9  }
  0x9e   : > { %p8107_p5 = scmp.ne.s32.totalorder %s8103_s11, 0 }
  0x9f   : > { %p8108_p0 = scmp.eq.s32.totalorder (!%p8107_p5), %s6611_s24, 0 }
  0xa0   : > { %379 = sbr.rel (%p8107_p5) target bundleno = 3326 (0xcfe), region = 52 }
  0xa7   : > { %6378 = dma.done.wait (%p8108_p0), [#allocation3], 512   ;;  %p8109_p13 = pmov %p8108_p0 }
  0xa8   : > { %s385_s16 = sand.u32 1, %s6611_s24   ;;  %s387_s25 = sand.u32 1, %s6399_s28  }
  0xa9   : > { %6380 = vsyncadd (%p8109_p13), [#allocation3], 4294966784  ;;  %s5821_s26 = smul.u32 192, %s387_s25  ;;  %s386_s20 = scalar_lea.sflag [#allocation6], %s385_s16 }
  0xaa   : > { %p8110_p3 = scmp.ne.s32.totalorder %s8102_s15, 0 }
  0xab   : > { %s6727_s5 = scalar_lea.vmem [#allocation5], %s5821_s26 }
  0xac   : > { %6382 = dma.done.wait (%p8110_p3), %s386_s20, 4096  }
  0xad   : > { %6384 = vsyncadd (%p8110_p3), %s386_s20, 4294963200  ;;  %s5400_s3 = sshll.u32 %s387_s25, 6  ;;  %s5401_s13 = sshll.u32 %s387_s25, 8 }
  0xae   : > { %s6733_s22 = scalar_lea.vmem [#allocation7], %s5400_s3  ;;  %s404_s11 = scalar_lea.sflag [#allocation9], %s385_s16 }
  0xaf   : > { %s6735_s8 = scalar_lea.vmem [#allocation8], %s5401_s13 }
  0xb0   : > { %6386 = dma.done.wait (%p8110_p3), %s404_s11, 8192  }
  0xb1   : > { %6388 = vsyncadd (%p8110_p3), %s404_s11, 4294959104  ;;  %p467_p2 = scmp.lt.s32.totalorder %s6611_s24, 1  ;;  %s6753_s23 = scalar_lea.vmem [#allocation10], %s5401_s13 }
  0xb2   : > { %p8111_p4 = scmp.ne.s32.totalorder %s6611_s24, 0 }
  0xb3   : > { %s468_s29 = scalar_select %p467_p2, %s6611_s24, 1 }
  0xb4   : > { %479 = sbr.rel (%p8111_p4) target bundleno = 187 (0xbb), region = 76  ;;  %v480_v0 = vld [vmem:[#allocation2] sm:$0xff] (!%p8111_p4)  ;;  %v481_v1 = vld [vmem:[#allocation2 + $0x8] sm:$0xff] (!%p8111_p4)  ;;  %v482_v2 = vld [vmem:[#allocation2 + $0x10] sm:$0xff] (!%p8111_p4) }
  0xb5   : > { %s5403_s9 = sshll.u32 %s468_s29, 3  ;;  %s5404_s10 = sshll.u32 %s468_s29, 2  ;;  %484 = vst [vmem:[#allocation11] sm:$0xff] (!%p8111_p4), %v480_v0  ;;  %485 = vst [vmem:[#allocation11 + $0x8] sm:$0xff] (!%p8111_p4), %v481_v1  ;;  %v483_v3 = vld [vmem:[#allocation2 + $0x18] sm:$0xff] (!%p8111_p4) }
  0xb6   : > { %s6746_s19 = scalar_lea.vmem %s8073_s1, %s5403_s9  ;;  %s6751_s12 = scalar_lea.vmem %s8074_s2, %s5404_s10  ;;  %486 = vst [vmem:[#allocation11 + $0x10] sm:$0xff] (!%p8111_p4), %v482_v2  ;;  %487 = vst [vmem:[#allocation11 + $0x18] sm:$0xff] (!%p8111_p4), %v483_v3 }
  0xbb PF: > { %v5942_v8 = vld [vmem:[%s6727_s5 + $0x4] ss:$12 sps:$4 sm:$0xff]   ;;  %v5944_v9 = vld [vmem:[%s6727_s5] ss:$12 sps:$4 sm:$0xff]   ;;  %v5945_v10 = vld [vmem:[%s6727_s5 + $0x1c] ss:$12 sps:$4 sm:$0xff]   ;;  %v539_v54 = vlaneseq }
  0xbc   : > { %v488_v4 = vld [vmem:[#allocation11] sm:$0xff]  ;;  %v489_v6 = vld [vmem:[#allocation11 + $0x8] sm:$0xff]  ;;  %717 = vmatprep.subr.bf16.mxu0 %v5942_v8  ;;  %v5952_v31 = vld [vmem:[%s6727_s5 + $0x30] ss:$12 sps:$4 sm:$0xff]   ;;  %v6422_v43 = vmov 0   ;;  %s6423_s15 = smov 96  }
  0xbd   : > { %v490_v5 = vld [vmem:[#allocation11 + $0x10] sm:$0xff]  ;;  %494 = vadd.xlane.f32.xlu0 %v488_v4  ;;  %v491_v7 = vld [vmem:[#allocation11 + $0x18] sm:$0xff]  ;;  %718 = vmatpush1.bf16.msra.mxu0 %v5944_v9  ;;  %v5951_v30 = vld [vmem:[%s6727_s5 + $0x20] ss:$12 sps:$4 sm:$0xff]   ;;  %v6798_v60 = vshrl.u32 %v539_v54, 7  ;;  %s6424_s18 = smov 64  }
  0xbe   : > { %498 = vadd.xlane.f32.xlu1 %v490_v5  ;;  %v5947_v11 = vld [vmem:[%s6727_s5 + $0x8] ss:$12 sps:$4 sm:$0xff]   ;;  %719 = vmatprep.subr.bf16.mxu0 %v5945_v10  ;;  %v5948_v28 = vld [vmem:[%s6727_s5 + $0x18] ss:$12 sps:$4 sm:$0xff]   ;;  %v5959_v36 = vld [vmem:[%s6727_s5 + $0x50] ss:$12 sps:$4 sm:$0xff]  }
  0xbf   : > { %5683 = vmatprep.subr.bf16.mxu1 %v5947_v11  ;;  %v5949_v29 = vld [vmem:[%s6727_s5 + $0x34] ss:$12 sps:$4 sm:$0xff]   ;;  %v5953_v32 = vld [vmem:[%s6727_s5 + $0x4c] ss:$12 sps:$4 sm:$0xff]   ;;  %v5957_v35 = vld [vmem:[%s6727_s5 + $0x64] ss:$12 sps:$4 sm:$0xff]   ;;  %749 = vmatprep.mubr.bf16.mxu0 %v6422_v43 }
  0xc0   : > { %5684 = vmatpush3.bf16.msra.mxu1 %v5947_v11  ;;  %v5955_v33 = vld [vmem:[%s6727_s5 + $0x38] ss:$12 sps:$4 sm:$0xff]   ;;  %v5956_v34 = vld [vmem:[%s6727_s5 + $0x48] ss:$12 sps:$4 sm:$0xff]   ;;  %v5960_v37 = vld [vmem:[%s6727_s5 + $0x60] ss:$12 sps:$4 sm:$0xff]  }
  0xc1   : > { %496 = vadd.xlane.f32.xlu0 %v489_v6  ;;  %720 = vmatpush1.bf16.msra.mxu0 %v5948_v28  ;;  %v5961_v38 = vld [vmem:[%s6727_s5 + $0x7c] ss:$12 sps:$4 sm:$0xff]   ;;  %v5964_v40 = vld [vmem:[%s6727_s5 + $0x78] ss:$12 sps:$4 sm:$0xff]   ;;  %v5965_v41 = vld [vmem:[%s6727_s5 + $0x94] ss:$12 sps:$4 sm:$0xff]  }
  0xc2   : > { %500 = vadd.xlane.f32.xlu1 %v491_v7  ;;  %721 = vmatprep.subr.bf16.mxu0 %v5949_v29  ;;  %v5963_v39 = vld [vmem:[%s6727_s5 + $0x68] ss:$12 sps:$4 sm:$0xff]   ;;  %v5967_v42 = vld [vmem:[%s6727_s5 + $0x80] ss:$12 sps:$4 sm:$0xff]   ;;  %v5968_v44 = vld [vmem:[%s6727_s5 + $0x90] ss:$12 sps:$4 sm:$0xff]  }
  0xc3   : > { %5685 = vmatprep.subr.bf16.mxu1 %v5951_v30  ;;  %v5969_v45 = vld [vmem:[%s6727_s5 + $0xac] ss:$12 sps:$4 sm:$0xff]   ;;  %v5972_v47 = vld [vmem:[%s6727_s5 + $0xa8] ss:$12 sps:$4 sm:$0xff]   ;;  %v5973_v48 = vld [vmem:[%s6727_s5 + $0xb0] ss:$12 sps:$4 sm:$0xff]  }
  0xc4   : > { %5686 = vmatpush3.bf16.msra.mxu1 %v5951_v30  ;;  %v5971_v46 = vld [vmem:[%s6727_s5 + $0x98] ss:$12 sps:$4 sm:$0xff]   ;;  %v6801_v63 = vsub.s32 0, %v6798_v60  ;;  %s6425_s27 = smov 32   ;;  %vm6427_vm0 = vmmov 0   ;;  %vm2611_vm1 = vcmask 261120  }
  0xc5   : > { %722 = vmatpush1.bf16.msra.mxu0 %v5952_v31  ;;  %5687 = vmatprep.subr.bf16.mxu1 %v5955_v33  ;;  %v492_v0 = vld [vmem:[%s6746_s19] sm:$0x3f]  ;;  %vm2988_vm2 = vcmask 130048   ;;  %vm4121_vm3 = vcmask 523264   ;;  %vm4126_vm4 = vcmask 785408   ;;  %p5566_p11 = scmp.ge.s32.totalorder %s6611_s24, 1 }
  0xc6   : > { %723 = vmatprep.subr.bf16.mxu0 %v5953_v32  ;;  %v542_v3 = vrot.slane %v492_v0, %v6801_v63 }
  0xc8   : > { %5688 = vmatpush3.bf16.msra.mxu1 %v5955_v33 }
  0xc9   : > { %724 = vmatpush1.bf16.msra.mxu0 %v5956_v34  ;;  %5689 = vmatprep.subr.bf16.mxu1 %v5959_v36  ;;  %v6426_v34 = vmov 0.0  }
  0xca   : > { %725 = vmatprep.subr.bf16.mxu0 %v5957_v35  ;;  %v6428_v35 = vmov 1983009808  }
  0xcc   : > { %5690 = vmatpush3.bf16.msra.mxu1 %v5959_v36  ;;  %v942_v36 = vunpack.c.l.s4 %v6428_v35 }
  0xcd   : > { %726 = vmatpush1.bf16.msra.mxu0 %v5960_v37  ;;  %5691 = vmatprep.subr.bf16.mxu1 %v5963_v39 }
  0xce   : > { %727 = vmatprep.subr.bf16.mxu0 %v5961_v38 }
  0xd0   : > { %5692 = vmatpush3.bf16.msra.mxu1 %v5963_v39  ;;  %v6429_v39 = vmov 1934713408  }
  0xd1   : > { %728 = vmatpush1.bf16.msra.mxu0 %v5964_v40  ;;  %5693 = vmatprep.subr.bf16.mxu1 %v5967_v42  ;;  %v1006_v40 = vunpack.c.l.s4 %v6429_v39 }
  0xd2   : > { %729 = vmatprep.subr.bf16.mxu0 %v5965_v41  ;;  %v943_v41 = vunpack.c.0.s8 %v942_v36 }
  0xd4   : > { %5694 = vmatpush3.bf16.msra.mxu1 %v5967_v42 }
  0xd5   : > { %730 = vmatpush1.bf16.msra.mxu0 %v5968_v44  ;;  %5695 = vmatprep.subr.bf16.mxu1 %v5971_v46 }
  0xd6   : > { %731 = vmatprep.subr.bf16.mxu0 %v5969_v45  ;;  %v1007_v45 = vunpack.c.0.s8 %v1006_v40 }
  0xd8   : > { %5696 = vmatpush3.bf16.msra.mxu1 %v5971_v46  ;;  %v6907_v46 = vsub.s32 %v943_v41, %v6798_v60 }
  0xd9   : > { %732 = vmatpush1.bf16.msra.mxu0 %v5972_v47  ;;  %5697 = vmatprep.subr.bf16.mxu1 %v5973_v48 }
  0xda   : > { %5703 = vmatprep.subr.bf16.mxu0 %v6426_v34 }
  0xdc   : > { %5698 = vmatpush3.bf16.msra.mxu1 %v5973_v48 }
  0xdd   : > { %5715 = vmatprep.subr.bf16.mxu1 %v6426_v34 }
 0x14a   : > { %v495_v12 = vpop.xlane.xlu0 %494 }
 0x14b   : > { %v499_v13 = vpop.xlane.xlu1 %498  ;;  %v503_v14 = vmul.f32 0.0078125, %v495_v12 }
 0x14c   : > { %v505_v15 = vmul.f32 0.0078125, %v499_v13 }
 0x14d   : > { %v6761_v16 = vsub.f32 %v488_v4, %v503_v14  ;;  %v6807_v4 = vsub.s32 1, %v6798_v60 }
 0x14e   : > { %v6763_v17 = vsub.f32 %v490_v5, %v505_v15  ;;  %v497_v18 = vpop.xlane.xlu0 %496 }
 0x14f   : > { %v501_v19 = vpop.xlane.xlu1 %500  ;;  %v504_v20 = vmul.f32 0.0078125, %v497_v18  ;;  %v511_v21 = vmul.f32 %v6761_v16, %v6761_v16  ;;  %v550_v9 = vrot.slane %v492_v0, %v6807_v4 }
 0x150   : > { %v506_v22 = vmul.f32 0.0078125, %v501_v19  ;;  %v513_v25 = vmul.f32 %v6763_v17, %v6763_v17 }
 0x151   : > { %v6767_v23 = vsub.f32 %v489_v6, %v504_v20  ;;  %515 = vadd.xlane.f32.xlu0 %v511_v21 }
 0x152   : > { %v6769_v24 = vsub.f32 %v491_v7, %v506_v22 }
 0x153   : > { %v512_v26 = vmul.f32 %v6767_v23, %v6767_v23 }
 0x154   : > { %v514_v27 = vmul.f32 %v6769_v24, %v6769_v24 }
 0x155   : > { %519 = vadd.xlane.f32.xlu0 %v513_v25  ;;  %517 = vadd.xlane.f32.xlu1 %v512_v26 }
 0x159   : > { %521 = vadd.xlane.f32.xlu1 %v514_v27 }
 0x1de   : > { %v516_v49 = vpop.xlane.xlu0 %515 }
 0x1df   : > { %v523_v50 = vmul.f32 0.0078125, %v516_v49 }
 0x1e1   : > { %v527_v51 = vadd.f32 1e-05, %v523_v50 }
 0x1e2   : > { %v518_v52 = vpop.xlane.xlu1 %517  ;;  %v520_v53 = vpop.xlane.xlu0 %519 }
 0x1e3   : > { %6062 = vrsqrt.f32 %v527_v51  ;;  %v524_v55 = vmul.f32 0.0078125, %v518_v52  ;;  %v525_v56 = vmul.f32 0.0078125, %v520_v53  ;;  %v6912_v53 = vsub.s32 %v1007_v45, %v6798_v60 }
 0x1e5   : > { %v528_v57 = vadd.f32 1e-05, %v524_v55  ;;  %v529_v58 = vadd.f32 1e-05, %v525_v56 }
 0x1e6   : > { %v522_v59 = vpop.xlane.xlu1 %521 }
 0x1e7   : > { %6064 = vrsqrt.f32 %v528_v57  ;;  %v526_v61 = vmul.f32 0.0078125, %v522_v59 }
 0x1e8   : > { %6066 = vrsqrt.f32 %v529_v58 }
 0x1e9   : > { %v530_v62 = vadd.f32 1e-05, %v526_v61 }
 0x1eb   : > { %6068 = vrsqrt.f32 %v530_v62 }
 0x1ed   : > { %v6063_v1 = vpop.eup %6062 }
 0x1ee   : > { %v535_v2 = vmul.f32 %v6063_v1, %v6761_v16 }
 0x1f0   : > { %v543_v8 = vmul.f32 %v542_v3, %v535_v2 }
 0x1f1   : > { %v6065_v5 = vpop.eup %6064 }
 0x1f2   : > { %v6067_v6 = vpop.eup %6066  ;;  %v536_v7 = vmul.f32 %v6065_v5, %v6767_v23  ;;  %v551_v13 = vadd.f32 %v550_v9, %v543_v8 }
 0x1f3   : > { %v537_v10 = vmul.f32 %v6067_v6, %v6763_v17 }
 0x1f4   : > { %v544_v11 = vmul.f32 %v542_v3, %v536_v7 }
 0x1f5   : > { %v6069_v12 = vpop.eup %6068  ;;  %v545_v16 = vmul.f32 %v542_v3, %v537_v10 }
 0x1f6   : > { %v552_v14 = vadd.f32 %v550_v9, %v544_v11  ;;  %v538_v15 = vmul.f32 %v6069_v12, %v6769_v24 }
 0x1f7   : > { %v553_v20 = vadd.f32 %v550_v9, %v545_v16 }
 0x1f8   : > { %v555_v18 = vpack.c.bf16 %v552_v14, %v551_v13  ;;  %v546_v19 = vmul.f32 %v542_v3, %v538_v15 }
 0x1fa   : > { %750 = vmatmul.mubr.bf16.vlgmr.msra.gmra.mrb[0].mxu0 %v555_v18  ;;  %5699 = vmatprep.mubr.bf16.mxu1 %v555_v18  ;;  %v554_v21 = vadd.f32 %v550_v9, %v546_v19 }
 0x1fb   : > { %759 = vmatprep.mubr.bf16.mxu0 %v6422_v43 }
 0x1fc   : > { %v556_v22 = vpack.c.bf16 %v554_v21, %v553_v20 }
 0x1fe   : > { %5700 = vmatmul.mubr.bf16.vlgmr.msra.gmra.mrb[0].mxu1 %v556_v22 }
 0x1ff   : > { %5717 = vmatprep.mubr.msk.bf16.mxu1 %vm6427_vm0, %v6426_v34 }
 0x202   : > { %760 = vmatmul.mubr.bf16.gmra.mrb[4].mxu0 %v556_v22 }
 0x203   : > { %5705 = vmatprep.mubr.msk.bf16.mxu0 %vm6427_vm0, %v6426_v34 }
 0x2cd   : > { %v6814_v23 = vpop.f32.mrb[0].mxu0 }
 0x2ce   : > { %823 = vrot.lane.b32.xlu0 %v6814_v23, %s6423_s15  ;;  %v6818_v17 = vpop.f32.mrb[1].mxu0 }
 0x2cf   : > { %875 = vrot.lane.b32.xlu1 %v6818_v17, %s6424_s18  ;;  %v6822_v24 = vpop.f32.mrb[2].mxu0 }
 0x2d0   : > { %v6824_v25 = vpop.f32.mrb[3].mxu0 }
 0x2d1   : > { %v6826_v26 = vpop.f32.mrb[0].mxu1 }
 0x2d2   : > { %863 = vrot.lane.b32.xlu0 %v6818_v17, %s6423_s15  ;;  %v6830_v27 = vpop.f32.mrb[1].mxu1 }
 0x2d3   : > { %825 = vrot.lane.b32.xlu1 %v6822_v24, %s6423_s15  ;;  %v6834_v28 = vpop.f32.mrb[2].mxu1 }
 0x2d4   : > { %v6836_v29 = vpop.f32.mrb[3].mxu1 }
 0x2d5   : > { %v6838_v30 = vpop.f32.mrb[4].mxu0 }
 0x2d6   : > { %887 = vrot.lane.b32.xlu0 %v6818_v17, %s6425_s27  ;;  %v6842_v31 = vpop.f32.mrb[5].mxu0 }
 0x2d7   : > { %865 = vrot.lane.b32.xlu1 %v6824_v25, %s6423_s15  ;;  %v6846_v32 = vpop.f32.mrb[6].mxu0 }
 0x2d8   : > { %v6848_v33 = vpop.f32.mrb[7].mxu0 }
 0x2da   : > { %835 = vrot.lane.b32.xlu0 %v6814_v23, %s6424_s18 }
 0x2db   : > { %877 = vrot.lane.b32.xlu1 %v6824_v25, %s6424_s18 }
 0x2de   : > { %847 = vrot.lane.b32.xlu0 %v6814_v23, %s6425_s27 }
 0x2df   : > { %889 = vrot.lane.b32.xlu1 %v6824_v25, %s6425_s27 }
 0x2e2   : > { %827 = vrot.lane.b32.xlu0 %v6838_v30, %s6423_s15 }
 0x2e3   : > { %837 = vrot.lane.b32.xlu1 %v6822_v24, %s6424_s18 }
 0x2e6   : > { %867 = vrot.lane.b32.xlu0 %v6842_v31, %s6423_s15 }
 0x2e7   : > { %849 = vrot.lane.b32.xlu1 %v6822_v24, %s6425_s27 }
 0x2ea   : > { %879 = vrot.lane.b32.xlu0 %v6842_v31, %s6424_s18 }
 0x2eb   : > { %829 = vrot.lane.b32.xlu1 %v6846_v32, %s6423_s15 }
 0x2ee   : > { %891 = vrot.lane.b32.xlu0 %v6842_v31, %s6425_s27 }
 0x2ef   : > { %869 = vrot.lane.b32.xlu1 %v6848_v33, %s6423_s15 }
 0x2f2   : > { %839 = vrot.lane.b32.xlu0 %v6838_v30, %s6424_s18 }
 0x2f3   : > { %881 = vrot.lane.b32.xlu1 %v6848_v33, %s6424_s18 }
 0x2f6   : > { %851 = vrot.lane.b32.xlu0 %v6838_v30, %s6425_s27 }
 0x2f7   : > { %893 = vrot.lane.b32.xlu1 %v6848_v33, %s6425_s27 }
 0x2fa   : > { %903 = vrot.lane.b32.xlu0 %v6830_v27, %s6423_s15 }
 0x2fb   : > { %841 = vrot.lane.b32.xlu1 %v6846_v32, %s6424_s18 }
 0x2fe   : > { %927 = vrot.lane.b32.xlu0 %v6830_v27, %s6425_s27 }
 0x2ff   : > { %853 = vrot.lane.b32.xlu1 %v6846_v32, %s6425_s27 }
 0x303   : > { %905 = vrot.lane.b32.xlu1 %v6836_v29, %s6423_s15 }
 0x307   : > { %915 = vrot.lane.b32.xlu1 %v6830_v27, %s6424_s18 }
 0x30b   : > { %917 = vrot.lane.b32.xlu1 %v6836_v29, %s6424_s18 }
 0x30f   : > { %929 = vrot.lane.b32.xlu1 %v6836_v29, %s6425_s27 }
 0x340   : > { %v824_v37 = vpop.permute.xlu0 %823 }
 0x341   : > { %v876_v38 = vpop.permute.xlu1 %875 }
 0x342   : > { %v971_v47 = vcombine.low %v6818_v17, %v876_v38  ;;  %v972_v48 = vcombine.high %v6818_v17, %v876_v38 }
 0x344   : > { %v864_v42 = vpop.permute.xlu0 %863  ;;  %v979_v54 = vrot.slane %v971_v47, %v6907_v46  ;;  %v986_v55 = vrot.slane %v972_v48, %v6907_v46 }
 0x345   : > { %v6904_v44 = vpop.permute.xlu1 %825 }
 0x348   : > { %v888_v49 = vpop.permute.xlu0 %887 }
 0x349   : > { %v987_v50 = vcombine.low %v864_v42, %v888_v49  ;;  %v988_v51 = vcombine.high %v864_v42, %v888_v49  ;;  %v866_v52 = vpop.permute.xlu1 %865 }
 0x34b   : > { %v995_v56 = vrot.slane %v987_v50, %v6907_v46  ;;  %v1002_v57 = vrot.slane %v988_v51, %v6907_v46 }
 0x34c   : > { %v836_v58 = vpop.permute.xlu0 %835 }
 0x34d   : > { %v1035_v59 = vcombine.low %v979_v54, %v995_v56  ;;  %v1036_v61 = vcombine.high %v979_v54, %v995_v56  ;;  %v1051_v62 = vcombine.low %v986_v55, %v1002_v57  ;;  %v1052_v0 = vcombine.high %v986_v55, %v1002_v57  ;;  %v878_v1 = vpop.permute.xlu1 %877 }
 0x34e   : > { %v939_v2 = vcombine.low %v6814_v23, %v836_v58  ;;  %v940_v3 = vcombine.high %v6814_v23, %v836_v58  ;;  %v1175_v5 = vcombine.low %v6824_v25, %v878_v1  ;;  %v1176_v6 = vcombine.high %v6824_v25, %v878_v1 }
 0x34f   : > { %v1043_v7 = vrot.slane %v1035_v59, %v6912_v53  ;;  %v1050_v8 = vrot.slane %v1036_v61, %v6912_v53  ;;  %v1059_v9 = vrot.slane %v1051_v62, %v6912_v53  ;;  %v1066_v10 = vrot.slane %v1052_v0, %v6912_v53 }
 0x350   : > { %v947_v11 = vrot.slane %v939_v2, %v6907_v46  ;;  %v954_v12 = vrot.slane %v940_v3, %v6907_v46  ;;  %v1183_v13 = vrot.slane %v1175_v5, %v6907_v46  ;;  %v1190_v14 = vrot.slane %v1176_v6, %v6907_v46  ;;  %v848_v15 = vpop.permute.xlu0 %847 }
 0x351   : > { %v5431_v16 = vcombine.low %v1043_v7, %v1050_v8  ;;  %v5433_v18 = vcombine.high %v1043_v7, %v1050_v8  ;;  %v5435_v19 = vcombine.low %v1059_v9, %v1066_v10  ;;  %v5437_v20 = vcombine.high %v1059_v9, %v1066_v10  ;;  %v890_v21 = vpop.permute.xlu1 %889 }
 0x352   : > { %v955_v22 = vcombine.low %v824_v37, %v848_v15  ;;  %v956_v23 = vcombine.high %v824_v37, %v848_v15  ;;  %v1191_v17 = vcombine.low %v866_v52, %v890_v21  ;;  %v1192_v25 = vcombine.high %v866_v52, %v890_v21 }
 0x353   : > { %v6931_v35 = vrot.slane %v5431_v16, %v6907_v46  ;;  %v6934_v36 = vrot.slane %v5433_v18, %v6907_v46  ;;  %v6937_v38 = vrot.slane %v5435_v19, %v6907_v46  ;;  %v6940_v39 = vrot.slane %v5437_v20, %v6907_v46 }
 0x354   : > { %v963_v40 = vrot.slane %v955_v22, %v6907_v46  ;;  %v970_v41 = vrot.slane %v956_v23, %v6907_v46  ;;  %v1199_v37 = vrot.slane %v1191_v17, %v6907_v46  ;;  %v1206_v42 = vrot.slane %v1192_v25, %v6907_v46  ;;  %v6946_v45 = vpop.permute.xlu0 %827 }
 0x355   : > { %v838_v47 = vpop.permute.xlu1 %837  ;;  %v1835_v48 = vcombine.low %v6931_v35, %v6934_v36  ;;  %v1867_v49 = vcombine.low %v6937_v38, %v6940_v39  ;;  %v1836_v50 = vcombine.high %v6931_v35, %v6934_v36  ;;  %v1868_v51 = vcombine.high %v6937_v38, %v6940_v39 }
 0x356   : > { %v1003_v52 = vcombine.low %v947_v11, %v963_v40  ;;  %v1004_v54 = vcombine.high %v947_v11, %v963_v40  ;;  %v1019_v55 = vcombine.low %v954_v12, %v970_v41  ;;  %v1020_v56 = vcombine.high %v954_v12, %v970_v41 }
 0x357   : > { %v1239_v57 = vcombine.low %v1183_v13, %v1199_v37  ;;  %v1240_v58 = vcombine.high %v1183_v13, %v1199_v37  ;;  %v1255_v59 = vcombine.low %v1190_v14, %v1206_v42  ;;  %v1256_v61 = vcombine.high %v1190_v14, %v1206_v42 }
 0x358   : > { %v1011_v62 = vrot.slane %v1003_v52, %v6912_v53  ;;  %v1018_v0 = vrot.slane %v1004_v54, %v6912_v53  ;;  %v1027_v1 = vrot.slane %v1019_v55, %v6912_v53  ;;  %v1034_v2 = vrot.slane %v1020_v56, %v6912_v53  ;;  %v868_v3 = vpop.permute.xlu0 %867 }
 0x359   : > { %v1247_v5 = vrot.slane %v1239_v57, %v6912_v53  ;;  %v1254_v6 = vrot.slane %v1240_v58, %v6912_v53  ;;  %v1263_v7 = vrot.slane %v1255_v59, %v6912_v53  ;;  %v1270_v8 = vrot.slane %v1256_v61, %v6912_v53  ;;  %v850_v9 = vpop.permute.xlu1 %849 }
 0x35a   : > { %v5430_v10 = vcombine.low %v1011_v62, %v1018_v0  ;;  %v5432_v11 = vcombine.high %v1011_v62, %v1018_v0  ;;  %v5434_v12 = vcombine.low %v1027_v1, %v1034_v2  ;;  %v5436_v13 = vcombine.high %v1027_v1, %v1034_v2 }
 0x35b   : > { %v5439_v14 = vcombine.low %v1247_v5, %v1254_v6  ;;  %v5441_v15 = vcombine.high %v1247_v5, %v1254_v6  ;;  %v5443_v16 = vcombine.low %v1263_v7, %v1270_v8  ;;  %v5445_v18 = vcombine.high %v1263_v7, %v1270_v8 }
 0x35c   : > { %v1763_v19 = vrot.slane %v5430_v10, %v6907_v46  ;;  %v1779_v20 = vrot.slane %v5432_v11, %v6907_v46  ;;  %v1795_v21 = vrot.slane %v5434_v12, %v6907_v46  ;;  %v1811_v22 = vrot.slane %v5436_v13, %v6907_v46  ;;  %v880_v23 = vpop.permute.xlu0 %879 }
 0x35d   : > { %v6969_v17 = vrot.slane %v5439_v14, %v6907_v46  ;;  %v6972_v25 = vrot.slane %v5441_v15, %v6907_v46  ;;  %v6975_v40 = vrot.slane %v5443_v16, %v6907_v46  ;;  %v6978_v41 = vrot.slane %v5445_v18, %v6907_v46  ;;  %v6980_v37 = vpop.permute.xlu1 %829 }
 0x35e   : > { %v1819_v42 = vcombine.low %v1763_v19, %v1779_v20  ;;  %v1820_v52 = vcombine.high %v1763_v19, %v1779_v20  ;;  %v1851_v54 = vcombine.low %v1795_v21, %v1811_v22  ;;  %v1852_v55 = vcombine.high %v1795_v21, %v1811_v22 }
 0x35f   : > { %v1143_v56 = vcombine.low %v6822_v24, %v838_v47  ;;  %v1144_v57 = vcombine.high %v6822_v24, %v838_v47  ;;  %v1159_v58 = vcombine.low %v6904_v44, %v850_v9  ;;  %v1160_v59 = vcombine.high %v6904_v44, %v850_v9 }
 0x360   : > { %v6987_v61 = vrot.slane %v1819_v42, %v6912_v53  ;;  %v6990_v62 = vrot.slane %v1820_v52, %v6912_v53  ;;  %v6993_v0 = vrot.slane %v1851_v54, %v6912_v53  ;;  %v6996_v1 = vrot.slane %v1852_v55, %v6912_v53  ;;  %v892_v2 = vpop.permute.xlu0 %891 }
 0x361   : > { %v1151_v5 = vrot.slane %v1143_v56, %v6907_v46  ;;  %v1158_v24 = vrot.slane %v1144_v57, %v6907_v46  ;;  %v1167_v47 = vrot.slane %v1159_v58, %v6907_v46  ;;  %v1174_v44 = vrot.slane %v1160_v59, %v6907_v46  ;;  %v7002_v6 = vpop.permute.xlu1 %869 }
 0x362   : > { %v1883_v7 = vcombine.low %v6987_v61, %v6993_v0  ;;  %v1379_v8 = vcombine.low %v6842_v31, %v880_v23  ;;  %v1380_v9 = vcombine.high %v6842_v31, %v880_v23  ;;  %v1395_v10 = vcombine.low %v868_v3, %v892_v2 }
 0x363   : > { %v1207_v11 = vcombine.low %v1151_v5, %v1167_v47  ;;  %v1208_v12 = vcombine.high %v1151_v5, %v1167_v47  ;;  %v1223_v13 = vcombine.low %v1158_v24, %v1174_v44  ;;  %v1224_v14 = vcombine.high %v1158_v24, %v1174_v44 }
 0x364   : > { %v7008_v15 = vmul.f32 0.17677669, %v1883_v7  ;;  %v1387_v16 = vrot.slane %v1379_v8, %v6907_v46  ;;  %v1394_v18 = vrot.slane %v1380_v9, %v6907_v46  ;;  %v1396_v19 = vcombine.high %v868_v3, %v892_v2  ;;  %v840_v20 = vpop.permute.xlu0 %839 }
 0x365   : > { %v1215_v21 = vrot.slane %v1207_v11, %v6912_v53  ;;  %v1222_v22 = vrot.slane %v1208_v12, %v6912_v53  ;;  %v1231_v42 = vrot.slane %v1223_v13, %v6912_v53  ;;  %v1238_v31 = vrot.slane %v1224_v14, %v6912_v53  ;;  %v882_v56 = vpop.permute.xlu1 %881 }
 0x366   : > { %v1403_v23 = vrot.slane %v1395_v10, %v6907_v46  ;;  %v1410_v52 = vrot.slane %v1396_v19, %v6907_v46  ;;  %v1347_v54 = vcombine.low %v6838_v30, %v840_v20  ;;  %v1348_v55 = vcombine.high %v6838_v30, %v840_v20 }
 0x367   : > { %v5438_v57 = vcombine.low %v1215_v21, %v1222_v22  ;;  %v5440_v3 = vcombine.high %v1215_v21, %v1222_v22  ;;  %v5442_v58 = vcombine.low %v1231_v42, %v1238_v31  ;;  %v5444_v59 = vcombine.high %v1231_v42, %v1238_v31 }
 0x368   : > { %v1443_v2 = vcombine.low %v1387_v16, %v1403_v23  ;;  %v1444_v5 = vcombine.high %v1387_v16, %v1403_v23  ;;  %v1459_v24 = vcombine.low %v1394_v18, %v1410_v52  ;;  %v1460_v47 = vcombine.high %v1394_v18, %v1410_v52 }
 0x369   : > { %v1899_v44 = vrot.slane %v5438_v57, %v6907_v46  ;;  %v1915_v7 = vrot.slane %v5440_v3, %v6907_v46  ;;  %v1931_v8 = vrot.slane %v5442_v58, %v6907_v46  ;;  %v1947_v9 = vrot.slane %v5444_v59, %v6907_v46  ;;  %v894_v42 = vpop.permute.xlu1 %893 }
 0x36a   : > { %v1451_v10 = vrot.slane %v1443_v2, %v6912_v53  ;;  %v1458_v30 = vrot.slane %v1444_v5, %v6912_v53  ;;  %v1467_v11 = vrot.slane %v1459_v24, %v6912_v53  ;;  %v1474_v12 = vrot.slane %v1460_v47, %v6912_v53 }
 0x36b   : > { %v1955_v13 = vcombine.low %v1899_v44, %v1915_v7  ;;  %v1956_v14 = vcombine.high %v1899_v44, %v1915_v7  ;;  %v1987_v16 = vcombine.low %v1931_v8, %v1947_v9  ;;  %v1988_v18 = vcombine.high %v1931_v8, %v1947_v9 }
 0x36c   : > { %v5451_v19 = vcombine.low %v1451_v10, %v1458_v30  ;;  %v5453_v20 = vcombine.high %v1451_v10, %v1458_v30  ;;  %v5455_v21 = vcombine.low %v1467_v11, %v1474_v12  ;;  %v5457_v22 = vcombine.high %v1467_v11, %v1474_v12 }
 0x36d   : > { %v7029_v31 = vrot.slane %v1955_v13, %v6912_v53  ;;  %v7032_v23 = vrot.slane %v1956_v14, %v6912_v53  ;;  %v7035_v52 = vrot.slane %v1987_v16, %v6912_v53  ;;  %v7038_v57 = vrot.slane %v1988_v18, %v6912_v53  ;;  %v7095_v13 = vpop.permute.xlu1 %841 }
 0x36e   : > { %v7041_v3 = vrot.slane %v5451_v19, %v6907_v46  ;;  %v7044_v58 = vrot.slane %v5453_v20, %v6907_v46  ;;  %v7047_v59 = vrot.slane %v5455_v21, %v6907_v46  ;;  %v7050_v2 = vrot.slane %v5457_v22, %v6907_v46 }
 0x36f   : > { %v2019_v5 = vcombine.low %v7029_v31, %v7035_v52  ;;  %v1355_v24 = vrot.slane %v1347_v54, %v6907_v46  ;;  %v1362_v47 = vrot.slane %v1348_v55, %v6907_v46  ;;  %v1583_v44 = vcombine.low %v6848_v33, %v882_v56  ;;  %v852_v55 = vpop.permute.xlu0 %851 }
 0x370   : > { %v1584_v7 = vcombine.high %v6848_v33, %v882_v56  ;;  %v7062_v8 = vrot.slane %v1835_v48, %v6912_v53  ;;  %v7068_v9 = vrot.slane %v1867_v49, %v6912_v53  ;;  %v1971_v54 = vcombine.low %v6969_v17, %v6972_v25 }
 0x371   : > { %v7072_v10 = vmul.f32 0.17677669, %v2019_v5  ;;  %v1591_v33 = vrot.slane %v1583_v44, %v6907_v46  ;;  %v2003_v56 = vcombine.low %v6975_v40, %v6978_v41  ;;  %v7081_v48 = vrot.slane %v1836_v50, %v6912_v53 }
 0x372   : > { %v1598_v49 = vrot.slane %v1584_v7, %v6907_v46  ;;  %v1887_v30 = vcombine.low %v7062_v8, %v7068_v9  ;;  %v7087_v11 = vrot.slane %v1971_v54, %v6912_v53  ;;  %v7093_v12 = vrot.slane %v1868_v51, %v6912_v53 }
 0x373   : > { %v7098_v35 = vrot.slane %v2003_v56, %v6912_v53  ;;  %v1972_v36 = vcombine.high %v6969_v17, %v6972_v25  ;;  %v2004_v50 = vcombine.high %v6975_v40, %v6978_v41  ;;  %v1363_v14 = vcombine.low %v6946_v45, %v852_v55 }
 0x374   : > { %v1889_v16 = vcombine.low %v7081_v48, %v7093_v12  ;;  %v1364_v38 = vcombine.high %v6946_v45, %v852_v55  ;;  %v1599_v39 = vcombine.low %v7002_v6, %v894_v42  ;;  %v1600_v51 = vcombine.high %v7002_v6, %v894_v42  ;;  %v7126_v55 = vpop.permute.xlu1 %853 }
 0x375   : > { %v2023_v18 = vcombine.low %v7087_v11, %v7098_v35  ;;  %v7113_v19 = vrot.slane %v1972_v36, %v6912_v53  ;;  %v7116_v17 = vrot.slane %v2004_v50, %v6912_v53  ;;  %v1371_v25 = vrot.slane %v1363_v14, %v6907_v46 }
 0x376   : > { %v1378_v40 = vrot.slane %v1364_v38, %v6907_v46  ;;  %v1607_v41 = vrot.slane %v1599_v39, %v6907_v46  ;;  %v1614_v45 = vrot.slane %v1600_v51, %v6907_v46  ;;  %v1551_v6 = vcombine.low %v6846_v32, %v7095_v13 }
 0x377   : > { %v2595_v20 = vpack.c.bf16 %v2023_v18, %v1887_v30  ;;  %v2025_v21 = vcombine.low %v7113_v19, %v7116_v17  ;;  %v1411_v22 = vcombine.low %v1355_v24, %v1371_v25  ;;  %v1412_v42 = vcombine.high %v1355_v24, %v1371_v25  ;;  %v904_v25 = vpop.permute.xlu0 %903 }
 0x378   : > { %v1427_v5 = vcombine.low %v1362_v47, %v1378_v40  ;;  %v1428_v44 = vcombine.high %v1362_v47, %v1378_v40  ;;  %v1647_v7 = vcombine.low %v1591_v33, %v1607_v41  ;;  %v1648_v54 = vcombine.high %v1591_v33, %v1607_v41 }
 0x379   : > { %v2616_v56 = vsel %vm2611_vm1, %v2595_v20, 0  ;;  %v2597_v36 = vpack.c.bf16 %v2025_v21, %v1889_v16  ;;  %v1419_v50 = vrot.slane %v1411_v22, %v6912_v53  ;;  %v1426_v14 = vrot.slane %v1412_v42, %v6912_v53 }
 0x37a   : > { %5704 = vmatpush3.bf16.xpose.msra.mxu0 %v2616_v56  ;;  %v1435_v30 = vrot.slane %v1427_v5, %v6912_v53  ;;  %v1442_v38 = vrot.slane %v1428_v44, %v6912_v53  ;;  %v1655_v24 = vrot.slane %v1647_v7, %v6912_v53  ;;  %v1662_v47 = vrot.slane %v1648_v54, %v6912_v53 }
 0x37b   : > { %v2710_v33 = vsel %vm2611_vm1, %v2597_v36, 0  ;;  %v5450_v39 = vcombine.low %v1419_v50, %v1426_v14  ;;  %v5452_v51 = vcombine.high %v1419_v50, %v1426_v14  ;;  %v1663_v18 = vcombine.low %v1598_v49, %v1614_v45  ;;  %5709 = vmatprep.subr.bf16.mxu0 %v6426_v34 }
 0x37c   : > { %5716 = vmatpush3.bf16.xpose.msra.mxu1 %v2710_v33  ;;  %v5454_v16 = vcombine.low %v1435_v30, %v1442_v38  ;;  %v5456_v40 = vcombine.high %v1435_v30, %v1442_v38  ;;  %v1664_v41 = vcombine.high %v1598_v49, %v1614_v45  ;;  %v5459_v20 = vcombine.low %v1655_v24, %v1662_v47  ;;  %v7147_v49 = vpop.permute.xlu1 %905 }
 0x37d   : > { %v2171_v21 = vrot.slane %v5450_v39, %v6907_v46  ;;  %v2187_v22 = vrot.slane %v5452_v51, %v6907_v46  ;;  %v1671_v42 = vrot.slane %v1663_v18, %v6912_v53  ;;  %v5461_v5 = vcombine.high %v1655_v24, %v1662_v47  ;;  %5727 = vmatprep.subr.bf16.mxu1 %v6426_v34 }
 0x37e   : > { %v2203_v44 = vrot.slane %v5454_v16, %v6907_v46  ;;  %v2219_v7 = vrot.slane %v5456_v40, %v6907_v46  ;;  %v1678_v54 = vrot.slane %v1664_v41, %v6912_v53  ;;  %v7145_v56 = vrot.slane %v5459_v20, %v6907_v46  ;;  %v928_v16 = vpop.permute.xlu0 %927 }
 0x37f   : > { %v2227_v45 = vcombine.low %v2171_v21, %v2187_v22  ;;  %v2228_v36 = vcombine.high %v2171_v21, %v2187_v22  ;;  %v7150_v50 = vrot.slane %v5461_v5, %v6907_v46  ;;  %v1552_v14 = vcombine.high %v6846_v32, %v7095_v13 }
 0x380   : > { %v2259_v30 = vcombine.low %v2203_v44, %v2219_v7  ;;  %v2260_v38 = vcombine.high %v2203_v44, %v2219_v7  ;;  %v5463_v24 = vcombine.low %v1671_v42, %v1678_v54  ;;  %v5465_v47 = vcombine.high %v1671_v42, %v1678_v54  ;;  %v916_v54 = vpop.permute.xlu1 %915 }
 0x381   : > { %v7155_v33 = vrot.slane %v2227_v45, %v6912_v53  ;;  %v7158_v39 = vrot.slane %v2228_v36, %v6912_v53  ;;  %v1559_v51 = vrot.slane %v1551_v6, %v6907_v46  ;;  %v1566_v18 = vrot.slane %v1552_v14, %v6907_v46 }
 0x382   : > { %v7163_v40 = vrot.slane %v2259_v30, %v6912_v53  ;;  %v7166_v32 = vrot.slane %v2260_v38, %v6912_v53  ;;  %v7169_v13 = vrot.slane %v5463_v24, %v6907_v46  ;;  %v7172_v41 = vrot.slane %v5465_v47, %v6907_v46 }
 0x383   : > { %v2587_v20 = vpack.c.bf16 %v7072_v10, %v7008_v15  ;;  %v1888_v6 = vcombine.high %v7062_v8, %v7068_v9  ;;  %v2024_v21 = vcombine.high %v7087_v11, %v7098_v35  ;;  %v1885_v22 = vcombine.low %v6990_v62, %v6996_v1 }
 0x384   : > { %v2021_v42 = vcombine.low %v7032_v23, %v7038_v57  ;;  %v1091_v5 = vcombine.low %v904_v25, %v928_v16  ;;  %v1092_v44 = vcombine.high %v904_v25, %v928_v16  ;;  %v1567_v7 = vcombine.low %v6980_v37, %v7126_v55 }
 0x385   : > { %5706 = vmatmul.mubr.msk.bf16.vlgmr.msra.gmra.mrb[8].mxu0 %vm2611_vm1, %v2587_v20  ;;  %v2596_v15 = vpack.c.bf16 %v2024_v21, %v1888_v6  ;;  %v2575_v10 = vmul.f32 0.17677669, %v1885_v22  ;;  %v1568_v8 = vcombine.high %v6980_v37, %v7126_v55  ;;  %v1884_v9 = vcombine.high %v6987_v61, %v6993_v0  ;;  %v918_v21 = vpop.permute.xlu1 %917 }
 0x386   : > { %v2576_v11 = vmul.f32 0.17677669, %v2021_v42  ;;  %v1099_v35 = vrot.slane %v1091_v5, %v6907_v46  ;;  %v1106_v45 = vrot.slane %v1092_v44, %v6907_v46  ;;  %v1575_v25 = vrot.slane %v1567_v7, %v6907_v46  ;;  %5711 = vmatprep.mubr.msk.bf16.mxu0 %vm6427_vm0, %v6426_v34 }
 0x387   : > { %v2663_v36 = vsel %vm2611_vm1, %v2596_v15, 0  ;;  %v1582_v14 = vrot.slane %v1568_v8, %v6907_v46  ;;  %v2020_v37 = vcombine.high %v7029_v31, %v7035_v52  ;;  %v2573_v55 = vmul.f32 0.17677669, %v1884_v9 }
 0x388   : > { %5710 = vmatpush3.bf16.xpose.msra.mxu0 %v2663_v36  ;;  %v2589_v61 = vpack.c.bf16 %v2576_v11, %v2575_v10  ;;  %v1615_v0 = vcombine.low %v1559_v51, %v1575_v25  ;;  %v1616_v30 = vcombine.high %v1559_v51, %v1575_v25  ;;  %v1890_v38 = vcombine.high %v7081_v48, %v7093_v12 }
 0x389   : > { %v1631_v24 = vcombine.low %v1566_v18, %v1582_v14  ;;  %v1632_v47 = vcombine.high %v1566_v18, %v1582_v14  ;;  %5721 = vmatprep.subr.bf16.mxu0 %v6426_v34  ;;  %v2574_v16 = vmul.f32 0.17677669, %v2020_v37  ;;  %v2026_v20 = vcombine.high %v7113_v19, %v7116_v17 }
 0x38a   : > { %5718 = vmatmul.mubr.msk.bf16.vlgmr.msra.gmra.mrb[4].mxu1 %vm2611_vm1, %v2589_v61  ;;  %v1623_v31 = vrot.slane %v1615_v0, %v6912_v53  ;;  %v1630_v52 = vrot.slane %v1616_v30, %v6912_v53  ;;  %v1075_v6 = vcombine.low %v6830_v27, %v916_v54  ;;  %v1076_v51 = vcombine.high %v6830_v27, %v916_v54 }
 0x38b   : > { %v1639_v48 = vrot.slane %v1631_v24, %v6912_v53  ;;  %v1646_v12 = vrot.slane %v1632_v47, %v6912_v53  ;;  %v2588_v18 = vpack.c.bf16 %v2574_v16, %v2573_v55  ;;  %v2598_v22 = vpack.c.bf16 %v2026_v20, %v1890_v38  ;;  %5729 = vmatprep.mubr.msk.bf16.mxu1 %vm6427_vm0, %v6426_v34 }
 0x38c   : > { %v5458_v19 = vcombine.low %v1623_v31, %v1630_v52  ;;  %v5460_v17 = vcombine.high %v1623_v31, %v1630_v52  ;;  %v1083_v42 = vrot.slane %v1075_v6, %v6907_v46  ;;  %v1090_v5 = vrot.slane %v1076_v51, %v6907_v46 }
 0x38d   : > { %v5462_v44 = vcombine.low %v1639_v48, %v1646_v12  ;;  %v5464_v7 = vcombine.high %v1639_v48, %v1646_v12  ;;  %v2757_v27 = vsel %vm2611_vm1, %v2598_v22, 0  ;;  %v1279_v54 = vcombine.low %v6836_v29, %v918_v21 }
 0x38e   : > { %v2307_v15 = vrot.slane %v5458_v19, %v6907_v46  ;;  %v2323_v10 = vrot.slane %v5460_v17, %v6907_v46  ;;  %v1107_v8 = vcombine.low %v1083_v42, %v1099_v35  ;;  %v1108_v9 = vcombine.high %v1083_v42, %v1099_v35  ;;  %v930_v19 = vpop.permute.xlu1 %929 }
 0x38f   : > { %v2339_v11 = vrot.slane %v5462_v44, %v6907_v46  ;;  %v2355_v25 = vrot.slane %v5464_v7, %v6907_v46  ;;  %5712 = vmatmul.mubr.msk.bf16.vlgmr.msra.gmra.mrb[12].mxu0 %vm2611_vm1, %v2588_v18  ;;  %v1123_v36 = vcombine.low %v1090_v5, %v1106_v45  ;;  %v1124_v14 = vcombine.high %v1090_v5, %v1106_v45 }
 0x390   : > { %v2363_v37 = vcombine.low %v2307_v15, %v2323_v10  ;;  %v2364_v55 = vcombine.high %v2307_v15, %v2323_v10  ;;  %5722 = vmatpush3.bf16.xpose.msra.mxu0 %v2757_v27  ;;  %v1115_v61 = vrot.slane %v1107_v8, %v6912_v53  ;;  %v1122_v0 = vrot.slane %v1108_v9, %v6912_v53 }
 0x391   : > { %v2395_v30 = vcombine.low %v2339_v11, %v2355_v25  ;;  %v2396_v38 = vcombine.high %v2339_v11, %v2355_v25  ;;  %v1131_v24 = vrot.slane %v1123_v36, %v6912_v53  ;;  %v1138_v35 = vrot.slane %v1124_v14, %v6912_v53  ;;  %5723 = vmatprep.mubr.msk.bf16.mxu0 %vm6427_vm0, %v6426_v34 }
 0x392   : > { %v7230_v47 = vrot.slane %v2363_v37, %v6912_v53  ;;  %v7233_v45 = vrot.slane %v2364_v55, %v6912_v53  ;;  %v2027_v16 = vcombine.low %v1115_v61, %v1122_v0  ;;  %v5446_v20 = vcombine.high %v1115_v61, %v1122_v0  ;;  %5733 = vmatprep.subr.bf16.mxu0 %v6426_v34 }
 0x393   : > { %v7237_v31 = vrot.slane %v2395_v30, %v6912_v53  ;;  %v7240_v52 = vrot.slane %v2396_v38, %v6912_v53  ;;  %v2043_v6 = vcombine.low %v1131_v24, %v1138_v35  ;;  %v5447_v51 = vcombine.high %v1131_v24, %v1138_v35 }
 0x394   : > { %v7243_v48 = vrot.slane %v2027_v16, %v6907_v46  ;;  %v7246_v12 = vrot.slane %v5446_v20, %v6907_v46  ;;  %v1280_v18 = vcombine.high %v6836_v29, %v918_v21  ;;  %v1287_v22 = vrot.slane %v1279_v54, %v6907_v46 }
 0x395   : > { %v7251_v17 = vrot.slane %v2043_v6, %v6907_v46  ;;  %v7254_v42 = vrot.slane %v5447_v51, %v6907_v46  ;;  %v2243_v5 = vcombine.low %v7041_v3, %v7044_v58  ;;  %v2275_v44 = vcombine.low %v7047_v59, %v7050_v2 }
 0x396   : > { %v1294_v7 = vrot.slane %v1280_v18, %v6907_v46  ;;  %v2379_v29 = vcombine.low %v7145_v56, %v7150_v50  ;;  %v2411_v21 = vcombine.low %v7169_v13, %v7172_v41  ;;  %v1886_v27 = vcombine.high %v6990_v62, %v6996_v1 }
 0x397   : > { %v2251_v54 = vrot.slane %v2243_v5, %v6912_v53  ;;  %v2283_v15 = vrot.slane %v2275_v44, %v6912_v53  ;;  %v2022_v10 = vcombine.high %v7032_v23, %v7038_v57  ;;  %v1295_v8 = vcombine.low %v7147_v49, %v930_v19 }
 0x398   : > { %v2387_v9 = vrot.slane %v2379_v29, %v6912_v53  ;;  %v2419_v11 = vrot.slane %v2411_v21, %v6912_v53  ;;  %v2577_v25 = vmul.f32 0.17677669, %v1886_v27  ;;  %v1296_v36 = vcombine.high %v7147_v49, %v930_v19 }
 0x399   : > { %v2295_v14 = vcombine.low %v2251_v54, %v2283_v15  ;;  %v2578_v37 = vmul.f32 0.17677669, %v2022_v10  ;;  %v2296_v55 = vcombine.high %v2251_v54, %v2283_v15  ;;  %v1303_v62 = vrot.slane %v1295_v8, %v6907_v46 }
 0x39a   : > { %v2431_v1 = vcombine.low %v2387_v9, %v2419_v11  ;;  %v2432_v61 = vcombine.high %v2387_v9, %v2419_v11  ;;  %v1310_v0 = vrot.slane %v1296_v36, %v6907_v46  ;;  %v2291_v23 = vcombine.low %v7155_v33, %v7163_v40 }
 0x39b   : > { %v2590_v57 = vpack.c.bf16 %v2578_v37, %v2577_v25  ;;  %v1311_v30 = vcombine.low %v1287_v22, %v1303_v62  ;;  %v1312_v38 = vcombine.high %v1287_v22, %v1303_v62  ;;  %v2427_v24 = vcombine.low %v7230_v47, %v7237_v31 }
 0x39c   : > { %v2599_v35 = vpack.c.bf16 %v2431_v1, %v2295_v14  ;;  %v2600_v49 = vpack.c.bf16 %v2432_v61, %v2296_v55  ;;  %v1327_v16 = vcombine.low %v1294_v7, %v1310_v0  ;;  %v1328_v20 = vcombine.high %v1294_v7, %v1310_v0 }
 0x39d   : > { %5724 = vmatmul.mubr.msk.bf16.vlgmr.msra.gmra.mrb[16].mxu0 %vm2611_vm1, %v2590_v57  ;;  %v1319_v6 = vrot.slane %v1311_v30, %v6912_v53  ;;  %v1326_v51 = vrot.slane %v1312_v38, %v6912_v53  ;;  %v2579_v18 = vmul.f32 0.17677669, %v2291_v23  ;;  %v2580_v19 = vmul.f32 0.17677669, %v2427_v24 }
 0x39e   : > { %v2804_v5 = vsel %vm2611_vm1, %v2599_v35, 0  ;;  %v2851_v44 = vsel %vm2611_vm1, %v2600_v49, 0  ;;  %v1335_v22 = vrot.slane %v1327_v16, %v6912_v53  ;;  %v1342_v29 = vrot.slane %v1328_v20, %v6912_v53  ;;  %5735 = vmatprep.mubr.msk.bf16.mxu0 %vm6427_vm0, %v6426_v34 }
 0x39f   : > { %5728 = vmatpush3.bf16.xpose.msra.mxu1 %v2804_v5  ;;  %5734 = vmatpush3.bf16.xpose.msra.mxu0 %v2851_v44  ;;  %v2095_v7 = vcombine.low %v1319_v6, %v1326_v51  ;;  %v5448_v21 = vcombine.high %v1319_v6, %v1326_v51  ;;  %v2591_v27 = vpack.c.bf16 %v2580_v19, %v2579_v18 }
 0x3a0   : > { %v2111_v54 = vcombine.low %v1335_v22, %v1342_v29  ;;  %v5449_v15 = vcombine.high %v1335_v22, %v1342_v29  ;;  %5739 = vmatprep.subr.bf16.mxu1 %v6426_v34  ;;  %5745 = vmatprep.subr.bf16.mxu0 %v6426_v34  ;;  %v2292_v10 = vcombine.high %v7155_v33, %v7163_v40 }
 0x3a1   : > { %v7295_v8 = vrot.slane %v2095_v7, %v6907_v46  ;;  %v7298_v9 = vrot.slane %v5448_v21, %v6907_v46  ;;  %v2428_v11 = vcombine.high %v7230_v47, %v7237_v31  ;;  %v2244_v25 = vcombine.high %v7041_v3, %v7044_v58 }
 0x3a2   : > { %v2118_v36 = vrot.slane %v2111_v54, %v6907_v46  ;;  %v2126_v14 = vrot.slane %v5449_v15, %v6907_v46  ;;  %v2581_v37 = vmul.f32 0.17677669, %v2292_v10  ;;  %v2276_v33 = vcombine.high %v7047_v59, %v7050_v2 }
 0x3a3   : > { %v2582_v40 = vmul.f32 0.17677669, %v2428_v11  ;;  %v2258_v55 = vrot.slane %v2244_v25, %v6912_v53  ;;  %v2380_v62 = vcombine.high %v7145_v56, %v7150_v50  ;;  %v2412_v47 = vcombine.high %v7169_v13, %v7172_v41 }
 0x3a4   : > { %v2290_v31 = vrot.slane %v2276_v33, %v6912_v53  ;;  %v2293_v3 = vcombine.low %v7158_v39, %v7166_v32  ;;  %v2429_v58 = vcombine.low %v7233_v45, %v7240_v52  ;;  %v2294_v59 = vcombine.high %v7158_v39, %v7166_v32 }
 0x3a5   : > { %v2592_v2 = vpack.c.bf16 %v2582_v40, %v2581_v37  ;;  %v2394_v1 = vrot.slane %v2380_v62, %v6912_v53  ;;  %v2426_v61 = vrot.slane %v2412_v47, %v6912_v53  ;;  %v2430_v56 = vcombine.high %v7233_v45, %v7240_v52 }
 0x3a6   : > { %5730 = vmatmul.mubr.msk.bf16.vlgmr.msra.gmra.mrb[8].mxu1 %vm2611_vm1, %v2591_v27  ;;  %v2297_v50 = vcombine.low %v2258_v55, %v2290_v31  ;;  %v2298_v13 = vcombine.high %v2258_v55, %v2290_v31  ;;  %v2583_v41 = vmul.f32 0.17677669, %v2293_v3  ;;  %v2584_v0 = vmul.f32 0.17677669, %v2429_v58 }
 0x3a7   : > { %5736 = vmatmul.mubr.msk.bf16.vlgmr.msra.gmra.mrb[20].mxu0 %vm2611_vm1, %v2592_v2  ;;  %v2433_v23 = vcombine.low %v2394_v1, %v2426_v61  ;;  %v2434_v57 = vcombine.high %v2394_v1, %v2426_v61  ;;  %5741 = vmatprep.mubr.msk.bf16.mxu1 %vm6427_vm0, %v6426_v34  ;;  %v2585_v39 = vmul.f32 0.17677669, %v2294_v59  ;;  %v2586_v32 = vmul.f32 0.17677669, %v2430_v56 }
 0x3a8   : > { %5747 = vmatprep.mubr.msk.bf16.mxu0 %vm6427_vm0, %v6426_v34  ;;  %v2593_v30 = vpack.c.bf16 %v2584_v0, %v2583_v41  ;;  %v2059_v45 = vcombine.low %v7243_v48, %v7246_v12  ;;  %v2075_v52 = vcombine.low %v7251_v17, %v7254_v42  ;;  %v2127_v38 = vcombine.low %v7295_v8, %v7298_v9 }
 0x3a9   : > { %v2601_v24 = vpack.c.bf16 %v2433_v23, %v2297_v50  ;;  %v2602_v35 = vpack.c.bf16 %v2434_v57, %v2298_v13  ;;  %v2594_v49 = vpack.c.bf16 %v2586_v32, %v2585_v39  ;;  %v2143_v16 = vcombine.low %v2118_v36, %v2126_v14 }
 0x3aa   : > { %v2067_v20 = vrot.slane %v2059_v45, %v6912_v53  ;;  %v2083_v6 = vrot.slane %v2075_v52, %v6912_v53  ;;  %v2135_v51 = vrot.slane %v2127_v38, %v6912_v53  ;;  %v2060_v18 = vcombine.high %v7243_v48, %v7246_v12 }
 0x3ab   : > { %v2898_v19 = vsel %vm2611_vm1, %v2601_v24, 0  ;;  %v2945_v5 = vsel %vm2611_vm1, %v2602_v35, 0  ;;  %v2151_v44 = vrot.slane %v2143_v16, %v6912_v53  ;;  %v2076_v22 = vcombine.high %v7251_v17, %v7254_v42 }
 0x3ac   : > { %5740 = vmatpush3.bf16.xpose.msra.mxu1 %v2898_v19  ;;  %5746 = vmatpush3.bf16.xpose.msra.mxu0 %v2945_v5  ;;  %v2091_v29 = vcombine.low %v2067_v20, %v2083_v6  ;;  %v2092_v7 = vcombine.high %v2067_v20, %v2083_v6  ;;  %v2074_v21 = vrot.slane %v2060_v18, %v6912_v53 }
 0x3ad   : > { %5751 = vmatprep.subr.bf16.mxu1 %v6426_v34  ;;  %5757 = vmatprep.subr.bf16.mxu0 %v6426_v34  ;;  %v2159_v48 = vcombine.low %v2135_v51, %v2151_v44  ;;  %v2160_v12 = vcombine.high %v2135_v51, %v2151_v44  ;;  %v2090_v27 = vrot.slane %v2076_v22, %v6912_v53 }
 0x3ae   : > { %v2128_v54 = vcombine.high %v7295_v8, %v7298_v9  ;;  %v2144_v15 = vcombine.high %v2118_v36, %v2126_v14 }
 0x3af   : > { %v2603_v10 = vpack.c.bf16 %v2159_v48, %v2091_v29  ;;  %v2604_v17 = vpack.c.bf16 %v2160_v12, %v2092_v7  ;;  %v2093_v42 = vcombine.low %v2074_v21, %v2090_v27  ;;  %v2094_v11 = vcombine.high %v2074_v21, %v2090_v27 }
 0x3b0   : > { %v2142_v25 = vrot.slane %v2128_v54, %v6912_v53  ;;  %v2158_v37 = vrot.slane %v2144_v15, %v6912_v53 }
 0x3b2   : > { %v2161_v33 = vcombine.low %v2142_v25, %v2158_v37  ;;  %v2162_v40 = vcombine.high %v2142_v25, %v2158_v37 }
 0x3b3   : > { %5742 = vmatmul.mubr.msk.bf16.vlgmr.msra.gmra.mrb[12].mxu1 %vm2611_vm1, %v2593_v30  ;;  %5748 = vmatmul.mubr.msk.bf16.vlgmr.msra.gmra.mrb[24].mxu0 %vm2611_vm1, %v2594_v49 }
 0x3b4   : > { %5752 = vmatpush3.bf16.msra.mxu1 %v2603_v10  ;;  %5758 = vmatpush3.bf16.msra.mxu0 %v2604_v17  ;;  %v7356_v55 = vpack.c.bf16 %v2161_v33, %v2093_v42  ;;  %v7358_v8 = vpack.c.bf16 %v2162_v40, %v2094_v11 }
 0x3b5   : > { %5753 = vmatprep.mubr.msk.bf16.mxu1 %vm6427_vm0, %v6426_v34  ;;  %5763 = vmatprep.subr.bf16.mxu1 %v6426_v34 }
 0x3b6   : > { %5759 = vmatprep.mubr.msk.bf16.mxu0 %vm6427_vm0, %v6426_v34  ;;  %5769 = vmatprep.subr.bf16.mxu0 %v6426_v34 }
 0x458   : > { %v7366_v9 = vpop.f32.mrb[8].mxu0 }
 0x459   : > { %v5707_v36 = vpop.f32.mrb[9].mxu0  ;;  %v2989_v14 = vsel %vm2988_vm2, %v7366_v9, -inf }
 0x45a   : > { %2990 = vmax.xlane.f32.xlu0 %v2989_v14  ;;  %v7370_v62 = vpop.f32.mrb[10].mxu0 }
 0x45b   : > { %v5708_v47 = vpop.f32.mrb[11].mxu0  ;;  %v2992_v31 = vsel %vm2988_vm2, %v7370_v62, -inf }
 0x45c   : > { %2993 = vmax.xlane.f32.xlu1 %v2992_v31 }
 0x45d   : > { %v7374_v3 = vpop.f32.mrb[4].mxu1 }
 0x45e   : > { %v5719_v58 = vpop.f32.mrb[5].mxu1  ;;  %v3001_v59 = vsel %vm2988_vm2, %v7374_v3, -inf }
 0x45f   : > { %v7378_v2 = vpop.f32.mrb[6].mxu1  ;;  %3002 = vmax.xlane.f32.xlu0 %v3001_v59 }
 0x460   : > { %v5720_v1 = vpop.f32.mrb[7].mxu1  ;;  %v3004_v61 = vsel %vm2988_vm2, %v7378_v2, -inf }
 0x461   : > { %3005 = vmax.xlane.f32.xlu1 %v3004_v61 }
 0x462   : > { %v7382_v56 = vpop.f32.mrb[12].mxu0 }
 0x463   : > { %v5713_v50 = vpop.f32.mrb[13].mxu0  ;;  %v2995_v13 = vsel %vm2988_vm2, %v7382_v56, -inf }
 0x464   : > { %2996 = vmax.xlane.f32.xlu0 %v2995_v13  ;;  %v7386_v41 = vpop.f32.mrb[14].mxu0 }
 0x465   : > { %v5714_v0 = vpop.f32.mrb[15].mxu0  ;;  %v2998_v51 = vsel %vm2988_vm2, %v7386_v41, -inf }
 0x470   : > { %v7388_v23 = vpop.f32.mrb[16].mxu0 }
 0x471   : > { %v5725_v57 = vpop.f32.mrb[17].mxu0  ;;  %v3007_v19 = vsel %vm2988_vm2, %v7388_v23, -inf }
 0x472   : > { %v7390_v39 = vpop.f32.mrb[18].mxu0 }
 0x473   : > { %v5726_v32 = vpop.f32.mrb[19].mxu0  ;;  %v3010_v18 = vsel %vm2988_vm2, %v7390_v39, -inf }
 0x479   : > { %v7392_v30 = vpop.f32.mrb[8].mxu1 }
 0x47a   : > { %v7394_v45 = vpop.f32.mrb[20].mxu0  ;;  %v5731_v52 = vpop.f32.mrb[9].mxu1  ;;  %v3013_v38 = vsel %vm2988_vm2, %v7392_v30, -inf }
 0x47b   : > { %v5737_v24 = vpop.f32.mrb[21].mxu0  ;;  %3014 = vmax.xlane.f32.xlu0 %v3013_v38  ;;  %v7398_v35 = vpop.f32.mrb[10].mxu1  ;;  %v3019_v15 = vsel %vm2988_vm2, %v7394_v45, -inf }
 0x47c   : > { %v7400_v49 = vpop.f32.mrb[22].mxu0  ;;  %v5732_v16 = vpop.f32.mrb[11].mxu1  ;;  %v3016_v20 = vsel %vm2988_vm2, %v7398_v35, -inf }
 0x47d   : > { %v5738_v6 = vpop.f32.mrb[23].mxu0  ;;  %3017 = vmax.xlane.f32.xlu1 %v3016_v20  ;;  %v3022_v17 = vsel %vm2988_vm2, %v7400_v49, -inf }
 0x47f   : > { %2999 = vmax.xlane.f32.xlu0 %v2998_v51 }
 0x481   : > { %3011 = vmax.xlane.f32.xlu1 %v3010_v18 }
 0x483   : > { %3008 = vmax.xlane.f32.xlu0 %v3007_v19 }
 0x486   : > { %v7410_v5 = vpop.f32.mrb[24].mxu0  ;;  %v7412_v44 = vpop.f32.mrb[12].mxu1 }
 0x487   : > { %v5743_v22 = vpop.f32.mrb[13].mxu1  ;;  %v5749_v29 = vpop.f32.mrb[25].mxu0  ;;  %v3025_v7 = vsel %vm2988_vm2, %v7412_v44, -inf  ;;  %v3031_v10 = vsel %vm2988_vm2, %v7410_v5, -inf }
 0x488   : > { %v7416_v21 = vpop.f32.mrb[26].mxu0  ;;  %v7418_v48 = vpop.f32.mrb[14].mxu1  ;;  %3026 = vmax.xlane.f32.xlu0 %v3025_v7 }
 0x489   : > { %v5744_v12 = vpop.f32.mrb[15].mxu1  ;;  %v5750_v27 = vpop.f32.mrb[27].mxu0  ;;  %v3028_v54 = vsel %vm2988_vm2, %v7418_v48, -inf  ;;  %v3034_v42 = vsel %vm2988_vm2, %v7416_v21, -inf }
 0x48a   : > { %3029 = vmax.xlane.f32.xlu1 %v3028_v54 }
 0x48c   : > { %3020 = vmax.xlane.f32.xlu0 %v3019_v15 }
 0x49b   : > { %909 = vrot.lane.b32.xlu1 %v6834_v28, %s6423_s15 }
 0x49f   : > { %919 = vrot.lane.b32.xlu1 %v6826_v26, %s6424_s18 }
 0x4a2   : > { %907 = vrot.lane.b32.xlu0 %v6826_v26, %s6423_s15 }
 0x4c1   : > { %3032 = vmax.xlane.f32.xlu0 %v3031_v10 }
 0x4c3   : > { %3023 = vmax.xlane.f32.xlu1 %v3022_v17 }
 0x4c7   : > { %3035 = vmax.xlane.f32.xlu1 %v3034_v42 }
 0x4d7   : > { %931 = vrot.lane.b32.xlu0 %v6826_v26, %s6425_s27 }
 0x4d8   : > { %921 = vrot.lane.b32.xlu1 %v6834_v28, %s6424_s18 }
 0x4e7   : > { %v2991_v11 = vpop.xlane.xlu0 %2990 }
 0x4e8   : > { %v3037_v25 = vsub.f32 %v7366_v9, %v2991_v11 }
 0x4e9   : > { %v2994_v37 = vpop.xlane.xlu1 %2993 }
 0x4ea   : > { %v3053_v33 = vmul.f32 1.442695, %v3037_v25  ;;  %v3038_v40 = vsub.f32 %v7370_v62, %v2994_v37 }
 0x4ec   : > { %6070 = vpow2.f32 %v3053_v33  ;;  %v3055_v36 = vmul.f32 1.442695, %v3038_v40  ;;  %v3003_v14 = vpop.xlane.xlu0 %3002 }
 0x4ed   : > { %v3041_v47 = vsub.f32 %v7374_v3, %v3003_v14 }
 0x4ee   : > { %6072 = vpow2.f32 %v3055_v36  ;;  %v3006_v31 = vpop.xlane.xlu1 %3005 }
 0x4ef   : > { %v3061_v58 = vmul.f32 1.442695, %v3041_v47  ;;  %v3042_v59 = vsub.f32 %v7378_v2, %v3006_v31 }
 0x4f1   : > { %6074 = vpow2.f32 %v3061_v58  ;;  %v3063_v1 = vmul.f32 1.442695, %v3042_v59  ;;  %v2997_v61 = vpop.xlane.xlu0 %2996 }
 0x4f2   : > { %v3039_v50 = vsub.f32 %v7382_v56, %v2997_v61 }
 0x4f3   : > { %6076 = vpow2.f32 %v3063_v1 }
 0x4f4   : > { %v3057_v9 = vmul.f32 1.442695, %v3039_v50 }
 0x4f6   : > { %v7445_v13 = vpop.eup %6070  ;;  %6078 = vpow2.f32 %v3057_v9 }
 0x4f7   : > { %v3085_v62 = vsel %vm2988_vm2, %v7445_v13, 0.0 }
 0x4f8   : > { %v7449_v0 = vpop.eup %6072  ;;  %3086 = vadd.xlane.f32.xlu0 %v3085_v62 }
 0x4f9   : > { %v3088_v3 = vsel %vm2988_vm2, %v7449_v0, 0.0 }
 0x4fb   : > { %v7453_v2 = vpop.eup %6074 }
 0x4fc   : > { %3089 = vadd.xlane.f32.xlu1 %v3088_v3  ;;  %v3097_v56 = vsel %vm2988_vm2, %v7453_v2, 0.0 }
 0x4fd   : > { %v7457_v57 = vpop.eup %6076  ;;  %3098 = vadd.xlane.f32.xlu0 %v3097_v56 }
 0x4fe   : > { %v3100_v32 = vsel %vm2988_vm2, %v7457_v57, 0.0 }
 0x500   : > { %v7461_v52 = vpop.eup %6078  ;;  %3101 = vadd.xlane.f32.xlu1 %v3100_v32 }
 0x501   : > { %v3091_v38 = vsel %vm2988_vm2, %v7461_v52, 0.0 }
 0x502   : > { %3092 = vadd.xlane.f32.xlu0 %v3091_v38 }
 0x508   : > { %v3015_v24 = vpop.xlane.xlu0 %3014 }
 0x509   : > { %v3045_v16 = vsub.f32 %v7392_v30, %v3015_v24 }
 0x50a   : > { %v3018_v20 = vpop.xlane.xlu1 %3017 }
 0x50b   : > { %v3069_v6 = vmul.f32 1.442695, %v3045_v16  ;;  %v3046_v51 = vsub.f32 %v7398_v35, %v3018_v20 }
 0x50c   : > { %v3000_v18 = vpop.xlane.xlu0 %2999 }
 0x50d   : > { %6080 = vpow2.f32 %v3069_v6  ;;  %v3040_v19 = vsub.f32 %v7386_v41, %v3000_v18  ;;  %v3071_v29 = vmul.f32 1.442695, %v3046_v51 }
 0x50e   : > { %v3012_v22 = vpop.xlane.xlu1 %3011 }
 0x50f   : > { %v3059_v7 = vmul.f32 1.442695, %v3040_v19  ;;  %v3044_v12 = vsub.f32 %v7390_v39, %v3012_v22 }
 0x510   : > { %v3009_v27 = vpop.xlane.xlu0 %3008 }
 0x511   : > { %6082 = vpow2.f32 %v3059_v7  ;;  %v3043_v54 = vsub.f32 %v7388_v23, %v3009_v27  ;;  %v3067_v15 = vmul.f32 1.442695, %v3044_v12 }
 0x512   : > { %6084 = vpow2.f32 %v3071_v29 }
 0x513   : > { %v3065_v30 = vmul.f32 1.442695, %v3043_v54 }
 0x515   : > { %6086 = vpow2.f32 %v3065_v30  ;;  %v3027_v10 = vpop.xlane.xlu0 %3026 }
 0x516   : > { %6088 = vpow2.f32 %v3067_v15  ;;  %v3049_v41 = vsub.f32 %v7412_v44, %v3027_v10 }
 0x517   : > { %v7470_v17 = vpop.eup %6080  ;;  %v7472_v35 = vpop.xlane.xlu1 %3029 }
 0x518   : > { %v3050_v42 = vsub.f32 %v7418_v48, %v7472_v35  ;;  %v3109_v39 = vsel %vm2988_vm2, %v7470_v17, 0.0  ;;  %v3077_v37 = vmul.f32 1.442695, %v3049_v41 }
 0x519   : > { %v3021_v11 = vpop.xlane.xlu0 %3020  ;;  %3110 = vadd.xlane.f32.xlu0 %v3109_v39 }
 0x51a   : > { %v3047_v23 = vsub.f32 %v7394_v45, %v3021_v11 }
 0x51b   : > { %v7480_v25 = vpop.eup %6082  ;;  %v7482_v33 = vpop.permute.xlu1 %909 }
 0x51c   : > { %v3073_v40 = vmul.f32 1.442695, %v3047_v23  ;;  %v3094_v36 = vsel %vm2988_vm2, %v7480_v25, 0.0  ;;  %v7486_v44 = vpop.eup %6084 }
 0x51d   : > { %3095 = vadd.xlane.f32.xlu1 %v3094_v36  ;;  %v3112_v58 = vsel %vm2988_vm2, %v7486_v44, 0.0  ;;  %v908_v3 = vpop.permute.xlu0 %907 }
 0x51e   : > { %6090 = vpow2.f32 %v3073_v40 }
 0x51f   : > { %v7488_v14 = vpop.eup %6086  ;;  %6092 = vpow2.f32 %v3077_v37  ;;  %v920_v47 = vpop.permute.xlu1 %919 }
 0x520   : > { %v1483_v31 = vcombine.low %v6826_v26, %v920_v47  ;;  %v1484_v45 = vcombine.high %v6826_v26, %v920_v47  ;;  %v3103_v59 = vsel %vm2988_vm2, %v7488_v14, 0.0  ;;  %v7496_v1 = vpop.eup %6088 }
 0x521   : > { %3113 = vadd.xlane.f32.xlu1 %v3112_v58  ;;  %3104 = vadd.xlane.f32.xlu0 %v3103_v59  ;;  %v3106_v61 = vsel %vm2988_vm2, %v7496_v1, 0.0 }
 0x522   : > { %v1491_v19 = vrot.slane %v1483_v31, %v6907_v46  ;;  %v1498_v22 = vrot.slane %v1484_v45, %v6907_v46 }
 0x525   : > { %3107 = vadd.xlane.f32.xlu0 %v3106_v61 }
 0x528   : > { %v7500_v50 = vpop.eup %6090 }
 0x529   : > { %v7502_v9 = vpop.eup %6092  ;;  %v3115_v26 = vsel %vm2988_vm2, %v7500_v50, 0.0 }
 0x52a   : > { %3116 = vadd.xlane.f32.xlu0 %v3115_v26  ;;  %v3121_v62 = vsel %vm2988_vm2, %v7502_v9, 0.0 }
 0x52e   : > { %3122 = vadd.xlane.f32.xlu0 %v3121_v62 }
 0x54e   : > { %v3033_v56 = vpop.xlane.xlu0 %3032 }
 0x54f   : > { %v3051_v32 = vsub.f32 %v7410_v5, %v3033_v56 }
 0x550   : > { %v3024_v38 = vpop.xlane.xlu1 %3023 }
 0x551   : > { %v3048_v24 = vsub.f32 %v7400_v49, %v3024_v38  ;;  %v3081_v16 = vmul.f32 1.442695, %v3051_v32 }
 0x552   : > { %v932_v20 = vpop.permute.xlu0 %931 }
 0x553   : > { %v3075_v6 = vmul.f32 1.442695, %v3048_v24  ;;  %6094 = vpow2.f32 %v3081_v16  ;;  %v1499_v51 = vcombine.low %v908_v3, %v932_v20  ;;  %v1500_v18 = vcombine.high %v908_v3, %v932_v20 }
 0x554   : > { %v3036_v29 = vpop.xlane.xlu1 %3035 }
 0x555   : > { %6096 = vpow2.f32 %v3075_v6  ;;  %v3052_v7 = vsub.f32 %v7416_v21, %v3036_v29  ;;  %v1507_v12 = vrot.slane %v1499_v51, %v6907_v46  ;;  %v1514_v5 = vrot.slane %v1500_v18, %v6907_v46 }
 0x557   : > { %v3083_v27 = vmul.f32 1.442695, %v3052_v7  ;;  %v1515_v49 = vcombine.low %v1491_v19, %v1507_v12  ;;  %v1516_v54 = vcombine.high %v1491_v19, %v1507_v12  ;;  %v1531_v15 = vcombine.low %v1498_v22, %v1514_v5 }
 0x558   : > { %v1532_v30 = vcombine.high %v1498_v22, %v1514_v5  ;;  %v7515_v10 = vpop.permute.xlu1 %921 }
 0x559   : > { %6098 = vpow2.f32 %v3083_v27  ;;  %v1523_v41 = vrot.slane %v1515_v49, %v6912_v53  ;;  %v1530_v39 = vrot.slane %v1516_v54, %v6912_v53  ;;  %v1539_v11 = vrot.slane %v1531_v15, %v6912_v53 }
 0x55a   : > { %v1546_v21 = vrot.slane %v1532_v30, %v6912_v53  ;;  %v1687_v23 = vcombine.low %v6834_v28, %v7515_v10  ;;  %v1688_v37 = vcombine.high %v6834_v28, %v7515_v10  ;;  %v3079_v27 = vmul.f32 1.442695, %v3050_v42 }
 0x55b   : > { %v2435_v40 = vcombine.low %v1523_v41, %v1530_v39  ;;  %v5466_v36 = vcombine.high %v1523_v41, %v1530_v39 }
 0x55c   : > { %v2451_v47 = vcombine.low %v1539_v11, %v1546_v21  ;;  %v5467_v31 = vcombine.high %v1539_v11, %v1546_v21  ;;  %6100 = vpow2.f32 %v3079_v27 }
 0x55d   : > { %v7525_v45 = vpop.eup %6094  ;;  %v2442_v58 = vrot.slane %v2435_v40, %v6907_v46  ;;  %v2450_v59 = vrot.slane %v5466_v36, %v6907_v46 }
 0x55e   : > { %v2458_v61 = vrot.slane %v2451_v47, %v6907_v46  ;;  %v2466_v26 = vrot.slane %v5467_v31, %v6907_v46  ;;  %v3127_v62 = vsel %vm2988_vm2, %v7525_v45, 0.0 }
 0x55f   : > { %v7533_v3 = vpop.eup %6096  ;;  %3128 = vadd.xlane.f32.xlu0 %v3127_v62  ;;  %v2467_v56 = vcombine.low %v2442_v58, %v2450_v59  ;;  %v2468_v32 = vcombine.high %v2442_v58, %v2450_v59 }
 0x560   : > { %v3118_v38 = vsel %vm2988_vm2, %v7533_v3, 0.0  ;;  %v2483_v24 = vcombine.low %v2458_v61, %v2466_v26  ;;  %v2484_v16 = vcombine.high %v2458_v61, %v2466_v26 }
 0x561   : > { %3119 = vadd.xlane.f32.xlu1 %v3118_v38  ;;  %v7538_v20 = vrot.slane %v2467_v56, %v6912_v53  ;;  %v7541_v6 = vrot.slane %v2468_v32, %v6912_v53 }
 0x562   : > { %v7544_v51 = vrot.slane %v2483_v24, %v6912_v53  ;;  %v7547_v18 = vrot.slane %v2484_v16, %v6912_v53 }
 0x563   : > { %v7549_v19 = vpop.eup %6098 }
 0x564   : > { %v3130_v22 = vsel %vm2988_vm2, %v7549_v19, 0.0  ;;  %v2499_v29 = vcombine.low %v7538_v20, %v7544_v51  ;;  %v2500_v7 = vcombine.high %v7538_v20, %v7544_v51  ;;  %v2501_v12 = vcombine.low %v7541_v6, %v7547_v18 }
 0x565   : > { %3131 = vadd.xlane.f32.xlu0 %v3130_v22  ;;  %v2502_v5 = vcombine.high %v7541_v6, %v7547_v18 }
 0x566   : > { %v7566_v41 = vpop.eup %6100 }
 0x567   : > { %v3124_v48 = vsel %vm2988_vm2, %v7566_v41, 0.0 }
 0x572   : > { %933 = vrot.lane.b32.xlu1 %v6834_v28, %s6425_s27 }
 0x585   : > { %v3087_v49 = vpop.xlane.xlu0 %3086 }
 0x586   : > { %6102 = vrcp.f32 %v3087_v49 }
 0x589   : > { %v3090_v54 = vpop.xlane.xlu1 %3089 }
 0x58a   : > { %6104 = vrcp.f32 %v3090_v54  ;;  %v3099_v15 = vpop.xlane.xlu0 %3098 }
 0x58d   : > { %v3102_v30 = vpop.xlane.xlu1 %3101 }
 0x58e   : > { %6106 = vrcp.f32 %v3102_v30 }
 0x58f   : > { %6108 = vrcp.f32 %v3099_v15  ;;  %v3093_v31 = vpop.xlane.xlu0 %3092 }
 0x590   : > { %v6103_v39 = vpop.eup %6102  ;;  %6110 = vrcp.f32 %v3093_v31 }
 0x591   : > { %v3149_v21 = vmul.f32 %v6103_v39, %v7445_v13 }
 0x594   : > { %v6105_v11 = vpop.eup %6104 }
 0x595   : > { %v3150_v40 = vmul.f32 %v6105_v11, %v7449_v0 }
 0x596   : > { %3125 = vadd.xlane.f32.xlu1 %v3124_v48 }
 0x597   : > { %v3165_v35 = vpack.c.bf16 %v3150_v40, %v3149_v21 }
 0x598   : > { %v6107_v42 = vpop.eup %6106 }
 0x599   : > { %5754 = vmatmul.mubr.msk.bf16.vlgmr.msra.gmra.mrb[16].mxu1 %vm2988_vm2, %v3165_v35  ;;  %v6109_v36 = vpop.eup %6108  ;;  %v3154_v47 = vmul.f32 %v6107_v42, %v7457_v57 }
 0x59a   : > { %5764 = vmatpush3.bf16.msra.mxu1 %v7356_v55  ;;  %5765 = vmatprep.mubr.msk.bf16.mxu1 %vm6427_vm0, %v6426_v34  ;;  %v3153_v13 = vmul.f32 %v6109_v36, %v7453_v2  ;;  %v6111_v26 = vpop.eup %6110 }
 0x59b   : > { %5775 = vmatprep.subr.bf16.mxu1 %v6426_v34  ;;  %v3151_v62 = vmul.f32 %v6111_v26, %v7461_v52 }
 0x59c   : > { %v3167_v0 = vpack.c.bf16 %v3154_v47, %v3153_v13 }
 0x5a1   : > { %5766 = vmatmul.mubr.msk.bf16.vlgmr.msra.gmra.mrb[20].mxu1 %vm2988_vm2, %v3167_v0 }
 0x5a2   : > { %5777 = vmatprep.mubr.msk.bf16.mxu1 %vm6427_vm0, %v6426_v34 }
 0x5a6   : > { %v3111_v58 = vpop.xlane.xlu0 %3110 }
 0x5aa   : > { %v3096_v59 = vpop.xlane.xlu1 %3095 }
 0x5ab   : > { %6112 = vrcp.f32 %v3096_v59 }
 0x5ae   : > { %v3105_v55 = vpop.xlane.xlu0 %3104  ;;  %v3114_v52 = vpop.xlane.xlu1 %3113 }
 0x5af   : > { %6114 = vrcp.f32 %v3105_v55 }
 0x5b2   : > { %v3108_v61 = vpop.xlane.xlu0 %3107 }
 0x5b3   : > { %6116 = vrcp.f32 %v3108_v61 }
 0x5b4   : > { %6118 = vrcp.f32 %v3111_v58 }
 0x5b5   : > { %v6113_v57 = vpop.eup %6112  ;;  %6120 = vrcp.f32 %v3114_v52 }
 0x5b6   : > { %v3152_v2 = vmul.f32 %v6113_v57, %v7480_v25 }
 0x5b7   : > { %v3117_v25 = vpop.xlane.xlu0 %3116 }
 0x5b8   : > { %v3166_v56 = vpack.c.bf16 %v3152_v2, %v3151_v62 }
 0x5b9   : > { %v6115_v32 = vpop.eup %6114 }
 0x5ba   : > { %5760 = vmatmul.mubr.msk.bf16.vlgmr.msra.gmra.mrb[28].mxu0 %vm2988_vm2, %v3166_v56  ;;  %v3155_v24 = vmul.f32 %v6115_v32, %v7488_v14  ;;  %v1695_v14 = vrot.slane %v1687_v23, %v6907_v46 }
 0x5bb   : > { %5770 = vmatpush3.bf16.msra.mxu0 %v7358_v8  ;;  %5771 = vmatprep.mubr.msk.bf16.mxu0 %vm6427_vm0, %v6426_v34  ;;  %v7594_v8 = vpop.xlane.xlu0 %3122 }
 0x5bc   : > { %5781 = vmatprep.subr.bf16.mxu0 %v6426_v34 }
 0x5bd   : > { %v6117_v38 = vpop.eup %6116 }
 0x5be   : > { %v3156_v16 = vmul.f32 %v6117_v38, %v7496_v1  ;;  %v1702_v1 = vrot.slane %v1688_v37, %v6907_v46  ;;  %v6119_v55 = vpop.eup %6118 }
 0x5bf   : > { %v6121_v61 = vpop.eup %6120 }
 0x5c0   : > { %v3168_v22 = vpack.c.bf16 %v3156_v16, %v3155_v24 }
 0x5c2   : > { %5772 = vmatmul.mubr.msk.bf16.vlgmr.msra.gmra.mrb[32].mxu0 %vm2988_vm2, %v3168_v22 }
 0x5c3   : > { %5783 = vmatprep.mubr.msk.bf16.mxu0 %vm6427_vm0, %v6426_v34 }
 0x5ec   : > { %v3129_v30 = vpop.xlane.xlu0 %3128 }
 0x5ee   : > { %v3120_v27 = vpop.xlane.xlu1 %3119 }
 0x5ef   : > { %6122 = vrcp.f32 %v3120_v27 }
 0x5f0   : > { %6124 = vrcp.f32 %v3117_v25 }
 0x5f2   : > { %v934_v49 = vpop.permute.xlu1 %933  ;;  %v3132_v13 = vpop.xlane.xlu0 %3131 }
 0x5f3   : > { %v1703_v54 = vcombine.low %v7482_v33, %v934_v49  ;;  %v1704_v15 = vcombine.high %v7482_v33, %v934_v49  ;;  %6126 = vrcp.f32 %v3132_v13 }
 0x5f4   : > { %6128 = vrcp.f32 %v3129_v30 }
 0x5f5   : > { %v1711_v39 = vrot.slane %v1703_v54, %v6907_v46  ;;  %v1718_v11 = vrot.slane %v1704_v15, %v6907_v46  ;;  %v3158_v54 = vmul.f32 %v6121_v61, %v7486_v44  ;;  %v3157_v44 = vmul.f32 %v6119_v55, %v7470_v17 }
 0x5f6   : > { %6130 = vrcp.f32 %v7594_v8 }
 0x5f7   : > { %v1719_v21 = vcombine.low %v1695_v14, %v1711_v39  ;;  %v1720_v33 = vcombine.high %v1695_v14, %v1711_v39  ;;  %v1735_v40 = vcombine.low %v1702_v1, %v1718_v11  ;;  %v1736_v48 = vcombine.high %v1702_v1, %v1718_v11 }
 0x5f9   : > { %v1727_v23 = vrot.slane %v1719_v21, %v6912_v53  ;;  %v1734_v35 = vrot.slane %v1720_v33, %v6912_v53  ;;  %v1743_v42 = vrot.slane %v1735_v40, %v6912_v53  ;;  %v1750_v28 = vrot.slane %v1736_v48, %v6912_v53  ;;  %v6123_v56 = vpop.eup %6122 }
 0x5fa   : > { %v6125_v22 = vpop.eup %6124  ;;  %v3160_v15 = vmul.f32 %v6123_v56, %v7533_v3 }
 0x5fb   : > { %v2503_v10 = vcombine.low %v1727_v23, %v1734_v35  ;;  %v5468_v37 = vcombine.high %v1727_v23, %v1734_v35  ;;  %v2519_v36 = vcombine.low %v1743_v42, %v1750_v28  ;;  %v5469_v47 = vcombine.high %v1743_v42, %v1750_v28 }
 0x5fc   : > { %v3159_v3 = vmul.f32 %v6125_v22, %v7500_v50 }
 0x5fd   : > { %v2510_v0 = vrot.slane %v2503_v10, %v6907_v46  ;;  %v2518_v31 = vrot.slane %v5468_v37, %v6907_v46  ;;  %v2526_v58 = vrot.slane %v2519_v36, %v6907_v46  ;;  %v2534_v59 = vrot.slane %v5469_v47, %v6907_v46  ;;  %v6127_v11 = vpop.eup %6126 }
 0x5fe   : > { %v3170_v21 = vpack.c.bf16 %v3160_v15, %v3159_v3  ;;  %v6129_v20 = vpop.eup %6128  ;;  %v3164_v17 = vmul.f32 %v6127_v11, %v7549_v19 }
 0x5ff   : > { %v2535_v26 = vcombine.low %v2510_v0, %v2518_v31  ;;  %v2551_v57 = vcombine.low %v2526_v58, %v2534_v59  ;;  %v2536_v62 = vcombine.high %v2510_v0, %v2518_v31  ;;  %v2552_v2 = vcombine.high %v2526_v58, %v2534_v59 }
 0x600   : > { %v3163_v50 = vmul.f32 %v6129_v20, %v7525_v45  ;;  %v6131_v18 = vpop.eup %6130 }
 0x601   : > { %v2543_v32 = vrot.slane %v2535_v26, %v6912_v53  ;;  %v2559_v38 = vrot.slane %v2551_v57, %v6912_v53  ;;  %v2550_v24 = vrot.slane %v2536_v62, %v6912_v53  ;;  %v2566_v16 = vrot.slane %v2552_v2, %v6912_v53 }
 0x602   : > { %v3172_v6 = vpack.c.bf16 %v3164_v17, %v3163_v50  ;;  %v3161_v19 = vmul.f32 %v6131_v18, %v7502_v9 }
 0x603   : > { %v2567_v52 = vcombine.low %v2543_v32, %v2559_v38  ;;  %v2568_v25 = vcombine.high %v2543_v32, %v2559_v38  ;;  %v2569_v27 = vcombine.low %v2550_v24, %v2566_v16  ;;  %v2570_v49 = vcombine.high %v2550_v24, %v2566_v16 }
 0x605   : > { %v2607_v14 = vpack.c.bf16 %v2567_v52, %v2499_v29  ;;  %v2608_v1 = vpack.c.bf16 %v2568_v25, %v2500_v7  ;;  %v2609_v30 = vpack.c.bf16 %v2569_v27, %v2501_v12  ;;  %v2610_v39 = vpack.c.bf16 %v2570_v49, %v2502_v5 }
 0x606   : > { %v3169_v29 = vpack.c.bf16 %v3158_v54, %v3157_v44 }
 0x607   : > { %5776 = vmatpush3.bf16.msra.mxu1 %v2607_v14  ;;  %5782 = vmatpush3.bf16.msra.mxu0 %v2608_v1 }
 0x608   : > { %5787 = vmatprep.subr.bf16.mxu1 %v6426_v34  ;;  %5793 = vmatprep.subr.bf16.mxu0 %v6426_v34 }
 0x60a   : > { %5778 = vmatmul.mubr.msk.bf16.vlgmr.msra.gmra.mrb[24].mxu1 %vm2988_vm2, %v3169_v29  ;;  %5784 = vmatmul.mubr.msk.bf16.vlgmr.msra.gmra.mrb[36].mxu0 %vm2988_vm2, %v3170_v21 }
 0x60b   : > { %5788 = vmatpush3.bf16.msra.mxu1 %v2609_v30  ;;  %5794 = vmatpush3.bf16.msra.mxu0 %v2610_v39 }
 0x60c   : > { %5795 = vmatprep.mubr.msk.bf16.mxu0 %vm6427_vm0, %v6426_v34  ;;  %5789 = vmatprep.mubr.msk.bf16.mxu1 %vm6427_vm0, %v6426_v34 }
 0x612   : > { %5796 = vmatmul.mubr.msk.bf16.vlgmr.msra.gmra.mrb[40].mxu0 %vm2988_vm2, %v3172_v6 }
 0x613   : > { %4561 = vmatprep.mubr.bf16.mxu0 %v6422_v43 }
 0x623   : > { %v3126_v51 = vpop.xlane.xlu1 %3125 }
 0x624   : > { %6132 = vrcp.f32 %v3126_v51 }
 0x62e   : > { %v6133_v7 = vpop.eup %6132 }
 0x62f   : > { %v3162_v12 = vmul.f32 %v6133_v7, %v7566_v41 }
 0x631   : > { %v3171_v5 = vpack.c.bf16 %v3162_v12, %v3161_v19 }
 0x633   : > { %5790 = vmatmul.mubr.msk.bf16.vlgmr.msra.gmra.mrb[28].mxu1 %vm2988_vm2, %v3171_v5 }
 0x66c   : > { %v3210_v34 = vpop.f32.mrb[16].mxu1 }
 0x66d   : > { %v5755_v45 = vpop.f32.mrb[17].mxu1 }
 0x66e   : > { %v3213_v33 = vpop.f32.mrb[18].mxu1 }
 0x66f   : > { %v5756_v40 = vpop.f32.mrb[19].mxu1 }
 0x674   : > { %v3298_v48 = vpop.f32.mrb[20].mxu1 }
 0x675   : > { %v3525_v23 = vcombine.low %v3210_v34, %v3298_v48  ;;  %v3526_v35 = vcombine.high %v3210_v34, %v3298_v48  ;;  %v5767_v42 = vpop.f32.mrb[21].mxu1 }
 0x676   : > { %v3301_v8 = vpop.f32.mrb[22].mxu1 }
 0x677   : > { %v3593_v28 = vcombine.low %v3213_v33, %v3301_v8  ;;  %v3594_v10 = vcombine.high %v3213_v33, %v3301_v8  ;;  %v5768_v37 = vpop.f32.mrb[23].mxu1  ;;  %v3533_v59 = vrot.slane %v3525_v23, %v6907_v46  ;;  %v3540_v55 = vrot.slane %v3526_v35, %v6907_v46 }
 0x679   : > { %v3601_v22 = vrot.slane %v3593_v28, %v6907_v46  ;;  %v3608_v52 = vrot.slane %v3594_v10, %v6907_v46 }
 0x68d   : > { %v3254_v36 = vpop.f32.mrb[28].mxu0 }
 0x68e   : > { %v5761_v47 = vpop.f32.mrb[29].mxu0 }
 0x68f   : > { %v3257_v9 = vpop.f32.mrb[30].mxu0 }
 0x690   : > { %v5762_v13 = vpop.f32.mrb[31].mxu0 }
 0x695   : > { %v3342_v41 = vpop.f32.mrb[32].mxu0 }
 0x696   : > { %v3541_v0 = vcombine.low %v3254_v36, %v3342_v41  ;;  %v3542_v31 = vcombine.high %v3254_v36, %v3342_v41  ;;  %v5773_v58 = vpop.f32.mrb[33].mxu0 }
 0x697   : > { %v3345_v61 = vpop.f32.mrb[34].mxu0 }
 0x698   : > { %v3549_v26 = vrot.slane %v3541_v0, %v6907_v46  ;;  %v3556_v57 = vrot.slane %v3542_v31, %v6907_v46  ;;  %v3609_v62 = vcombine.low %v3257_v9, %v3345_v61  ;;  %v3610_v2 = vcombine.high %v3257_v9, %v3345_v61  ;;  %v5774_v56 = vpop.f32.mrb[35].mxu0 }
 0x69a   : > { %v3557_v32 = vcombine.low %v3533_v59, %v3549_v26  ;;  %v3558_v38 = vcombine.high %v3533_v59, %v3549_v26  ;;  %v3573_v24 = vcombine.low %v3540_v55, %v3556_v57  ;;  %v3574_v16 = vcombine.high %v3540_v55, %v3556_v57 }
 0x69b   : > { %v3617_v25 = vrot.slane %v3609_v62, %v6907_v46  ;;  %v3624_v27 = vrot.slane %v3610_v2, %v6907_v46 }
 0x69c   : > { %v3565_v49 = vrot.slane %v3557_v32, %v6912_v53  ;;  %v3572_v54 = vrot.slane %v3558_v38, %v6912_v53  ;;  %v3581_v15 = vrot.slane %v3573_v24, %v6912_v53  ;;  %v3588_v14 = vrot.slane %v3574_v16, %v6912_v53  ;;  %v5974_v24 = vld [vmem:[%s6733_s22] sm:$0xff]   ;;  %v5975_v16 = vld [vmem:[%s6733_s22 + $0x8] sm:$0xff]  }
 0x69d   : > { %v3625_v1 = vcombine.low %v3601_v22, %v3617_v25  ;;  %v3626_v30 = vcombine.high %v3601_v22, %v3617_v25  ;;  %v3641_v39 = vcombine.low %v3608_v52, %v3624_v27  ;;  %v3642_v44 = vcombine.high %v3608_v52, %v3624_v27  ;;  %5799 = vmatprep.subr.bf16.mxu1 %v5974_v24  ;;  %v5976_v27 = vld [vmem:[%s6733_s22 + $0x10] sm:$0xff]  }
 0x69e   : > { %v3797_v3 = vcombine.low %v3565_v49, %v3572_v54  ;;  %v5486_v11 = vcombine.high %v3565_v49, %v3572_v54  ;;  %v3813_v29 = vcombine.low %v3581_v15, %v3588_v14  ;;  %v5487_v21 = vcombine.high %v3581_v15, %v3588_v14  ;;  %5800 = vmatpush3.bf16.msra.mxu1 %v5974_v24  ;;  %v5977_v49 = vld [vmem:[%s6733_s22 + $0x18] sm:$0xff]   ;;  %v5978_v54 = vld [vmem:[%s6733_s22 + $0x20] sm:$0xff]  }
 0x69f   : > { %v3633_v20 = vrot.slane %v3625_v1, %v6912_v53  ;;  %v3640_v17 = vrot.slane %v3626_v30, %v6912_v53  ;;  %v3649_v50 = vrot.slane %v3641_v39, %v6912_v53  ;;  %v3656_v6 = vrot.slane %v3642_v44, %v6912_v53  ;;  %5801 = vmatprep.subr.bf16.mxu1 %v5975_v16 }
 0x6a0   : > { %v3804_v51 = vrot.slane %v3797_v3, %v6907_v46  ;;  %v3812_v18 = vrot.slane %v5486_v11, %v6907_v46  ;;  %v3820_v7 = vrot.slane %v3813_v29, %v6907_v46  ;;  %v3828_v19 = vrot.slane %v5487_v21, %v6907_v46 }
 0x6a1   : > { %v3865_v12 = vcombine.low %v3633_v20, %v3640_v17  ;;  %v5488_v5 = vcombine.high %v3633_v20, %v3640_v17  ;;  %v3881_v34 = vcombine.low %v3649_v50, %v3656_v6  ;;  %v5489_v45 = vcombine.high %v3649_v50, %v3656_v6 }
 0x6a2   : > { %v3830_v33 = vcombine.high %v3804_v51, %v3812_v18  ;;  %v3846_v40 = vcombine.high %v3820_v7, %v3828_v19  ;;  %v3829_v48 = vcombine.low %v3804_v51, %v3812_v18  ;;  %v3845_v23 = vcombine.low %v3820_v7, %v3828_v19  ;;  %5802 = vmatpush3.bf16.msra.mxu1 %v5975_v16 }
 0x6a3   : > { %v3872_v35 = vrot.slane %v3865_v12, %v6907_v46  ;;  %v3880_v42 = vrot.slane %v5488_v5, %v6907_v46  ;;  %v3888_v8 = vrot.slane %v3881_v34, %v6907_v46  ;;  %v3896_v28 = vrot.slane %v5489_v45, %v6907_v46  ;;  %5803 = vmatprep.subr.bf16.mxu1 %v5976_v27 }
 0x6a4   : > { %v3844_v10 = vrot.slane %v3830_v33, %v6912_v53  ;;  %v3860_v37 = vrot.slane %v3846_v40, %v6912_v53  ;;  %v7679_v36 = vrot.slane %v3829_v48, %v6912_v53  ;;  %v7682_v47 = vrot.slane %v3845_v23, %v6912_v53 }
 0x6a5   : > { %v3898_v9 = vcombine.high %v3872_v35, %v3880_v42  ;;  %v3914_v13 = vcombine.high %v3888_v8, %v3896_v28  ;;  %v3897_v41 = vcombine.low %v3872_v35, %v3880_v42  ;;  %v3913_v0 = vcombine.low %v3888_v8, %v3896_v28 }
 0x6a6   : > { %v3863_v31 = vcombine.low %v3844_v10, %v3860_v37  ;;  %v3861_v58 = vcombine.low %v7679_v36, %v7682_v47  ;;  %v3862_v59 = vcombine.high %v7679_v36, %v7682_v47  ;;  %v3864_v55 = vcombine.high %v3844_v10, %v3860_v37  ;;  %5804 = vmatpush3.bf16.msra.mxu1 %v5976_v27 }
 0x6a7   : > { %v3912_v61 = vrot.slane %v3898_v9, %v6912_v53  ;;  %v3928_v26 = vrot.slane %v3914_v13, %v6912_v53  ;;  %v7691_v57 = vrot.slane %v3897_v41, %v6912_v53  ;;  %v7694_v62 = vrot.slane %v3913_v0, %v6912_v53  ;;  %5805 = vmatprep.subr.bf16.mxu1 %v5977_v49 }
 0x6a9   : > { %v3931_v2 = vcombine.low %v3912_v61, %v3928_v26  ;;  %v3930_v56 = vcombine.high %v7691_v57, %v7694_v62  ;;  %v3929_v32 = vcombine.low %v7691_v57, %v7694_v62  ;;  %v3932_v38 = vcombine.high %v3912_v61, %v3928_v26 }
 0x6aa   : > { %5806 = vmatpush3.bf16.msra.mxu1 %v5977_v49 }
 0x6ab   : > { %v5917_v22 = vpack.i.bf16 %v3931_v2, %v3863_v31  ;;  %v5912_v52 = vpack.i.bf16 %v3930_v56, %v3862_v59  ;;  %v5922_v25 = vpack.i.bf16 %v3932_v38, %v3864_v55  ;;  %5807 = vmatprep.subr.bf16.mxu1 %v5978_v54 }
 0x6ad   : > { %5918 = vrot.lane.b32.xlu1 %v5917_v22, %s6424_s18  ;;  %5913 = vrot.lane.b32.xlu0 %v5912_v52, %s6425_s27 }
 0x6ae   : > { %5808 = vmatpush3.bf16.msra.mxu1 %v5978_v54 }
 0x6b1   : > { %5923 = vrot.lane.b32.xlu0 %v5922_v25, %s6423_s15 }
 0x6dd   : > { %v3386_v15 = vpop.f32.mrb[24].mxu1  ;;  %v3430_v14 = vpop.f32.mrb[36].mxu0 }
 0x6de   : > { %v5779_v1 = vpop.f32.mrb[25].mxu1  ;;  %v5785_v30 = vpop.f32.mrb[37].mxu0 }
 0x6df   : > { %v3389_v39 = vpop.f32.mrb[26].mxu1  ;;  %v3433_v44 = vpop.f32.mrb[38].mxu0 }
 0x6e0   : > { %v5780_v3 = vpop.f32.mrb[27].mxu1  ;;  %v5786_v11 = vpop.f32.mrb[39].mxu0 }
 0x6e5   : > { %v3518_v29 = vpop.f32.mrb[40].mxu0 }
 0x6e6   : > { %v3677_v21 = vcombine.low %v3430_v14, %v3518_v29  ;;  %v3678_v20 = vcombine.high %v3430_v14, %v3518_v29  ;;  %v5797_v17 = vpop.f32.mrb[41].mxu0 }
 0x6e7   : > { %v3521_v50 = vpop.f32.mrb[42].mxu0 }
 0x6e8   : > { %v3745_v6 = vcombine.low %v3433_v44, %v3521_v50  ;;  %v3746_v51 = vcombine.high %v3433_v44, %v3521_v50  ;;  %v5798_v18 = vpop.f32.mrb[43].mxu0  ;;  %v3685_v34 = vrot.slane %v3677_v21, %v6907_v46  ;;  %v3692_v45 = vrot.slane %v3678_v20, %v6907_v46  ;;  %v5979_v50 = vld [vmem:[%s6733_s22 + $0x28] sm:$0xff]  }
 0x6e9   : > { %5809 = vmatprep.subr.bf16.mxu1 %v5979_v50 }
 0x6ea   : > { %v3753_v9 = vrot.slane %v3745_v6, %v6907_v46  ;;  %v3760_v13 = vrot.slane %v3746_v51, %v6907_v46  ;;  %5810 = vmatpush3.bf16.msra.mxu1 %v5979_v50 }
 0x706   : > { %v3474_v7 = vpop.f32.mrb[28].mxu1 }
 0x707   : > { %v3661_v19 = vcombine.low %v3386_v15, %v3474_v7  ;;  %v3662_v12 = vcombine.high %v3386_v15, %v3474_v7  ;;  %v5791_v5 = vpop.f32.mrb[29].mxu1 }
 0x708   : > { %v3477_v33 = vpop.f32.mrb[30].mxu1 }
 0x709   : > { %v3669_v40 = vrot.slane %v3661_v19, %v6907_v46  ;;  %v3676_v48 = vrot.slane %v3662_v12, %v6907_v46  ;;  %v3729_v23 = vcombine.low %v3389_v39, %v3477_v33  ;;  %v3730_v35 = vcombine.high %v3389_v39, %v3477_v33  ;;  %v5792_v42 = vpop.f32.mrb[31].mxu1 }
 0x70b   : > { %v3693_v8 = vcombine.low %v3669_v40, %v3685_v34  ;;  %v3694_v28 = vcombine.high %v3669_v40, %v3685_v34  ;;  %v3709_v10 = vcombine.low %v3676_v48, %v3692_v45  ;;  %v3710_v37 = vcombine.high %v3676_v48, %v3692_v45 }
 0x70c   : > { %v3737_v41 = vrot.slane %v3729_v23, %v6907_v46  ;;  %v3744_v0 = vrot.slane %v3730_v35, %v6907_v46 }
 0x70d   : > { %v3701_v31 = vrot.slane %v3693_v8, %v6912_v53  ;;  %v3708_v59 = vrot.slane %v3694_v28, %v6912_v53  ;;  %v3717_v55 = vrot.slane %v3709_v10, %v6912_v53  ;;  %v3724_v61 = vrot.slane %v3710_v37, %v6912_v53 }
 0x70e   : > { %v3761_v26 = vcombine.low %v3737_v41, %v3753_v9  ;;  %v3762_v2 = vcombine.high %v3737_v41, %v3753_v9  ;;  %v3777_v56 = vcombine.low %v3744_v0, %v3760_v13  ;;  %v3778_v38 = vcombine.high %v3744_v0, %v3760_v13 }
 0x70f   : > { %v3933_v24 = vcombine.low %v3701_v31, %v3708_v59  ;;  %v5490_v16 = vcombine.high %v3701_v31, %v3708_v59  ;;  %v3949_v22 = vcombine.low %v3717_v55, %v3724_v61  ;;  %v5491_v52 = vcombine.high %v3717_v55, %v3724_v61 }
 0x710   : > { %v3769_v25 = vrot.slane %v3761_v26, %v6912_v53  ;;  %v3776_v27 = vrot.slane %v3762_v2, %v6912_v53  ;;  %v3785_v49 = vrot.slane %v3777_v56, %v6912_v53  ;;  %v3792_v54 = vrot.slane %v3778_v38, %v6912_v53  ;;  %v5981_v26 = vld [vmem:[%s6733_s22 + $0x38] sm:$0xff]  }
 0x711   : > { %v3940_v15 = vrot.slane %v3933_v24, %v6907_v46  ;;  %v3948_v14 = vrot.slane %v5490_v16, %v6907_v46  ;;  %v3956_v1 = vrot.slane %v3949_v22, %v6907_v46  ;;  %v3964_v30 = vrot.slane %v5491_v52, %v6907_v46 }
 0x712   : > { %v4001_v39 = vcombine.low %v3769_v25, %v3776_v27  ;;  %v5492_v44 = vcombine.high %v3769_v25, %v3776_v27  ;;  %v4017_v3 = vcombine.low %v3785_v49, %v3792_v54  ;;  %v5493_v11 = vcombine.high %v3785_v49, %v3792_v54 }
 0x713   : > { %v3965_v29 = vcombine.low %v3940_v15, %v3948_v14  ;;  %v3981_v21 = vcombine.low %v3956_v1, %v3964_v30  ;;  %v3966_v20 = vcombine.high %v3940_v15, %v3948_v14  ;;  %v3982_v17 = vcombine.high %v3956_v1, %v3964_v30 }
 0x714   : > { %v4008_v6 = vrot.slane %v4001_v39, %v6907_v46  ;;  %v4016_v51 = vrot.slane %v5492_v44, %v6907_v46  ;;  %v4024_v18 = vrot.slane %v4017_v3, %v6907_v46  ;;  %v4032_v7 = vrot.slane %v5493_v11, %v6907_v46  ;;  %v5980_v46 = vld [vmem:[%s6733_s22 + $0x30] sm:$0xff]  }
 0x715   : > { %v3973_v19 = vrot.slane %v3965_v29, %v6912_v53  ;;  %v3989_v12 = vrot.slane %v3981_v21, %v6912_v53  ;;  %v3980_v5 = vrot.slane %v3966_v20, %v6912_v53  ;;  %v3996_v34 = vrot.slane %v3982_v17, %v6912_v53  ;;  %5811 = vmatprep.subr.bf16.mxu1 %v5980_v46 }
 0x716   : > { %v4033_v45 = vcombine.low %v4008_v6, %v4016_v51  ;;  %v4049_v33 = vcombine.low %v4024_v18, %v4032_v7  ;;  %v4034_v40 = vcombine.high %v4008_v6, %v4016_v51  ;;  %v4050_v48 = vcombine.high %v4024_v18, %v4032_v7  ;;  %5812 = vmatpush3.bf16.msra.mxu1 %v5980_v46  ;;  %v7767_v18 = vld [vmem:[%s6746_s19] sm:$0x3f] }
 0x717   : > { %v3997_v23 = vcombine.low %v3973_v19, %v3989_v12  ;;  %v3998_v35 = vcombine.high %v3973_v19, %v3989_v12  ;;  %v3999_v42 = vcombine.low %v3980_v5, %v3996_v34  ;;  %v4000_v8 = vcombine.high %v3980_v5, %v3996_v34  ;;  %5813 = vmatprep.subr.bf16.mxu1 %v5981_v26 }
 0x718   : > { %v4041_v28 = vrot.slane %v4033_v45, %v6912_v53  ;;  %v4057_v10 = vrot.slane %v4049_v33, %v6912_v53  ;;  %v4048_v37 = vrot.slane %v4034_v40, %v6912_v53  ;;  %v4064_v9 = vrot.slane %v4050_v48, %v6912_v53  ;;  %v6175_v40 = vld [vmem:[#allocation11] sm:$0xff] }
 0x719   : > { %v4151_v51 = vsub.s32 2, %v6798_v60 }
 0x71a   : > { %v4066_v13 = vcombine.high %v4041_v28, %v4057_v10  ;;  %v4065_v41 = vcombine.low %v4041_v28, %v4057_v10  ;;  %v4067_v0 = vcombine.low %v4048_v37, %v4064_v9  ;;  %v4068_v31 = vcombine.high %v4048_v37, %v4064_v9  ;;  %5814 = vmatpush3.bf16.msra.mxu1 %v5981_v26  ;;  %v6178_v10 = vld [vmem:[#allocation11 + $0x18] sm:$0xff]  ;;  %v5982_v9 = vld [vmem:[%s6735_s8] ss:$16 sps:$4 sm:$0xff]  }
 0x71b   : > { %v4152_v7 = vrot.slane %v7767_v18, %v4151_v51 }
 0x71c   : > { %v5927_v59 = vpack.i.bf16 %v4066_v13, %v3998_v35  ;;  %v5932_v55 = vpack.i.bf16 %v4067_v0, %v3999_v42  ;;  %v5937_v61 = vpack.i.bf16 %v4068_v31, %v4000_v8  ;;  %v6176_v35 = vld [vmem:[#allocation11 + $0x8] sm:$0xff]  ;;  %v6177_v8 = vld [vmem:[#allocation11 + $0x10] sm:$0xff] }
 0x71d   : > { %v5984_v13 = vld [vmem:[%s6735_s8 + $0x4] ss:$16 sps:$4 sm:$0xff]   ;;  %v5987_v0 = vld [vmem:[%s6735_s8 + $0xc] ss:$16 sps:$4 sm:$0xff]  }
 0x71e   : > { %5928 = vrot.lane.b32.xlu1 %v5927_v59, %s6425_s27  ;;  %v5990_v31 = vld [vmem:[%s6735_s8 + $0x24] ss:$16 sps:$4 sm:$0xff]   ;;  %4529 = vmatprep.subr.bf16.mxu0 %v5984_v13  ;;  %v5993_v59 = vld [vmem:[%s6735_s8 + $0x2c] ss:$16 sps:$4 sm:$0xff]  }
 0x71f   : > { %v5919_v2 = vpop.permute.xlu1 %5918  ;;  %v5914_v56 = vpop.permute.xlu0 %5913  ;;  %4582 = vmatprep.subr.bf16.mxu1 %v5987_v0  ;;  %4530 = vmatpush1.bf16.msra.mxu0 %v5982_v9 }
 0x720   : > { %v5916_v38 = vunpack.i.h.bf16 %v5914_v56  ;;  %v5915_v24 = vunpack.i.l.bf16 %v5914_v56  ;;  %v5921_v16 = vunpack.i.h.bf16 %v5919_v2  ;;  %v5920_v53 = vunpack.i.l.bf16 %v5919_v2  ;;  %4531 = vmatprep.subr.bf16.mxu0 %v5990_v31 }
 0x722   : > { %5933 = vrot.lane.b32.xlu1 %v5932_v55, %s6424_s18  ;;  %v4118_v22 = vsel %vm2611_vm1, %v3929_v32, %v5916_v38  ;;  %v4117_v52 = vsel %vm2611_vm1, %v3861_v58, %v5915_v24  ;;  %v5988_v55 = vld [vmem:[%s6735_s8 + $0x20] ss:$16 sps:$4 sm:$0xff]  }
 0x723   : > { %v5924_v25 = vpop.permute.xlu0 %5923  ;;  %v4122_v54 = vsel %vm4121_vm3, %v4117_v52, %v5920_v53  ;;  %v4123_v15 = vsel %vm4121_vm3, %v4118_v22, %v5921_v16  ;;  %4532 = vmatpush1.bf16.msra.mxu0 %v5988_v55 }
 0x724   : > { %v5926_v27 = vunpack.i.h.bf16 %v5924_v25  ;;  %v5925_v49 = vunpack.i.l.bf16 %v5924_v25 }
 0x726   : > { %5938 = vrot.lane.b32.xlu1 %v5937_v61, %s6423_s15  ;;  %v4127_v57 = vsel %vm4126_vm4, %v4122_v54, %v5925_v49  ;;  %v4128_v62 = vsel %vm4126_vm4, %v4123_v15, %v5926_v27  ;;  %v5991_v61 = vld [vmem:[%s6735_s8 + $0x28] ss:$16 sps:$4 sm:$0xff]  }
 0x727   : > { %v4131_v32 = vpack.c.bf16 %v4128_v62, %v4127_v57 }
 0x729   : > { %5815 = vmatprep.mubr.bf16.mxu1 %v4131_v32  ;;  %v5994_v32 = vld [vmem:[%s6735_s8 + $0x40] ss:$16 sps:$4 sm:$0xff]  }
 0x790   : > { %v5929_v36 = vpop.permute.xlu1 %5928 }
 0x791   : > { %v5931_v58 = vunpack.i.h.bf16 %v5929_v36  ;;  %v5930_v14 = vunpack.i.l.bf16 %v5929_v36  ;;  %v5996_v36 = vld [vmem:[%s6735_s8 + $0x44] ss:$16 sps:$4 sm:$0xff]  }
 0x792   : > { %4533 = vmatprep.subr.bf16.mxu0 %v5996_v36 }
 0x793   : > { %v4119_v44 = vsel %vm2611_vm1, %v3997_v23, %v5930_v14  ;;  %v4120_v3 = vsel %vm2611_vm1, %v4065_v41, %v5931_v58  ;;  %v5985_v41 = vld [vmem:[%s6735_s8 + $0x8] ss:$16 sps:$4 sm:$0xff]   ;;  %v5999_v58 = vld [vmem:[%s6735_s8 + $0x4c] ss:$16 sps:$4 sm:$0xff]   ;;  %v6002_v14 = vld [vmem:[%s6735_s8 + $0x64] ss:$16 sps:$4 sm:$0xff]   ;;  %4534 = vmatpush1.bf16.msra.mxu0 %v5994_v32 }
 0x794   : > { %v5934_v47 = vpop.permute.xlu1 %5933  ;;  %4535 = vmatprep.subr.bf16.mxu0 %v6002_v14 }
 0x795   : > { %v5936_v1 = vunpack.i.h.bf16 %v5934_v47  ;;  %v5935_v30 = vunpack.i.l.bf16 %v5934_v47  ;;  %v5997_v47 = vld [vmem:[%s6735_s8 + $0x48] ss:$16 sps:$4 sm:$0xff]  }
 0x797   : > { %v4124_v21 = vsel %vm4121_vm3, %v4119_v44, %v5935_v30  ;;  %v4125_v20 = vsel %vm4121_vm3, %v4120_v3, %v5936_v1  ;;  %v6000_v1 = vld [vmem:[%s6735_s8 + $0x60] ss:$16 sps:$4 sm:$0xff]   ;;  %v6005_v30 = vld [vmem:[%s6735_s8 + $0x6c] ss:$16 sps:$4 sm:$0xff]   ;;  %v6008_v44 = vld [vmem:[%s6735_s8 + $0x84] ss:$16 sps:$4 sm:$0xff]  }
 0x798   : > { %v5939_v39 = vpop.permute.xlu1 %5938  ;;  %v6011_v3 = vld [vmem:[%s6735_s8 + $0x8c] ss:$16 sps:$4 sm:$0xff]   ;;  %4536 = vmatpush1.bf16.msra.mxu0 %v6000_v1  ;;  %v6030_v1 = vld [vmem:[%s6753_s23 + $0x40] sm:$0xff]  }
 0x799   : > { %v5941_v11 = vunpack.i.h.bf16 %v5939_v39  ;;  %v5940_v29 = vunpack.i.l.bf16 %v5939_v39  ;;  %v6003_v39 = vld [vmem:[%s6735_s8 + $0x68] ss:$16 sps:$4 sm:$0xff]   ;;  %4537 = vmatprep.subr.bf16.mxu0 %v6008_v44 }
 0x79a   : > { %v6035_v44 = vld [vmem:[%s6753_s23 + $0xc8] sm:$0xff]  }
 0x79b   : > { %v4129_v17 = vsel %vm4126_vm4, %v4124_v21, %v5940_v29  ;;  %v4130_v50 = vsel %vm4126_vm4, %v4125_v20, %v5941_v11  ;;  %v6006_v11 = vld [vmem:[%s6735_s8 + $0x80] ss:$16 sps:$4 sm:$0xff]   ;;  %v6009_v29 = vld [vmem:[%s6735_s8 + $0x88] ss:$16 sps:$4 sm:$0xff]   ;;  %v6014_v21 = vld [vmem:[%s6735_s8 + $0xa4] ss:$16 sps:$4 sm:$0xff]  }
 0x79c   : > { %v4132_v6 = vpack.c.bf16 %v4130_v50, %v4129_v17  ;;  %v6017_v20 = vld [vmem:[%s6735_s8 + $0xac] ss:$16 sps:$4 sm:$0xff]   ;;  %4538 = vmatpush1.bf16.msra.mxu0 %v6006_v11  ;;  %v6012_v17 = vld [vmem:[%s6735_s8 + $0xa0] ss:$16 sps:$4 sm:$0xff]   ;;  %v6015_v50 = vld [vmem:[%s6735_s8 + $0xa8] ss:$16 sps:$4 sm:$0xff]  }
 0x79d   : > { %4539 = vmatprep.subr.bf16.mxu0 %v6014_v21  ;;  %v6037_v11 = vld [vmem:[%s6753_s23 + $0x88] sm:$0xff]   ;;  %v6039_v21 = vld [vmem:[%s6753_s23 + $0xd0] sm:$0xff]  }
 0x79e   : > { %5816 = vmatmul.mubr.bf16.vlgmr.msra.gmra.mrb[32].mxu1 %v4132_v6  ;;  %v6020_v6 = vld [vmem:[%s6735_s8 + $0xc4] ss:$16 sps:$4 sm:$0xff]  }
 0x79f   : > { %4614 = vmatprep.mubr.bf16.mxu1 %v6422_v43  ;;  %4583 = vmatpush1.bf16.msra.mxu1 %v5985_v41 }
 0x7a0   : > { %4584 = vmatprep.subr.bf16.mxu1 %v5993_v59  ;;  %4540 = vmatpush1.bf16.msra.mxu0 %v6012_v17  ;;  %v4300_v59 = vsub.s32 3, %v6798_v60  ;;  %v6041_v17 = vld [vmem:[%s6753_s23 + $0x90] sm:$0xff]  }
 0x7a1   : > { %4541 = vmatprep.subr.bf16.mxu0 %v6020_v6  ;;  %v6043_v6 = vld [vmem:[%s6753_s23 + $0xd8] sm:$0xff]  }
 0x7a3   : > { %4585 = vmatpush1.bf16.msra.mxu1 %v5991_v61  ;;  %v4301_v61 = vrot.slane %v7767_v18, %v4300_v59 }
 0x7a4   : > { %4586 = vmatprep.subr.bf16.mxu1 %v5999_v58 }
 0x7a7   : > { %4587 = vmatpush1.bf16.msra.mxu1 %v5997_v47 }
 0x7a8   : > { %4588 = vmatprep.subr.bf16.mxu1 %v6005_v30  ;;  %v6032_v30 = vld [vmem:[%s6753_s23] sm:$0xff]  }
 0x7ab   : > { %4589 = vmatpush1.bf16.msra.mxu1 %v6003_v39  ;;  %v6033_v39 = vld [vmem:[%s6753_s23 + $0x80] sm:$0xff]  }
 0x7ac   : > { %4590 = vmatprep.subr.bf16.mxu1 %v6011_v3  ;;  %v6036_v3 = vld [vmem:[%s6753_s23 + $0x8] sm:$0xff]  }
 0x7af   : > { %4591 = vmatpush1.bf16.msra.mxu1 %v6009_v29  ;;  %v6038_v29 = vld [vmem:[%s6753_s23 + $0x50] sm:$0xff]  }
 0x7b0   : > { %4592 = vmatprep.subr.bf16.mxu1 %v6017_v20  ;;  %v6040_v20 = vld [vmem:[%s6753_s23 + $0x10] sm:$0xff]  }
 0x7b3   : > { %4593 = vmatpush1.bf16.msra.mxu1 %v6015_v50  ;;  %v6042_v50 = vld [vmem:[%s6753_s23 + $0x58] sm:$0xff]  }
 0x871   : > { %v5817_v19 = vpop.f32.mrb[32].mxu1 }
 0x872   : > { %v4235_v12 = vpop.f32.mrb[33].mxu1  ;;  %v4244_v33 = vadd.f32 %v5817_v19, %v4152_v7  ;;  %v6018_v19 = vld [vmem:[%s6735_s8 + $0xc0] ss:$16 sps:$4 sm:$0xff]  }
 0x873   : > { %v4236_v5 = vadd.f32 %v4235_v12, %v4152_v7  ;;  %v5818_v34 = vpop.f32.mrb[34].mxu1  ;;  %v6021_v12 = vld [vmem:[%s6735_s8 + $0xc8] ss:$16 sps:$4 sm:$0xff]   ;;  %4542 = vmatpush1.bf16.msra.mxu0 %v6018_v19 }
 0x874   : > { %v4238_v45 = vpop.f32.mrb[35].mxu1  ;;  %v7777_v46 = vadd.f32 %v6177_v8, %v4244_v33  ;;  %v4247_v28 = vadd.f32 %v5818_v34, %v4152_v7  ;;  %v6029_v34 = vld [vmem:[%s6735_s8 + $0xec] ss:$16 sps:$4 sm:$0xff]   ;;  %v6027_v33 = vld [vmem:[%s6735_s8 + $0xe8] ss:$16 sps:$4 sm:$0xff]  }
 0x875   : > { %v7772_v48 = vadd.f32 %v6175_v40, %v4236_v5  ;;  %v4239_v23 = vadd.f32 %v4238_v45, %v4152_v7  ;;  %v6023_v7 = vld [vmem:[%s6735_s8 + $0xcc] ss:$16 sps:$4 sm:$0xff]   ;;  %v6026_v5 = vld [vmem:[%s6735_s8 + $0xe4] ss:$16 sps:$4 sm:$0xff]   ;;  %v6024_v45 = vld [vmem:[%s6735_s8 + $0xe0] ss:$16 sps:$4 sm:$0xff]  }
 0x876   : > { %v7781_v37 = vadd.f32 %v6178_v10, %v4247_v28  ;;  %4594 = vmatprep.subr.bf16.mxu1 %v6023_v7  ;;  %4543 = vmatprep.subr.bf16.mxu0 %v6026_v5  ;;  %v6044_v7 = vld [vmem:[%s6753_s23 + $0x18] sm:$0xff]   ;;  %v6047_v5 = vld [vmem:[%s6753_s23 + $0xe0] sm:$0xff]  }
 0x877   : > { %v7774_v42 = vadd.f32 %v6176_v35, %v4239_v23  ;;  %4254 = vadd.xlane.f32.xlu0 %v7772_v48  ;;  %4595 = vmatpush1.bf16.msra.mxu1 %v6021_v12  ;;  %v6045_v19 = vld [vmem:[%s6753_s23 + $0x98] sm:$0xff]   ;;  %v6046_v12 = vld [vmem:[%s6753_s23 + $0x60] sm:$0xff]  }
 0x878   : > { %4596 = vmatprep.subr.bf16.mxu1 %v6029_v34  ;;  %4544 = vmatpush1.bf16.msra.mxu0 %v6024_v45  ;;  %v6048_v34 = vld [vmem:[%s6753_s23 + $0x20] sm:$0xff]  }
 0x879   : > { %4256 = vadd.xlane.f32.xlu1 %v7774_v42  ;;  %5627 = vmatprep.subr.bf16.mxu0 %v6030_v1  ;;  %v6049_v45 = vld [vmem:[%s6753_s23 + $0xa0] sm:$0xff]  }
 0x87b   : > { %4258 = vadd.xlane.f32.xlu0 %v7777_v46  ;;  %4597 = vmatpush1.bf16.msra.mxu1 %v6027_v33  ;;  %v6050_v33 = vld [vmem:[%s6753_s23 + $0x68] sm:$0xff]  }
 0x87f   : > { %4260 = vadd.xlane.f32.xlu0 %v7781_v37 }
 0x904   : > { %v4255_v26 = vpop.xlane.xlu0 %4254 }
 0x905   : > { %v4262_v2 = vmul.f32 0.0078125, %v4255_v26  ;;  %v4308_v26 = vsub.s32 4, %v6798_v60 }
 0x906   : > { %v4257_v56 = vpop.xlane.xlu1 %4256 }
 0x907   : > { %v7793_v38 = vsub.f32 %v7772_v48, %v4262_v2  ;;  %v4263_v24 = vmul.f32 0.0078125, %v4257_v56 }
 0x908   : > { %v4259_v16 = vpop.xlane.xlu0 %4258 }
 0x909   : > { %v7796_v53 = vsub.f32 %v7774_v42, %v4263_v24  ;;  %v4264_v22 = vmul.f32 0.0078125, %v4259_v16  ;;  %v4270_v52 = vmul.f32 %v7793_v38, %v7793_v38 }
 0x90b   : > { %v7801_v25 = vsub.f32 %v7777_v46, %v4264_v22  ;;  %4274 = vadd.xlane.f32.xlu0 %v4270_v52  ;;  %v4271_v27 = vmul.f32 %v7796_v53, %v7796_v53  ;;  %v4309_v52 = vrot.slane %v7767_v18, %v4308_v26 }
 0x90c   : > { %v4261_v49 = vpop.xlane.xlu0 %4260 }
 0x90d   : > { %v4265_v54 = vmul.f32 0.0078125, %v4261_v49  ;;  %4276 = vadd.xlane.f32.xlu1 %v4271_v27  ;;  %v4272_v15 = vmul.f32 %v7801_v25, %v7801_v25 }
 0x90f   : > { %v7808_v57 = vsub.f32 %v7781_v37, %v4265_v54  ;;  %4278 = vadd.xlane.f32.xlu0 %v4272_v15 }
 0x911   : > { %v4273_v62 = vmul.f32 %v7808_v57, %v7808_v57 }
 0x913   : > { %4280 = vadd.xlane.f32.xlu1 %v4273_v62 }
 0x998   : > { %v4275_v40 = vpop.xlane.xlu0 %4274 }
 0x999   : > { %v4282_v23 = vmul.f32 0.0078125, %v4275_v40  ;;  %v6051_v40 = vld [vmem:[%s6753_s23 + $0xe8] sm:$0xff]  }
 0x99a   : > { %v4277_v35 = vpop.xlane.xlu1 %4276 }
 0x99b   : > { %v4286_v8 = vadd.f32 1e-05, %v4282_v23  ;;  %v4283_v28 = vmul.f32 0.0078125, %v4277_v35  ;;  %v6052_v23 = vld [vmem:[%s6753_s23 + $0x28] sm:$0xff]  }
 0x99c   : > { %v4279_v10 = vpop.xlane.xlu0 %4278  ;;  %v6053_v35 = vld [vmem:[%s6753_s23 + $0xa8] sm:$0xff]  }
 0x99d   : > { %6134 = vrsqrt.f32 %v4286_v8  ;;  %v4287_v9 = vadd.f32 1e-05, %v4283_v28  ;;  %v4284_v13 = vmul.f32 0.0078125, %v4279_v10  ;;  %v6054_v8 = vld [vmem:[%s6753_s23 + $0x70] sm:$0xff]  }
 0x99e   : > { %v6055_v28 = vld [vmem:[%s6753_s23 + $0xf0] sm:$0xff]  }
 0x99f   : > { %6136 = vrsqrt.f32 %v4287_v9  ;;  %v4288_v41 = vadd.f32 1e-05, %v4284_v13  ;;  %v6056_v10 = vld [vmem:[%s6753_s23 + $0x30] sm:$0xff]   ;;  %v6058_v13 = vld [vmem:[%s6753_s23 + $0x78] sm:$0xff]  }
 0x9a0   : > { %v4281_v0 = vpop.xlane.xlu1 %4280  ;;  %v6057_v9 = vld [vmem:[%s6753_s23 + $0xb0] sm:$0xff]  }
 0x9a1   : > { %6138 = vrsqrt.f32 %v4288_v41  ;;  %v4285_v31 = vmul.f32 0.0078125, %v4281_v0  ;;  %v6059_v41 = vld [vmem:[%s6753_s23 + $0xf8] sm:$0xff]  }
 0x9a2   : > { %v6060_v0 = vld [vmem:[%s6753_s23 + $0x38] sm:$0xff]  }
 0x9a3   : > { %v4289_v55 = vadd.f32 1e-05, %v4285_v31  ;;  %v6061_v31 = vld [vmem:[%s6753_s23 + $0xb8] sm:$0xff]  }
 0x9a5   : > { %6140 = vrsqrt.f32 %v4289_v55  ;;  %v493_v55 = vld [vmem:[%s6751_s12] sm:$0xf] }
 0x9a6   : > { %v7886_v26 = vrot.slane %v493_v55, %v4151_v51 }
 0x9a7   : > { %v6135_v2 = vpop.eup %6134 }
 0x9a8   : > { %v4294_v56 = vmul.f32 %v6135_v2, %v7793_v38  ;;  %v7889_v2 = vrot.slane %v493_v55, %v6807_v4 }
 0x9a9   : > { %v6137_v24 = vpop.eup %6136 }
 0x9aa   : > { %v4295_v16 = vmul.f32 %v6137_v24, %v7796_v53  ;;  %v4302_v22 = vmul.f32 %v4301_v61, %v4294_v56  ;;  %v7893_v56 = vrot.slane %v493_v55, %v4300_v59 }
 0x9ab   : > { %v6139_v27 = vpop.eup %6138 }
 0x9ac   : > { %v4303_v49 = vmul.f32 %v4301_v61, %v4295_v16  ;;  %v4310_v54 = vadd.f32 %v4309_v52, %v4302_v22  ;;  %v4296_v62 = vmul.f32 %v6139_v27, %v7801_v25 }
 0x9ae   : > { %v4311_v15 = vadd.f32 %v4309_v52, %v4303_v49  ;;  %v4304_v53 = vmul.f32 %v4301_v61, %v4296_v62 }
 0x9af   : > { %v6141_v32 = vpop.eup %6140 }
 0x9b0   : > { %v4314_v36 = vpack.c.bf16 %v4311_v15, %v4310_v54  ;;  %v4297_v38 = vmul.f32 %v6141_v32, %v7808_v57  ;;  %v4312_v25 = vadd.f32 %v4309_v52, %v4304_v53  ;;  %v6031_v57 = vld [vmem:[%s6753_s23 + $0xc0] sm:$0xff]  }
 0x9b1   : > { %5655 = vmatprep.subr.bf16.mxu1 %v6031_v57 }
 0x9b2   : > { %4562 = vmatmul.mubr.bf16.vlgmr.msra.gmra.mrb[44].mxu0 %v4314_v36  ;;  %4615 = vmatmul.mubr.bf16.vlgmr.msra.gmra.mrb[36].mxu1 %v4314_v36  ;;  %v4305_v47 = vmul.f32 %v4301_v61, %v4297_v38  ;;  %v7882_v61 = vrot.slane %v493_v55, %v6801_v63 }
 0x9b3   : > { %4571 = vmatprep.mubr.bf16.mxu0 %v6422_v43  ;;  %4624 = vmatprep.mubr.bf16.mxu1 %v6422_v43  ;;  %v6034_v43 = vld [vmem:[%s6753_s23 + $0x48] sm:$0xff]  }
 0x9b4   : > { %v4313_v58 = vadd.f32 %v4309_v52, %v4305_v47  ;;  %5628 = vmatpush3.bf16.msra.mxu0 %v6032_v30  ;;  %5656 = vmatpush3.bf16.msra.mxu1 %v6033_v39 }
 0x9b5   : > { %5629 = vmatprep.subr.bf16.mxu0 %v6034_v43  ;;  %5657 = vmatprep.subr.bf16.mxu1 %v6035_v44 }
 0x9b6   : > { %v4315_v14 = vpack.c.bf16 %v4313_v58, %v4312_v25 }
 0x9b8   : > { %5630 = vmatpush3.bf16.msra.mxu0 %v6036_v3  ;;  %5658 = vmatpush3.bf16.msra.mxu1 %v6037_v11 }
 0x9b9   : > { %5631 = vmatprep.subr.bf16.mxu0 %v6038_v29  ;;  %5659 = vmatprep.subr.bf16.mxu1 %v6039_v21 }
 0x9ba   : > { %4572 = vmatmul.mubr.bf16.gmra.mrb[48].mxu0 %v4315_v14  ;;  %4625 = vmatmul.mubr.bf16.gmra.mrb[40].mxu1 %v4315_v14 }
 0x9bc   : > { %5632 = vmatpush3.bf16.msra.mxu0 %v6040_v20  ;;  %5660 = vmatpush3.bf16.msra.mxu1 %v6041_v17 }
 0x9bd   : > { %5633 = vmatprep.subr.bf16.mxu0 %v6042_v50  ;;  %5661 = vmatprep.subr.bf16.mxu1 %v6043_v6 }
 0x9c0   : > { %5634 = vmatpush3.bf16.msra.mxu0 %v6044_v7  ;;  %5662 = vmatpush3.bf16.msra.mxu1 %v6045_v19 }
 0x9c1   : > { %5635 = vmatprep.subr.bf16.mxu0 %v6046_v12  ;;  %5663 = vmatprep.subr.bf16.mxu1 %v6047_v5 }
 0x9c4   : > { %5636 = vmatpush3.bf16.msra.mxu0 %v6048_v34  ;;  %5664 = vmatpush3.bf16.msra.mxu1 %v6049_v45 }
 0x9c5   : > { %5637 = vmatprep.subr.bf16.mxu0 %v6050_v33  ;;  %5665 = vmatprep.subr.bf16.mxu1 %v6051_v40 }
 0x9c8   : > { %5638 = vmatpush3.bf16.msra.mxu0 %v6052_v23  ;;  %5666 = vmatpush3.bf16.msra.mxu1 %v6053_v35 }
 0x9c9   : > { %5639 = vmatprep.subr.bf16.mxu0 %v6054_v8  ;;  %5667 = vmatprep.subr.bf16.mxu1 %v6055_v28 }
 0x9cc   : > { %5640 = vmatpush3.bf16.msra.mxu0 %v6056_v10  ;;  %5668 = vmatpush3.bf16.msra.mxu1 %v6057_v9 }
 0x9cd   : > { %5641 = vmatprep.subr.bf16.mxu0 %v6058_v13  ;;  %5669 = vmatprep.subr.bf16.mxu1 %v6059_v41 }
 0x9d0   : > { %5642 = vmatpush3.bf16.msra.mxu0 %v6060_v0  ;;  %5670 = vmatpush3.bf16.msra.mxu1 %v6061_v31 }
 0xa85   : > { %v4563_v24 = vpop.f32.mrb[44].mxu0  ;;  %v4616_v16 = vpop.f32.mrb[36].mxu1 }
 0xa86   : > { %v7896_v22 = vadd.f32 %v4563_v24, %v7882_v61  ;;  %v7899_v52 = vadd.f32 %v4616_v16, %v7886_v26  ;;  %v4565_v27 = vpop.f32.mrb[45].mxu0  ;;  %v4618_v49 = vpop.f32.mrb[37].mxu1 }
 0xa87   : > { %v7902_v51 = vadd.f32 %v4565_v27, %v7889_v2  ;;  %v7905_v54 = vadd.f32 %v4618_v49, %v7893_v56  ;;  %v4567_v15 = vpop.f32.mrb[46].mxu0  ;;  %v4620_v62 = vpop.f32.mrb[38].mxu1 }
 0xa88   : > { %v4635_v59 = vmul.f32 %v7896_v22, %v7896_v22  ;;  %v4637_v32 = vmul.f32 %v7899_v52, %v7899_v52  ;;  %v7912_v36 = vadd.f32 %v4567_v15, %v7882_v61  ;;  %v7915_v38 = vadd.f32 %v4620_v62, %v7886_v26  ;;  %v4569_v53 = vpop.f32.mrb[47].mxu0  ;;  %v4622_v47 = vpop.f32.mrb[39].mxu1 }
 0xa89   : > { %v4636_v58 = vmul.f32 %v7902_v51, %v7902_v51  ;;  %v4638_v25 = vmul.f32 %v7905_v54, %v7905_v54  ;;  %v7922_v14 = vadd.f32 %v4569_v53, %v7889_v2  ;;  %v7925_v1 = vadd.f32 %v4622_v47, %v7893_v56 }
 0xa8a   : > { %v4651_v57 = vmul.f32 %v4635_v59, %v7896_v22  ;;  %v4653_v30 = vmul.f32 %v4637_v32, %v7899_v52  ;;  %v4639_v39 = vmul.f32 %v7912_v36, %v7912_v36  ;;  %v4641_v43 = vmul.f32 %v7915_v38, %v7915_v38 }
 0xa8b   : > { %v4652_v44 = vmul.f32 %v4636_v58, %v7902_v51  ;;  %v4654_v3 = vmul.f32 %v4638_v25, %v7905_v54  ;;  %v4640_v11 = vmul.f32 %v7922_v14, %v7922_v14  ;;  %v4642_v29 = vmul.f32 %v7925_v1, %v7925_v1 }
 0xa8c   : > { %v4667_v21 = vmul.f32 0.044715, %v4651_v57  ;;  %v4669_v20 = vmul.f32 0.044715, %v4653_v30  ;;  %v4655_v17 = vmul.f32 %v4639_v39, %v7912_v36  ;;  %v4657_v50 = vmul.f32 %v4641_v43, %v7915_v38 }
 0xa8d   : > { %v4668_v6 = vmul.f32 0.044715, %v4652_v44  ;;  %v4670_v7 = vmul.f32 0.044715, %v4654_v3  ;;  %v4656_v19 = vmul.f32 %v4640_v11, %v7922_v14  ;;  %v4658_v12 = vmul.f32 %v4642_v29, %v7925_v1  ;;  %v4573_v5 = vpop.f32.mrb[48].mxu0  ;;  %v4626_v34 = vpop.f32.mrb[40].mxu1 }
 0xa8e   : > { %v4683_v45 = vadd.f32 %v4667_v21, %v7896_v22  ;;  %v4685_v33 = vadd.f32 %v4669_v20, %v7899_v52  ;;  %v4671_v40 = vmul.f32 0.044715, %v4655_v17  ;;  %v4673_v23 = vmul.f32 0.044715, %v4657_v50  ;;  %v4575_v35 = vpop.f32.mrb[49].mxu0  ;;  %v4628_v8 = vpop.f32.mrb[41].mxu1 }
 0xa8f   : > { %v4684_v28 = vadd.f32 %v4668_v6, %v7902_v51  ;;  %v4686_v10 = vadd.f32 %v4670_v7, %v7905_v54  ;;  %v4672_v9 = vmul.f32 0.044715, %v4656_v19  ;;  %v4674_v13 = vmul.f32 0.044715, %v4658_v12  ;;  %v4577_v41 = vpop.f32.mrb[50].mxu0  ;;  %v4630_v0 = vpop.f32.mrb[42].mxu1 }
 0xa90   : > { %v4699_v31 = vmul.f32 0.7978846, %v4683_v45  ;;  %v4701_v55 = vmul.f32 0.7978846, %v4685_v33  ;;  %v4687_v24 = vadd.f32 %v4671_v40, %v7912_v36  ;;  %v4689_v16 = vadd.f32 %v4673_v23, %v7915_v38  ;;  %v4579_v27 = vpop.f32.mrb[51].mxu0  ;;  %v4632_v49 = vpop.f32.mrb[43].mxu1 }
 0xa91   : > { %v4700_v15 = vmul.f32 0.7978846, %v4684_v28  ;;  %v4702_v62 = vmul.f32 0.7978846, %v4686_v10  ;;  %v4688_v59 = vadd.f32 %v4672_v9, %v7922_v14  ;;  %v4690_v32 = vadd.f32 %v4674_v13, %v7925_v1 }
 0xa92   : > { %6142 = vtanh.f32 %v4699_v31  ;;  %v4703_v53 = vmul.f32 0.7978846, %v4687_v24  ;;  %v4705_v47 = vmul.f32 0.7978846, %v4689_v16  ;;  %v7952_v58 = vadd.f32 %v4573_v5, %v7882_v61 }
 0xa93   : > { %6144 = vtanh.f32 %v4701_v55  ;;  %v4704_v25 = vmul.f32 0.7978846, %v4688_v59  ;;  %v4706_v57 = vmul.f32 0.7978846, %v4690_v32  ;;  %v7955_v30 = vadd.f32 %v4626_v34, %v7886_v26 }
 0xa94   : > { %6146 = vtanh.f32 %v4700_v15  ;;  %v4643_v39 = vmul.f32 %v7952_v58, %v7952_v58  ;;  %v7960_v43 = vadd.f32 %v4575_v35, %v7889_v2  ;;  %v7963_v44 = vadd.f32 %v4628_v8, %v7893_v56 }
 0xa95   : > { %6148 = vtanh.f32 %v4702_v62  ;;  %v4645_v3 = vmul.f32 %v7955_v30, %v7955_v30  ;;  %v7968_v11 = vadd.f32 %v4577_v41, %v7882_v61  ;;  %v7971_v29 = vadd.f32 %v4630_v0, %v7886_v26 }
 0xa96   : > { %6150 = vtanh.f32 %v4703_v53  ;;  %v4659_v21 = vmul.f32 %v4643_v39, %v7952_v58  ;;  %v4644_v20 = vmul.f32 %v7960_v43, %v7960_v43  ;;  %v4646_v17 = vmul.f32 %v7963_v44, %v7963_v44 }
 0xa97   : > { %6152 = vtanh.f32 %v4705_v47  ;;  %v4661_v50 = vmul.f32 %v4645_v3, %v7955_v30  ;;  %v4647_v6 = vmul.f32 %v7968_v11, %v7968_v11  ;;  %v4649_v61 = vmul.f32 %v7971_v29, %v7971_v29 }
 0xa98   : > { %6154 = vtanh.f32 %v4704_v25  ;;  %v4675_v26 = vmul.f32 0.044715, %v4659_v21  ;;  %v4660_v7 = vmul.f32 %v4644_v20, %v7960_v43  ;;  %v4662_v19 = vmul.f32 %v4646_v17, %v7963_v44 }
 0xa99   : > { %6156 = vtanh.f32 %v4706_v57  ;;  %v4677_v12 = vmul.f32 0.044715, %v4661_v50  ;;  %v4663_v5 = vmul.f32 %v4647_v6, %v7968_v11  ;;  %v4665_v34 = vmul.f32 %v4649_v61, %v7971_v29 }
 0xa9a   : > { %v4691_v45 = vadd.f32 %v4675_v26, %v7952_v58  ;;  %v4676_v33 = vmul.f32 0.044715, %v4660_v7  ;;  %v4678_v40 = vmul.f32 0.044715, %v4662_v19  ;;  %v7989_v23 = vadd.f32 %v4579_v27, %v7889_v2 }
 0xa9b   : > { %v4693_v35 = vadd.f32 %v4677_v12, %v7955_v30  ;;  %v4679_v8 = vmul.f32 0.044715, %v4663_v5  ;;  %v4681_v28 = vmul.f32 0.044715, %v4665_v34  ;;  %v7993_v10 = vadd.f32 %v4632_v49, %v7893_v56 }
 0xa9c   : > { %v6143_v9 = vpop.eup %6142  ;;  %v4707_v13 = vmul.f32 0.7978846, %v4691_v45  ;;  %v4692_v41 = vadd.f32 %v4676_v33, %v7960_v43  ;;  %v4694_v0 = vadd.f32 %v4678_v40, %v7963_v44  ;;  %v4648_v31 = vmul.f32 %v7989_v23, %v7989_v23 }
 0xa9d   : > { %v6145_v55 = vpop.eup %6144  ;;  %v4731_v24 = vadd.f32 1.0, %v6143_v9  ;;  %v4709_v2 = vmul.f32 0.7978846, %v4693_v35  ;;  %v4695_v16 = vadd.f32 %v4679_v8, %v7968_v11  ;;  %v4697_v27 = vadd.f32 %v4681_v28, %v7971_v29 }
 0xa9e   : > { %v6147_v15 = vpop.eup %6146  ;;  %v4733_v62 = vadd.f32 1.0, %v6145_v55  ;;  %6158 = vtanh.f32 %v4707_v13  ;;  %v4708_v56 = vmul.f32 0.7978846, %v4692_v41  ;;  %v4710_v49 = vmul.f32 0.7978846, %v4694_v0 }
 0xa9f   : > { %v6149_v59 = vpop.eup %6148  ;;  %v4747_v32 = vmul.f32 0.5, %v4731_v24  ;;  %6160 = vtanh.f32 %v4709_v2  ;;  %v4711_v53 = vmul.f32 0.7978846, %v4695_v16  ;;  %v4713_v47 = vmul.f32 0.7978846, %v4697_v27 }
 0xaa0   : > { %v6151_v25 = vpop.eup %6150  ;;  %v4749_v57 = vmul.f32 0.5, %v4733_v62  ;;  %6162 = vtanh.f32 %v4708_v56  ;;  %v4664_v39 = vmul.f32 %v4648_v31, %v7989_v23  ;;  %v4650_v3 = vmul.f32 %v7993_v10, %v7993_v10 }
 0xaa1   : > { %v6153_v21 = vpop.eup %6152  ;;  %v4763_v20 = vmul.f32 %v4747_v32, %v7896_v22  ;;  %v4735_v17 = vadd.f32 1.0, %v6151_v25  ;;  %6164 = vtanh.f32 %v4710_v49  ;;  %v4732_v50 = vadd.f32 1.0, %v6147_v15 }
 0xaa2   : > { %v6155_v6 = vpop.eup %6154  ;;  %v4765_v61 = vmul.f32 %v4749_v57, %v7899_v52  ;;  %v4737_v26 = vadd.f32 1.0, %v6153_v21  ;;  %6166 = vtanh.f32 %v4711_v53  ;;  %v4680_v7 = vmul.f32 0.044715, %v4664_v39 }
 0xaa3   : > { %v6157_v19 = vpop.eup %6156  ;;  %v4751_v12 = vmul.f32 0.5, %v4735_v17  ;;  %6168 = vtanh.f32 %v4713_v47  ;;  %v4666_v5 = vmul.f32 %v4650_v3, %v7993_v10  ;;  %v4736_v34 = vadd.f32 1.0, %v6155_v6 }
 0xaa4   : > { %v4753_v45 = vmul.f32 0.5, %v4737_v26  ;;  %v4696_v33 = vadd.f32 %v4680_v7, %v7989_v23  ;;  %v4748_v40 = vmul.f32 0.5, %v4732_v50  ;;  %v4734_v22 = vadd.f32 1.0, %v6149_v59 }
 0xaa5   : > { %v4767_v35 = vmul.f32 %v4751_v12, %v7912_v36  ;;  %v4682_v8 = vmul.f32 0.044715, %v4666_v5  ;;  %v4752_v28 = vmul.f32 0.5, %v4736_v34  ;;  %v4738_v9 = vadd.f32 1.0, %v6157_v19 }
 0xaa6   : > { %v4769_v52 = vmul.f32 %v4753_v45, %v7915_v38  ;;  %v4712_v13 = vmul.f32 0.7978846, %v4696_v33  ;;  %v4764_v41 = vmul.f32 %v4748_v40, %v7902_v51  ;;  %v4750_v0 = vmul.f32 0.5, %v4734_v22 }
 0xaa7   : > { %v4779_v31 = vpack.c.bf16 %v4767_v35, %v4763_v20  ;;  %v4698_v55 = vadd.f32 %v4682_v8, %v7993_v10  ;;  %v4768_v24 = vmul.f32 %v4752_v28, %v7922_v14  ;;  %v4754_v2 = vmul.f32 0.5, %v4738_v9 }
 0xaa8   : > { %v6159_v16 = vpop.eup %6158  ;;  %v4781_v27 = vpack.c.bf16 %v4769_v52, %v4765_v61  ;;  %6170 = vtanh.f32 %v4712_v13  ;;  %v4766_v36 = vmul.f32 %v4750_v0, %v7905_v54  ;;  %v4853_v28 = vsub.s32 5, %v6798_v60 }
 0xaa9   : > { %v6161_v15 = vpop.eup %6160  ;;  %v4714_v62 = vmul.f32 0.7978846, %v4698_v55  ;;  %v4780_v56 = vpack.c.bf16 %v4768_v24, %v4764_v41  ;;  %v4770_v38 = vmul.f32 %v4754_v2, %v7925_v1  ;;  %v4739_v49 = vadd.f32 1.0, %v6159_v16 }
 0xaaa   : > { %v6163_v59 = vpop.eup %6162  ;;  %v4741_v51 = vadd.f32 1.0, %v6161_v15  ;;  %v4854_v52 = vrot.slane %v7767_v18, %v4853_v28 }
 0xaab   : > { %v6165_v32 = vpop.eup %6164  ;;  %6172 = vtanh.f32 %v4714_v62  ;;  %5079 = vmatprep.mubr.bf16.mxu0 %v4780_v56  ;;  %v4782_v53 = vpack.c.bf16 %v4770_v38, %v4766_v36  ;;  %v4755_v57 = vmul.f32 0.5, %v4739_v49  ;;  %v4740_v3 = vadd.f32 1.0, %v6163_v59 }
 0xaac   : > { %v6167_v47 = vpop.eup %6166  ;;  %5080 = vmatmul.mubr.bf16.vlgmr.msra.gmra.mrb[52].mxu0 %v4779_v31  ;;  %v4757_v39 = vmul.f32 0.5, %v4741_v51  ;;  %v4742_v6 = vadd.f32 1.0, %v6165_v32 }
 0xaad   : > { %v6169_v14 = vpop.eup %6168  ;;  %5128 = vmatprep.mubr.bf16.mxu1 %v4782_v53  ;;  %v4743_v25 = vadd.f32 1.0, %v6167_v47  ;;  %v4771_v1 = vmul.f32 %v4755_v57, %v7952_v58  ;;  %v4756_v19 = vmul.f32 0.5, %v4740_v3 }
 0xaae   : > { %5129 = vmatmul.mubr.bf16.vlgmr.msra.gmra.mrb[44].mxu1 %v4781_v27  ;;  %v4745_v54 = vadd.f32 1.0, %v6169_v14  ;;  %v4773_v61 = vmul.f32 %v4757_v39, %v7955_v30  ;;  %v4758_v40 = vmul.f32 0.5, %v4742_v6 }
 0xaaf   : > { %v4759_v21 = vmul.f32 0.5, %v4743_v25  ;;  %v4772_v22 = vmul.f32 %v4756_v19, %v7960_v43 }
 0xab0   : > { %v4761_v20 = vmul.f32 0.5, %v4745_v54  ;;  %v4774_v8 = vmul.f32 %v4758_v40, %v7963_v44 }
 0xab1   : > { %v4775_v17 = vmul.f32 %v4759_v21, %v7968_v11 }
 0xab2   : > { %v6171_v50 = vpop.eup %6170  ;;  %v4777_v26 = vmul.f32 %v4761_v20, %v7971_v29 }
 0xab3   : > { %v4744_v7 = vadd.f32 1.0, %v6171_v50  ;;  %v4783_v12 = vpack.c.bf16 %v4775_v17, %v4771_v1 }
 0xab4   : > { %v4785_v5 = vpack.c.bf16 %v4777_v26, %v4773_v61 }
 0xab5   : > { %v6173_v34 = vpop.eup %6172  ;;  %v4760_v45 = vmul.f32 0.5, %v4744_v7 }
 0xab6   : > { %v4746_v33 = vadd.f32 1.0, %v6173_v34 }
 0xab7   : > { %v4776_v58 = vmul.f32 %v4760_v45, %v7989_v23 }
 0xab8   : > { %v4762_v35 = vmul.f32 0.5, %v4746_v33 }
 0xab9   : > { %v4784_v11 = vpack.c.bf16 %v4776_v58, %v4772_v22 }
 0xaba   : > { %v4778_v30 = vmul.f32 %v4762_v35, %v7993_v10 }
 0xabb   : > { %5087 = vmatprep.mubr.bf16.mxu0 %v4784_v11 }
 0xabc   : > { %v4786_v29 = vpack.c.bf16 %v4778_v30, %v4774_v8  ;;  %5088 = vmatmul.mubr.bf16.gmra.mrb[56].mxu0 %v4783_v12 }
 0xabe   : > { %5136 = vmatprep.mubr.bf16.mxu1 %v4786_v29 }
 0xabf   : > { %5137 = vmatmul.mubr.bf16.gmra.mrb[48].mxu1 %v4785_v5 }
 0xb7f   : > { %v5643_v9 = vpop.f32.mrb[52].mxu0 }
 0xb80   : > { %v5644_v13 = vpop.f32.mrb[53].mxu0 }
 0xb81   : > { %v5671_v43 = vpop.f32.mrb[44].mxu1  ;;  %v5645_v41 = vadd.f32 %v5644_v13, %v5643_v9  ;;  %v5646_v23 = vpop.f32.mrb[54].mxu0 }
 0xb82   : > { %v5672_v0 = vpop.f32.mrb[45].mxu1  ;;  %v5647_v31 = vpop.f32.mrb[55].mxu0 }
 0xb83   : > { %v5082_v55 = vadd.f32 %v5645_v41, %v4854_v52  ;;  %v5673_v44 = vadd.f32 %v5672_v0, %v5671_v43  ;;  %v5674_v24 = vpop.f32.mrb[46].mxu1  ;;  %v5648_v10 = vadd.f32 %v5647_v31, %v5646_v23 }
 0xb84   : > { %v5675_v2 = vpop.f32.mrb[47].mxu1 }
 0xb85   : > { %v5131_v16 = vadd.f32 %v5673_v44, %v5082_v55  ;;  %v5085_v27 = vadd.f32 %v5648_v10, %v4854_v52  ;;  %v5676_v36 = vadd.f32 %v5675_v2, %v5674_v24 }
 0xb87   : > { %v5145_v15 = vadd.f32 %v5131_v16, %v7772_v48  ;;  %v5134_v60 = vadd.f32 %v5676_v36, %v5085_v27 }
 0xb89   : > { %v5146_v62 = vadd.f32 %v5134_v60, %v7774_v42  ;;  %5153 = vst [vmem:[#allocation11] sm:$0xff] (!%p5566_p11), %v5145_v15 }
 0xb8b   : > { %5154 = vst [vmem:[#allocation11 + $0x8] sm:$0xff] (!%p5566_p11), %v5146_v62 }
 0xb8f   : > { %v5649_v18 = vpop.f32.mrb[56].mxu0 }
 0xb90   : > { %v5650_v56 = vpop.f32.mrb[57].mxu0 }
 0xb91   : > { %v5651_v38 = vadd.f32 %v5650_v56, %v5649_v18  ;;  %v5652_v49 = vpop.f32.mrb[58].mxu0 }
 0xb92   : > { %v5677_v59 = vpop.f32.mrb[48].mxu1  ;;  %v5653_v51 = vpop.f32.mrb[59].mxu0 }
 0xb93   : > { %v5090_v32 = vadd.f32 %v5651_v38, %v4854_v52  ;;  %v5678_v53 = vpop.f32.mrb[49].mxu1  ;;  %v5654_v47 = vadd.f32 %v5653_v51, %v5652_v49 }
 0xb94   : > { %v5679_v14 = vadd.f32 %v5678_v53, %v5677_v59  ;;  %v5680_v25 = vpop.f32.mrb[50].mxu1  ;;  %5152 = sbr.rel (%p5566_p11) target bundleno = 2973 (0xb9d), region = 80 }
 0xb95   : > { %v5093_v57 = vadd.f32 %v5654_v47, %v4854_v52  ;;  %v5681_v54 = vpop.f32.mrb[51].mxu1 }
 0xb96   : > { %v5139_v39 = vadd.f32 %v5679_v14, %v5090_v32  ;;  %v5682_v3 = vadd.f32 %v5681_v54, %v5680_v25 }
 0xb98   : > { %v5147_v48 = vadd.f32 %v5139_v39, %v7777_v46  ;;  %v5142_v21 = vadd.f32 %v5682_v3, %v5093_v57 }
 0xb9a   : > { %v5148_v42 = vadd.f32 %v5142_v21, %v7781_v37  ;;  %5155 = vst [vmem:[#allocation11 + $0x10] sm:$0xff] (!%p5566_p11), %v5147_v48 }
 0xb9c   : > { %5156 = vst [vmem:[#allocation11 + $0x18] sm:$0xff] %v5148_v42 }
 0xb9d PF: > { %p5567_p6 = scmp.ne.s32.totalorder %s6611_s24, 1 }
 0xb9e   : > { %5162 = vadd.xlane.f32.xlu0 (!%p5567_p6), %v5145_v15  ;;  %5166 = vadd.xlane.f32.xlu1 (!%p5567_p6), %v5147_v48  ;;  %v5161_v13 = vld [vmem:[%s8079_s7] sm:$0x3] (!%p5567_p6) }
 0xb9f   : > { %5160 = sbr.rel (%p5567_p6) target bundleno = 3294 (0xcde), region = 84  ;;  %v5209_v41 = vrot.slane (!%p5567_p6), %v5161_v13, %v6801_v63  ;;  %v5217_v31 = vrot.slane (!%p5567_p6), %v5161_v13, %v6807_v4 }
 0xba2   : > { %5164 = vadd.xlane.f32.xlu0 (!%p5567_p6), %v5146_v62  ;;  %5168 = vadd.xlane.f32.xlu1 (!%p5567_p6), %v5148_v42 }
 0xc2b   : > { %v5163_v20 = vpop.xlane.xlu0 %5162  ;;  %v5167_v46 = vpop.xlane.xlu1 %5166 }
 0xc2c   : > { %v5170_v1 = vmul.f32 0.0078125, %v5163_v20  ;;  %v5172_v17 = vmul.f32 0.0078125, %v5167_v46 }
 0xc2e   : > { %v5174_v37 = vsub.f32 %v5145_v15, %v5170_v1  ;;  %v5176_v50 = vsub.f32 %v5147_v48, %v5172_v17 }
 0xc2f   : > { %v5165_v6 = vpop.xlane.xlu0 %5164  ;;  %v5169_v61 = vpop.xlane.xlu1 %5168 }
 0xc30   : > { %v5171_v26 = vmul.f32 0.0078125, %v5165_v6  ;;  %v5178_v7 = vmul.f32 %v5174_v37, %v5174_v37  ;;  %v5173_v19 = vmul.f32 0.0078125, %v5169_v61  ;;  %v5180_v34 = vmul.f32 %v5176_v50, %v5176_v50 }
 0xc32   : > { %v5175_v12 = vsub.f32 %v5146_v62, %v5171_v26  ;;  %5182 = vadd.xlane.f32.xlu0 %v5178_v7  ;;  %v5177_v5 = vsub.f32 %v5148_v42, %v5173_v19 }
 0xc34   : > { %v5179_v45 = vmul.f32 %v5175_v12, %v5175_v12  ;;  %v5181_v33 = vmul.f32 %v5177_v5, %v5177_v5 }
 0xc36   : > { %5186 = vadd.xlane.f32.xlu0 %v5180_v34  ;;  %5184 = vadd.xlane.f32.xlu1 %v5179_v45 }
 0xc3a   : > { %5188 = vadd.xlane.f32.xlu1 %v5181_v33 }
 0xcbf   : > { %v5183_v40 = vpop.xlane.xlu0 %5182 }
 0xcc0   : > { %v5190_v22 = vmul.f32 0.0078125, %v5183_v40 }
 0xcc2   : > { %v5194_v58 = vadd.f32 1e-05, %v5190_v22 }
 0xcc3   : > { %v5185_v35 = vpop.xlane.xlu1 %5184  ;;  %v5187_v11 = vpop.xlane.xlu0 %5186 }
 0xcc4   : > { %6179 = vrsqrt.f32 %v5194_v58  ;;  %v5191_v8 = vmul.f32 0.0078125, %v5185_v35  ;;  %v5192_v30 = vmul.f32 0.0078125, %v5187_v11 }
 0xcc6   : > { %v5195_v29 = vadd.f32 1e-05, %v5191_v8  ;;  %v5196_v28 = vadd.f32 1e-05, %v5192_v30 }
 0xcc7   : > { %v5189_v9 = vpop.xlane.xlu1 %5188 }
 0xcc8   : > { %6181 = vrsqrt.f32 %v5195_v29  ;;  %v5193_v52 = vmul.f32 0.0078125, %v5189_v9 }
 0xcc9   : > { %6183 = vrsqrt.f32 %v5196_v28 }
 0xcca   : > { %v5197_v43 = vadd.f32 1e-05, %v5193_v52 }
 0xccc   : > { %6185 = vrsqrt.f32 %v5197_v43 }
 0xcce   : > { %v6180_v23 = vpop.eup %6179 }
 0xccf   : > { %v5202_v0 = vmul.f32 %v6180_v23, %v5174_v37 }
 0xcd1   : > { %v5210_v55 = vmul.f32 %v5209_v41, %v5202_v0 }
 0xcd2   : > { %v6182_v44 = vpop.eup %6181 }
 0xcd3   : > { %v6184_v24 = vpop.eup %6183  ;;  %v5218_v10 = vadd.f32 %v5217_v31, %v5210_v55  ;;  %v5203_v2 = vmul.f32 %v6182_v44, %v5175_v12 }
 0xcd4   : > { %v5204_v16 = vmul.f32 %v6184_v24, %v5176_v50 }
 0xcd5   : > { %5222 = vst [vmem:[#allocation11] sm:$0xff] %v5218_v10  ;;  %v5211_v27 = vmul.f32 %v5209_v41, %v5203_v2 }
 0xcd6   : > { %v6186_v36 = vpop.eup %6185  ;;  %v5212_v15 = vmul.f32 %v5209_v41, %v5204_v16 }
 0xcd7   : > { %v5219_v60 = vadd.f32 %v5217_v31, %v5211_v27  ;;  %v5205_v62 = vmul.f32 %v6186_v36, %v5177_v5 }
 0xcd8   : > { %v5220_v18 = vadd.f32 %v5217_v31, %v5212_v15 }
 0xcd9   : > { %5223 = vst [vmem:[#allocation11 + $0x8] sm:$0xff] %v5219_v60  ;;  %v5213_v56 = vmul.f32 %v5209_v41, %v5205_v62 }
 0xcda   : > { %5224 = vst [vmem:[#allocation11 + $0x10] sm:$0xff] %v5220_v18 }
 0xcdb   : > { %v5221_v63 = vadd.f32 %v5217_v31, %v5213_v56 }
 0xcdd   : > { %5225 = vst [vmem:[#allocation11 + $0x18] sm:$0xff] %v5221_v63 }
 0xcde PF: > { %p5858_p7 = scmp.eq.s32.totalorder %s6611_s24, 1  ;;  %s6430_s26 = smov [#allocation11]  }
 0xcdf   : > { %s5232_s20 = sshll.u32 %s6430_s26, 4  ;;  %s5233_s20 = int_to_ptr.vmem [resolvable:$true] %s5232_s20 }
 0xce0   : > { %s6335_s5 = scalar_lea.vmem %s5233_s20, 512  ;;  %p6342_p1 = scmp.lt.s32.totalorder %s5233_s20, %s5233_s20 }
 0xce1   : > { %p6336_p8 = scmp.ne.s32.totalorder %s5233_s20, %s6335_s5  ;;  %p6343_p9 = scmp.lt.s32.totalorder %s6335_s5, %s6335_s5 }
 0xce3   : > { %p6337_p10 = pnand %p6336_p8, %p5858_p7  ;;  %p6344_p5 = por %p6343_p9, %p6342_p1 }
 0xce5   : > { %p6338_p12 = pneg %p6337_p10 }
 0xce7   : > { %p6345_p0 = pnand %p6344_p5, %p6338_p12 }
 0xce9   : > { %6348 = shalt.err (!%p6345_p0)
}
 0xcea   : > { %s8112_s22 = sld [smem:[#allocation21_spill]] }
 0xcf0   : > { %s6349_s11 = scalar_lea.hbm %s8112_s22, 512 }
 0xcf1   : > { %p6350_p13 = scmp.ne.s32.totalorder %s8112_s22, %s6349_s11  ;;  %p6355_p4 = scmp.lt.u32.totalorder %s6349_s11, %s8112_s22 }
 0xcf3   : > { %p6351_p3 = pnand %p6350_p13, %p5858_p7 }
 0xcf5   : > { %p6352_p2 = pneg %p6351_p3 }
 0xcf7   : > { %p6357_p11 = pnand %p6355_p4, %p6352_p2 }
 0xcf9   : > { %6360 = shalt.err (!%p6357_p11)
}
 0xcfa   : > { %s6431_s17 = smov 128   ;;  %s6432_s21 = smov 8  }
 0xcfb   : > { %5835 = dma.vmem_to_hbm [thread:$0]  (%p5858_p7), %s5233_s20, 512, %s8112_s22, [#allocation4], %s6431_s17, %s6431_s17, %s6432_s21  }
 0xcfc   : > { %6390 = dma.done.wait (%p5858_p7), [#allocation4], 512  }
 0xcfd   : > { %6392 = vsyncadd (%p5858_p7), [#allocation4], 4294966784 }
 0xcfe PF: > { %s8113_s30 = sld [smem:[#allocation17_spill]]  ;;  %s8114_s12 = sld [smem:[#allocation16_spill]] }
 0xcff   : > { %s8115_s29 = sld [smem:[#allocation18_spill]]  ;;  %s8116_s27 = smov %s6399_s28 }
 0xd04   : > { %p23_p6 = scmp.ge.s32.totalorder %s8113_s30, 4   ;;  %s8117_s28 = smov %s8114_s12 }
 0xd06   :  { %25 = sbr.rel (!%p23_p6) target bundleno = 11 (0xb), region = 147 }
 0xd0d   :  { %5248 = vsyncpa [#allocation3], 1 }
 0xd0e   :  { %5250 = vsyncpa [#allocation3 + $0x1], 1 }
 0xd0f   :  { %5251 = vsyncpa [#allocation6], 1 }
 0xd10   :  { %5253 = vsyncpa [#allocation6 + $0x1], 1 }
 0xd11   :  { %5254 = vsyncpa [#allocation9], 1 }
 0xd12   :  { %5256 = vsyncpa [#allocation9 + $0x1], 1 }
 0xd13   :  { %5257 = vsyncpa [#allocation4], 1 }
 0xd14   :  { %5259 = vsyncpa [#allocation4 + $0x1], 1 }

</bundles_post_ra>
